<compile_context>
chip_gen: v6e
topology: v6e:2x2x1
jax: 0.10.0
libtpu: 0.0.40
codegen_flags: <defaults>
</compile_context>

<pallas_src>
import functools

import jax
import jax.numpy as jnp
import numpy as np
from jax.experimental import pallas as pl
from jax.experimental.pallas import tpu as pltpu

LEAKY_SLOPE = 0.01
C1, C2, C3 = 256, 128, 64  # channels after fc / convT1 / convT2


# ----------------------------------------------------------------------------
# The fused Pallas kernel (one image per grid step)
# ----------------------------------------------------------------------------
def _generator_kernel(z_ref, fcw_ref, fcb_ref, r1_ref, b1_ref, r2_ref, b2_ref,
                      w3_ref, b3_ref, o_ref, a1, a2, a3, *, H, W):
    h1, w1 = H // 4, W // 4
    h2, w2 = H // 2, W // 2
    h3, w3 = H, W
    W1p, W2p, W3p = w1 + 1, w2 + 1, w3 + 1          # guarded row widths
    P1, P2, P3 = h1 * W1p, h2 * W2p, h3 * W3p       # guarded spatial extents
    T3 = W3p + 1                                     # top halo rows of a3

    # Guards / halo rows must be zero for every image (scratch persists
    # across grid steps); interiors are fully overwritten below.
    a1[...] = jnp.zeros_like(a1)
    a2[...] = jnp.zeros_like(a2)
    a3[...] = jnp.zeros_like(a3)

    # ------------------ decoder_input: Linear(z_dim -> 16*H*W) ---------------
    # fc columns are pre-permuted to NHWC order, so column s*C1+c is spatial s,
    # channel c.  Scatter rows into the guarded-flat layer-1 scratch.
    fc = jnp.dot(z_ref[0], fcw_ref[...], preferred_element_type=jnp.float32)
    fc = fc + fcb_ref[...]                           # (1, h1*w1*C1) f32
    for s in range(h1 * w1):
        m, n = divmod(s, w1)
        r = m * W1p + n
        a1[r:r + 1, :] = fc[:, s * C1:(s + 1) * C1]

    # --------------- ConvTranspose2d(k=3,s=2,p=1,op=1) + LeakyReLU -----------
    def convt(a_ref, r_ref, b_ref, P, Wp):
        # Shifted windows of the guarded-flat image.  The zero guard column and
        # bottom halo make the +1 taps read zeros -- no masks required.
        x0 = a_ref[0:P, :]                 # x[m, n]
        x1 = a_ref[1:P + 1, :]             # x[m, n+1]
        xr = a_ref[Wp:Wp + P, :]           # x[m+1, n]
        xr1 = a_ref[Wp + 1:Wp + 1 + P, :]  # x[m+1, n+1]
        lhs = jnp.concatenate([x0, x1, xr, xr1], axis=1).astype(jnp.bfloat16)
        y = jnp.dot(lhs, r_ref[...], preferred_element_type=jnp.float32)
        y = y + b_ref[...]
        return jnp.where(y >= 0, y, LEAKY_SLOPE * y)  # (P, 4*cout) f32

    def scatter_phases(y, dst_ref, hin, win, wp_in, wp_out, cout, top):
        # y columns are [phase00 | phase01 | phase10 | phase11].  Interleave the
        # 2x2 sub-pixel phases into the next layer's guarded-flat scratch with
        # sublane-strided stores (stride 2 over rows), skipping guard rows.
        for ph in range(2):
            for pw in range(2):
                c0 = (2 * ph + pw) * cout
                for m in range(hin):
                    src = y[m * wp_in:m * wp_in + win, c0:c0 + cout]
                    dst = top + (2 * m + ph) * wp_out + pw
                    dst_ref[pl.ds(dst, win, stride=2), :] = src

    y1 = convt(a1, r1_ref, b1_ref, P1, W1p)          # (P1, 4*C2)
    scatter_phases(y1, a2, h1, w1, W1p, W2p, C2, 0)

    y2 = convt(a2, r2_ref, b2_ref, P2, W2p)          # (P2, 4*C3)
    scatter_phases(y2, a3, h2, w2, W2p, W3p, C3, T3)

    # --------------------- Conv2d(C3 -> 1, k=3, p=1) on the VPU --------------
    acc = jnp.zeros((P3, C3), jnp.float32)
    for t in range(9):
        dr, ds = t // 3 - 1, t % 3 - 1
        start = T3 + dr * W3p + ds
        acc = acc + a3[start:start + P3, :] * w3_ref[t:t + 1, :]
    col = jnp.sum(acc, axis=1, keepdims=True) + b3_ref[...]   # (P3, 1)
    for m in range(h3):                               # drop guard-column rows
        o_ref[0, m * w3:(m + 1) * w3, :] = col[m * W3p:m * W3p + w3, :]


# ----------------------------------------------------------------------------
# Wrapper: one fused pallas_call for the whole forward pass
# ----------------------------------------------------------------------------
def generator_forward(z, prepped, X_shape):
    _, H, W = X_shape
    n, zd = z.shape
    h1, w1 = H // 4, W // 4
    h2, w2 = H // 2, W // 2
    d_fc = 16 * H * W

    a1_rows = (h1 + 1) * (w1 + 1) + 1
    a2_rows = (h2 + 1) * (w2 + 1) + 1
    a3_rows = H * (W + 1) + 2 * (W + 2)

    z3 = z.astype(jnp.bfloat16).reshape(n, 1, zd)

    out = pl.pallas_call(
        functools.partial(_generator_kernel, H=H, W=W),
        out_shape=jax.ShapeDtypeStruct((n, H * W, 1), jnp.float32),
        grid=(n,),
        in_specs=[
            pl.BlockSpec((1, 1, zd), lambda b: (b, 0, 0)),        # z (per image)
            pl.BlockSpec((zd, d_fc), lambda b: (0, 0)),           # fc weight
            pl.BlockSpec((1, d_fc), lambda b: (0, 0)),            # fc bias
            pl.BlockSpec((4 * C1, 4 * C2), lambda b: (0, 0)),     # convT1 packed RHS
            pl.BlockSpec((1, 4 * C2), lambda b: (0, 0)),          # convT1 bias (x4)
            pl.BlockSpec((4 * C2, 4 * C3), lambda b: (0, 0)),     # convT2 packed RHS
            pl.BlockSpec((1, 4 * C3), lambda b: (0, 0)),          # convT2 bias (x4)
            pl.BlockSpec((9, C3), lambda b: (0, 0)),              # conv3 taps
            pl.BlockSpec((1, 1), lambda b: (0, 0)),               # conv3 bias
        ],
        out_specs=pl.BlockSpec((1, H * W, 1), lambda b: (b, 0, 0)),
        scratch_shapes=[
            pltpu.VMEM((a1_rows, C1), jnp.float32),   # guarded layer-1 input
            pltpu.VMEM((a2_rows, C2), jnp.float32),   # guarded layer-2 input
            pltpu.VMEM((a3_rows, C3), jnp.float32),   # guarded layer-3 input
        ],
        compiler_params=pltpu.CompilerParams(dimension_semantics=("parallel",)),
    )(z3, prepped["fc_w"], prepped["fc_b"], prepped["ct1_rhs"], prepped["ct1_b"],
      prepped["ct2_rhs"], prepped["ct2_b"], prepped["c3_w"], prepped["c3_b"])

    return jnp.squeeze(out.reshape(n, H, W))


# ----------------------------------------------------------------------------
# One-time parameter relayout (outside jit)
# ----------------------------------------------------------------------------
def prepare_params(params, X_shape):
    _, H, W = X_shape
    h1, w1 = H // 4, W // 4
    s = h1 * w1

    # fc columns: NCHW flat (c*s + sp) -> NHWC flat (sp*C1 + c)
    sp = np.arange(s)
    ch = np.arange(C1)
    perm = (ch[None, :] * s + sp[:, None]).reshape(-1)

    def pack_convt(w):  # w: (cin, cout, 3, 3) -> (4*cin, 4*cout) bf16
        cin, cout = w.shape[0], w.shape[1]
        zero = jnp.zeros((cin, cout), jnp.float32)
        tap = lambda kh, kw: w[:, :, kh, kw].astype(jnp.float32)
        # Output column order per row-block: [phase00 | phase01 | phase10 | phase11]
        r_x0 = jnp.concatenate([tap(1, 1), tap(1, 2), tap(2, 1), tap(2, 2)], 1)
        r_x1 = jnp.concatenate([zero, tap(1, 0), zero, tap(2, 0)], 1)
        r_xr = jnp.concatenate([zero, zero, tap(0, 1), tap(0, 2)], 1)
        r_xr1 = jnp.concatenate([zero, zero, zero, tap(0, 0)], 1)
        return jnp.concatenate([r_x0, r_x1, r_xr, r_xr1], 0).astype(jnp.bfloat16)

    return {
        "fc_w": jnp.asarray(params["fc_w"][:, perm], jnp.bfloat16),
        "fc_b": jnp.asarray(params["fc_b"][:, perm], jnp.float32),
        "ct1_rhs": pack_convt(params["ct1_w"]),
        "ct1_b": jnp.tile(params["ct1_b"].reshape(1, -1).astype(jnp.float32), (1, 4)),
        "ct2_rhs": pack_convt(params["ct2_w"]),
        "ct2_b": jnp.tile(params["ct2_b"].reshape(1, -1).astype(jnp.float32), (1, 4)),
        # Conv2d weight (1, C3, 3, 3) -> (9, C3), row t = kh*3 + kw
        "c3_w": jnp.transpose(params["c3_w"][0], (1, 2, 0)).reshape(9, C3)
                  .astype(jnp.float32),
        "c3_b": params["c3_b"].reshape(1, 1).astype(jnp.float32),
    }


# ----------------------------------------------------------------------------
# Pure-JAX f32 reference (PyTorch semantics) for the correctness check
# ----------------------------------------------------------------------------
def ref_forward(z, params, X_shape):
    _, H, W = X_shape
    n = z.shape[0]
    y = z @ params["fc_w"] + params["fc_b"]
    x = y.reshape(n, 256, H // 4, W // 4)

    def leaky(v):
        return jnp.where(v >= 0, v, LEAKY_SLOPE * v)

    def convT(x, w, b):  # w: (Cin, Cout, 3, 3)
        w_flip = jnp.flip(w, (2, 3)).transpose(1, 0, 2, 3)  # OIHW
        y = jax.lax.conv_general_dilated(
            x, w_flip, window_strides=(1, 1), padding=((1, 2), (1, 2)),
            lhs_dilation=(2, 2), dimension_numbers=("NCHW", "OIHW", "NCHW"))
        return y + b.reshape(1, -1, 1, 1)

    def conv(x, w, b):  # w: (Cout, Cin, 3, 3)
        y = jax.lax.conv_general_dilated(
            x, w, window_strides=(1, 1), padding=((1, 1), (1, 1)),
            dimension_numbers=("NCHW", "OIHW", "NCHW"))
        return y + b.reshape(1, -1, 1, 1)

    x = leaky(convT(x, params["ct1_w"], params["ct1_b"]))
    x = leaky(convT(x, params["ct2_w"], params["ct2_b"]))
    x = conv(x, params["c3_w"], params["c3_b"])
    return jnp.squeeze(x)


# ----------------------------------------------------------------------------
# Deterministic parameter init (synthetic; shapes match nn.Module __init__)
# ----------------------------------------------------------------------------
def init_params(keys, z_dim, X_shape):
    _, H, W = X_shape

    def uinit(k, shape, fan_in):
        bound = 1.0 / np.sqrt(fan_in)
        return jax.random.uniform(k, shape, jnp.float32, -bound, bound)

    d_fc = 16 * H * W
    return {
        "fc_w": uinit(keys[0], (z_dim, d_fc), z_dim),        # Linear (in, out)
        "fc_b": uinit(keys[1], (1, d_fc), z_dim),
        "ct1_w": uinit(keys[2], (256, 128, 3, 3), 256 * 9),  # ConvT2d (Cin,Cout,3,3)
        "ct1_b": uinit(keys[3], (128,), 256 * 9),
        "ct2_w": uinit(keys[4], (128, 64, 3, 3), 128 * 9),
        "ct2_b": uinit(keys[5], (64,), 128 * 9),
        "c3_w": uinit(keys[6], (1, 64, 3, 3), 64 * 9),       # Conv2d (Cout,Cin,3,3)
        "c3_b": uinit(keys[7], (1,), 64 * 9),
    }


if __name__ == "__main__":
    X_shape = (2, 16, 16)  # (B, H, W): H, W divisible by 4
    z_dim = 32
    N = X_shape[0]

    key = jax.random.PRNGKey(0)
    kz, *pkeys = jax.random.split(key, 9)
    params = init_params(pkeys, z_dim, X_shape)
    z = jax.random.normal(kz, (N, z_dim), jnp.float32)

    prepped = prepare_params(params, X_shape)  # one-time relayout, not jitted
    fwd = jax.jit(functools.partial(generator_forward, X_shape=X_shape))
    out = jax.block_until_ready(fwd(z, prepped))

    ref = ref_forward(z, params, X_shape)
    assert out.shape == (N, X_shape[1], X_shape[2]), out.shape
    np.testing.assert_allclose(np.asarray(out), np.asarray(ref), rtol=1e-2, atol=1e-2)

    print("KERNEL_OK")
</pallas_src>

<mosaic_0001>
module attributes {stable_mosaic.version = 11 : i64} {
  func.func @_generator_kernel(%arg0: i32, %arg1: memref<1x1x32xbf16, #tpu.memory_space<vmem>>, %arg2: memref<32x4096xbf16, #tpu.memory_space<vmem>>, %arg3: memref<1x4096xf32, #tpu.memory_space<vmem>>, %arg4: memref<1024x512xbf16, #tpu.memory_space<vmem>>, %arg5: memref<1x512xf32, #tpu.memory_space<vmem>>, %arg6: memref<512x256xbf16, #tpu.memory_space<vmem>>, %arg7: memref<1x256xf32, #tpu.memory_space<vmem>>, %arg8: memref<9x64xf32, #tpu.memory_space<vmem>>, %arg9: memref<1x1xf32, #tpu.memory_space<vmem>>, %arg10: memref<1x256x1xf32, #tpu.memory_space<vmem>>, %arg11: memref<26x256xf32, #tpu.memory_space<vmem>>, %arg12: memref<82x128xf32, #tpu.memory_space<vmem>>, %arg13: memref<308x64xf32, #tpu.memory_space<vmem>>) attributes {dimension_semantics = [#tpu.dimension_semantics<parallel>], iteration_bounds = array<i64: 2>, scalar_prefetch = 0 : i64, scratch_operands = 3 : i64, tpu.core_type = #tpu.core_type<tc>, window_params = [{transform_indices = @transform_0, window_bounds = array<i64: 1, 1, 32>}, {pipeline_mode = #tpu.pipeline_mode<synchronous>, transform_indices = @transform_1, window_bounds = array<i64: 32, 4096>}, {pipeline_mode = #tpu.pipeline_mode<synchronous>, transform_indices = @transform_2, window_bounds = array<i64: 1, 4096>}, {pipeline_mode = #tpu.pipeline_mode<synchronous>, transform_indices = @transform_3, window_bounds = array<i64: 1024, 512>}, {pipeline_mode = #tpu.pipeline_mode<synchronous>, transform_indices = @transform_4, window_bounds = array<i64: 1, 512>}, {pipeline_mode = #tpu.pipeline_mode<synchronous>, transform_indices = @transform_5, window_bounds = array<i64: 512, 256>}, {pipeline_mode = #tpu.pipeline_mode<synchronous>, transform_indices = @transform_6, window_bounds = array<i64: 1, 256>}, {pipeline_mode = #tpu.pipeline_mode<synchronous>, transform_indices = @transform_7, window_bounds = array<i64: 9, 64>}, {pipeline_mode = #tpu.pipeline_mode<synchronous>, transform_indices = @transform_8, window_bounds = array<i64: 1, 1>}, {transform_indices = @transform_9, window_bounds = array<i64: 1, 256, 1>}]} {
    %cst = arith.constant 0.000000e+00 : f32
    %0 = vector.broadcast %cst : f32 to vector<26x256xf32>
    %c0 = arith.constant 0 : index
    %c0_0 = arith.constant 0 : index
    %1 = vector.load %arg11[%c0, %c0_0] : memref<26x256xf32, #tpu.memory_space<vmem>>, vector<26x256xf32>
    tpu.vector_store %arg11[%c0, %c0_0], %0 {strides = array<i32>} : memref<26x256xf32, #tpu.memory_space<vmem>>, vector<26x256xf32>,
    %cst_1 = arith.constant 0.000000e+00 : f32
    %2 = vector.broadcast %cst_1 : f32 to vector<82x128xf32>
    %c0_2 = arith.constant 0 : index
    %c0_3 = arith.constant 0 : index
    %3 = vector.load %arg12[%c0_2, %c0_3] : memref<82x128xf32, #tpu.memory_space<vmem>>, vector<82x128xf32>
    tpu.vector_store %arg12[%c0_2, %c0_3], %2 {strides = array<i32>} : memref<82x128xf32, #tpu.memory_space<vmem>>, vector<82x128xf32>,
    %cst_4 = arith.constant 0.000000e+00 : f32
    %4 = vector.broadcast %cst_4 : f32 to vector<308x64xf32>
    %c0_5 = arith.constant 0 : index
    %c0_6 = arith.constant 0 : index
    %5 = vector.load %arg13[%c0_5, %c0_6] : memref<308x64xf32, #tpu.memory_space<vmem>>, vector<308x64xf32>
    tpu.vector_store %arg13[%c0_5, %c0_6], %4 {strides = array<i32>} : memref<308x64xf32, #tpu.memory_space<vmem>>, vector<308x64xf32>,
    %c0_7 = arith.constant 0 : index
    %c0_8 = arith.constant 0 : index
    %c0_9 = arith.constant 0 : index
    %6 = vector.load %arg1[%c0_7, %c0_8, %c0_9] : memref<1x1x32xbf16, #tpu.memory_space<vmem>>, vector<1x1x32xbf16>
    %7 = vector.shape_cast %6 : vector<1x1x32xbf16> to vector<1x32xbf16>
    %c0_10 = arith.constant 0 : index
    %c0_11 = arith.constant 0 : index
    %8 = vector.load %arg2[%c0_10, %c0_11] : memref<32x4096xbf16, #tpu.memory_space<vmem>>, vector<32x4096xbf16>
    %cst_12 = arith.constant dense<0.000000e+00> : vector<1x4096xf32>
    %9 = tpu.matmul %7, %8, %cst_12 {dimension_numbers = #tpu.dot_dimension_numbers<[1], [0], [0], [1], [0, 0, 1, 1], [], []>} : vector<1x32xbf16>, vector<32x4096xbf16>, vector<1x4096xf32> -> vector<1x4096xf32>
    %c0_13 = arith.constant 0 : index
    %c0_14 = arith.constant 0 : index
    %10 = vector.load %arg3[%c0_13, %c0_14] : memref<1x4096xf32, #tpu.memory_space<vmem>>, vector<1x4096xf32>
    %11 = arith.addf %9, %10 : vector<1x4096xf32>
    %12 = vector.extract_strided_slice %11 {offsets = [0, 0], sizes = [1, 256], strides = [1, 1]} : vector<1x4096xf32> to vector<1x256xf32>
    %c0_15 = arith.constant 0 : index
    %c0_16 = arith.constant 0 : index
    %13 = vector.load %arg11[%c0_15, %c0_16] : memref<26x256xf32, #tpu.memory_space<vmem>>, vector<1x256xf32>
    tpu.vector_store %arg11[%c0_15, %c0_16], %12 {strides = array<i32>} : memref<26x256xf32, #tpu.memory_space<vmem>>, vector<1x256xf32>,
    %14 = vector.extract_strided_slice %11 {offsets = [0, 256], sizes = [1, 256], strides = [1, 1]} : vector<1x4096xf32> to vector<1x256xf32>
    %c1 = arith.constant 1 : index
    %c0_17 = arith.constant 0 : index
    %15 = vector.load %arg11[%c1, %c0_17] : memref<26x256xf32, #tpu.memory_space<vmem>>, vector<1x256xf32>
    tpu.vector_store %arg11[%c1, %c0_17], %14 {strides = array<i32>} : memref<26x256xf32, #tpu.memory_space<vmem>>, vector<1x256xf32>,
    %16 = vector.extract_strided_slice %11 {offsets = [0, 512], sizes = [1, 256], strides = [1, 1]} : vector<1x4096xf32> to vector<1x256xf32>
    %c2 = arith.constant 2 : index
    %c0_18 = arith.constant 0 : index
    %17 = vector.load %arg11[%c2, %c0_18] : memref<26x256xf32, #tpu.memory_space<vmem>>, vector<1x256xf32>
    tpu.vector_store %arg11[%c2, %c0_18], %16 {strides = array<i32>} : memref<26x256xf32, #tpu.memory_space<vmem>>, vector<1x256xf32>,
    %18 = vector.extract_strided_slice %11 {offsets = [0, 768], sizes = [1, 256], strides = [1, 1]} : vector<1x4096xf32> to vector<1x256xf32>
    %c3 = arith.constant 3 : index
    %c0_19 = arith.constant 0 : index
    %19 = vector.load %arg11[%c3, %c0_19] : memref<26x256xf32, #tpu.memory_space<vmem>>, vector<1x256xf32>
    tpu.vector_store %arg11[%c3, %c0_19], %18 {strides = array<i32>} : memref<26x256xf32, #tpu.memory_space<vmem>>, vector<1x256xf32>,
    %20 = vector.extract_strided_slice %11 {offsets = [0, 1024], sizes = [1, 256], strides = [1, 1]} : vector<1x4096xf32> to vector<1x256xf32>
    %c5 = arith.constant 5 : index
    %c0_20 = arith.constant 0 : index
    %21 = vector.load %arg11[%c5, %c0_20] : memref<26x256xf32, #tpu.memory_space<vmem>>, vector<1x256xf32>
    tpu.vector_store %arg11[%c5, %c0_20], %20 {strides = array<i32>} : memref<26x256xf32, #tpu.memory_space<vmem>>, vector<1x256xf32>,
    %22 = vector.extract_strided_slice %11 {offsets = [0, 1280], sizes = [1, 256], strides = [1, 1]} : vector<1x4096xf32> to vector<1x256xf32>
    %c6 = arith.constant 6 : index
    %c0_21 = arith.constant 0 : index
    %23 = vector.load %arg11[%c6, %c0_21] : memref<26x256xf32, #tpu.memory_space<vmem>>, vector<1x256xf32>
    tpu.vector_store %arg11[%c6, %c0_21], %22 {strides = array<i32>} : memref<26x256xf32, #tpu.memory_space<vmem>>, vector<1x256xf32>,
    %24 = vector.extract_strided_slice %11 {offsets = [0, 1536], sizes = [1, 256], strides = [1, 1]} : vector<1x4096xf32> to vector<1x256xf32>
    %c7 = arith.constant 7 : index
    %c0_22 = arith.constant 0 : index
    %25 = vector.load %arg11[%c7, %c0_22] : memref<26x256xf32, #tpu.memory_space<vmem>>, vector<1x256xf32>
    tpu.vector_store %arg11[%c7, %c0_22], %24 {strides = array<i32>} : memref<26x256xf32, #tpu.memory_space<vmem>>, vector<1x256xf32>,
    %26 = vector.extract_strided_slice %11 {offsets = [0, 1792], sizes = [1, 256], strides = [1, 1]} : vector<1x4096xf32> to vector<1x256xf32>
    %c8 = arith.constant 8 : index
    %c0_23 = arith.constant 0 : index
    %27 = vector.load %arg11[%c8, %c0_23] : memref<26x256xf32, #tpu.memory_space<vmem>>, vector<1x256xf32>
    tpu.vector_store %arg11[%c8, %c0_23], %26 {strides = array<i32>} : memref<26x256xf32, #tpu.memory_space<vmem>>, vector<1x256xf32>,
    %28 = vector.extract_strided_slice %11 {offsets = [0, 2048], sizes = [1, 256], strides = [1, 1]} : vector<1x4096xf32> to vector<1x256xf32>
    %c10 = arith.constant 10 : index
    %c0_24 = arith.constant 0 : index
    %29 = vector.load %arg11[%c10, %c0_24] : memref<26x256xf32, #tpu.memory_space<vmem>>, vector<1x256xf32>
    tpu.vector_store %arg11[%c10, %c0_24], %28 {strides = array<i32>} : memref<26x256xf32, #tpu.memory_space<vmem>>, vector<1x256xf32>,
    %30 = vector.extract_strided_slice %11 {offsets = [0, 2304], sizes = [1, 256], strides = [1, 1]} : vector<1x4096xf32> to vector<1x256xf32>
    %c11 = arith.constant 11 : index
    %c0_25 = arith.constant 0 : index
    %31 = vector.load %arg11[%c11, %c0_25] : memref<26x256xf32, #tpu.memory_space<vmem>>, vector<1x256xf32>
    tpu.vector_store %arg11[%c11, %c0_25], %30 {strides = array<i32>} : memref<26x256xf32, #tpu.memory_space<vmem>>, vector<1x256xf32>,
    %32 = vector.extract_strided_slice %11 {offsets = [0, 2560], sizes = [1, 256], strides = [1, 1]} : vector<1x4096xf32> to vector<1x256xf32>
    %c12 = arith.constant 12 : index
    %c0_26 = arith.constant 0 : index
    %33 = vector.load %arg11[%c12, %c0_26] : memref<26x256xf32, #tpu.memory_space<vmem>>, vector<1x256xf32>
    tpu.vector_store %arg11[%c12, %c0_26], %32 {strides = array<i32>} : memref<26x256xf32, #tpu.memory_space<vmem>>, vector<1x256xf32>,
    %34 = vector.extract_strided_slice %11 {offsets = [0, 2816], sizes = [1, 256], strides = [1, 1]} : vector<1x4096xf32> to vector<1x256xf32>
    %c13 = arith.constant 13 : index
    %c0_27 = arith.constant 0 : index
    %35 = vector.load %arg11[%c13, %c0_27] : memref<26x256xf32, #tpu.memory_space<vmem>>, vector<1x256xf32>
    tpu.vector_store %arg11[%c13, %c0_27], %34 {strides = array<i32>} : memref<26x256xf32, #tpu.memory_space<vmem>>, vector<1x256xf32>,
    %36 = vector.extract_strided_slice %11 {offsets = [0, 3072], sizes = [1, 256], strides = [1, 1]} : vector<1x4096xf32> to vector<1x256xf32>
    %c15 = arith.constant 15 : index
    %c0_28 = arith.constant 0 : index
    %37 = vector.load %arg11[%c15, %c0_28] : memref<26x256xf32, #tpu.memory_space<vmem>>, vector<1x256xf32>
    tpu.vector_store %arg11[%c15, %c0_28], %36 {strides = array<i32>} : memref<26x256xf32, #tpu.memory_space<vmem>>, vector<1x256xf32>,
    %38 = vector.extract_strided_slice %11 {offsets = [0, 3328], sizes = [1, 256], strides = [1, 1]} : vector<1x4096xf32> to vector<1x256xf32>
    %c16 = arith.constant 16 : index
    %c0_29 = arith.constant 0 : index
    %39 = vector.load %arg11[%c16, %c0_29] : memref<26x256xf32, #tpu.memory_space<vmem>>, vector<1x256xf32>
    tpu.vector_store %arg11[%c16, %c0_29], %38 {strides = array<i32>} : memref<26x256xf32, #tpu.memory_space<vmem>>, vector<1x256xf32>,
    %40 = vector.extract_strided_slice %11 {offsets = [0, 3584], sizes = [1, 256], strides = [1, 1]} : vector<1x4096xf32> to vector<1x256xf32>
    %c17 = arith.constant 17 : index
    %c0_30 = arith.constant 0 : index
    %41 = vector.load %arg11[%c17, %c0_30] : memref<26x256xf32, #tpu.memory_space<vmem>>, vector<1x256xf32>
    tpu.vector_store %arg11[%c17, %c0_30], %40 {strides = array<i32>} : memref<26x256xf32, #tpu.memory_space<vmem>>, vector<1x256xf32>,
    %42 = vector.extract_strided_slice %11 {offsets = [0, 3840], sizes = [1, 256], strides = [1, 1]} : vector<1x4096xf32> to vector<1x256xf32>
    %c18 = arith.constant 18 : index
    %c0_31 = arith.constant 0 : index
    %43 = vector.load %arg11[%c18, %c0_31] : memref<26x256xf32, #tpu.memory_space<vmem>>, vector<1x256xf32>
    tpu.vector_store %arg11[%c18, %c0_31], %42 {strides = array<i32>} : memref<26x256xf32, #tpu.memory_space<vmem>>, vector<1x256xf32>,
    %c0_32 = arith.constant 0 : index
    %c0_33 = arith.constant 0 : index
    %44 = vector.load %arg11[%c0_32, %c0_33] : memref<26x256xf32, #tpu.memory_space<vmem>>, vector<20x256xf32>
    %c1_34 = arith.constant 1 : index
    %c0_35 = arith.constant 0 : index
    %45 = vector.load %arg11[%c1_34, %c0_35] : memref<26x256xf32, #tpu.memory_space<vmem>>, vector<20x256xf32>
    %c5_36 = arith.constant 5 : index
    %c0_37 = arith.constant 0 : index
    %46 = vector.load %arg11[%c5_36, %c0_37] : memref<26x256xf32, #tpu.memory_space<vmem>>, vector<20x256xf32>
    %c6_38 = arith.constant 6 : index
    %c0_39 = arith.constant 0 : index
    %47 = vector.load %arg11[%c6_38, %c0_39] : memref<26x256xf32, #tpu.memory_space<vmem>>, vector<20x256xf32>
    %48 = tpu.concatenate %44, %45, %46, %47 in 1 : vector<20x256xf32>, vector<20x256xf32>, vector<20x256xf32>, vector<20x256xf32> -> vector<20x1024xf32>
    %49 = arith.truncf %48 : vector<20x1024xf32> to vector<20x1024xbf16>
    %c0_40 = arith.constant 0 : index
    %c0_41 = arith.constant 0 : index
    %50 = vector.load %arg4[%c0_40, %c0_41] : memref<1024x512xbf16, #tpu.memory_space<vmem>>, vector<1024x512xbf16>
    %cst_42 = arith.constant dense<0.000000e+00> : vector<20x512xf32>
    %51 = tpu.matmul %49, %50, %cst_42 {dimension_numbers = #tpu.dot_dimension_numbers<[1], [0], [0], [1], [0, 0, 1, 1], [], []>} : vector<20x1024xbf16>, vector<1024x512xbf16>, vector<20x512xf32> -> vector<20x512xf32>
    %c0_43 = arith.constant 0 : index
    %c0_44 = arith.constant 0 : index
    %52 = vector.load %arg5[%c0_43, %c0_44] : memref<1x512xf32, #tpu.memory_space<vmem>>, vector<1x512xf32>
    %53 = vector.broadcast %52 : vector<1x512xf32> to vector<20x512xf32>
    %54 = arith.addf %51, %53 : vector<20x512xf32>
    %cst_45 = arith.constant 0.000000e+00 : f32
    %55 = vector.broadcast %cst_45 : f32 to vector<20x512xf32>
    %56 = arith.cmpf oge, %54, %55 : vector<20x512xf32>
    %cst_46 = arith.constant 0.00999999977 : f32
    %57 = vector.broadcast %cst_46 : f32 to vector<20x512xf32>
    %58 = arith.mulf %57, %54 : vector<20x512xf32>
    %59 = arith.select %56, %54, %58 : vector<20x512xi1>, vector<20x512xf32>
    %60 = vector.extract_strided_slice %59 {offsets = [0, 0], sizes = [4, 128], strides = [1, 1]} : vector<20x512xf32> to vector<4x128xf32>
    %c0_47 = arith.constant 0 : index
    %c0_48 = arith.constant 0 : index
    %61 = tpu.strided_load %arg12[%c0_47, %c0_48] {strides = array<i32: 2, 1>} : memref<82x128xf32, #tpu.memory_space<vmem>>, vector<4x128xf32>
    tpu.strided_store %arg12[%c0_47, %c0_48], %60 {strides = array<i32: 2, 1>} : memref<82x128xf32, #tpu.memory_space<vmem>>, vector<4x128xf32>
    %62 = vector.extract_strided_slice %59 {offsets = [5, 0], sizes = [4, 128], strides = [1, 1]} : vector<20x512xf32> to vector<4x128xf32>
    %c18_49 = arith.constant 18 : index
    %c0_50 = arith.constant 0 : index
    %63 = tpu.strided_load %arg12[%c18_49, %c0_50] {strides = array<i32: 2, 1>} : memref<82x128xf32, #tpu.memory_space<vmem>>, vector<4x128xf32>
    tpu.strided_store %arg12[%c18_49, %c0_50], %62 {strides = array<i32: 2, 1>} : memref<82x128xf32, #tpu.memory_space<vmem>>, vector<4x128xf32>
    %64 = vector.extract_strided_slice %59 {offsets = [10, 0], sizes = [4, 128], strides = [1, 1]} : vector<20x512xf32> to vector<4x128xf32>
    %c36 = arith.constant 36 : index
    %c0_51 = arith.constant 0 : index
    %65 = tpu.strided_load %arg12[%c36, %c0_51] {strides = array<i32: 2, 1>} : memref<82x128xf32, #tpu.memory_space<vmem>>, vector<4x128xf32>
    tpu.strided_store %arg12[%c36, %c0_51], %64 {strides = array<i32: 2, 1>} : memref<82x128xf32, #tpu.memory_space<vmem>>, vector<4x128xf32>
    %66 = vector.extract_strided_slice %59 {offsets = [15, 0], sizes = [4, 128], strides = [1, 1]} : vector<20x512xf32> to vector<4x128xf32>
    %c54 = arith.constant 54 : index
    %c0_52 = arith.constant 0 : index
    %67 = tpu.strided_load %arg12[%c54, %c0_52] {strides = array<i32: 2, 1>} : memref<82x128xf32, #tpu.memory_space<vmem>>, vector<4x128xf32>
    tpu.strided_store %arg12[%c54, %c0_52], %66 {strides = array<i32: 2, 1>} : memref<82x128xf32, #tpu.memory_space<vmem>>, vector<4x128xf32>
    %68 = vector.extract_strided_slice %59 {offsets = [0, 128], sizes = [4, 128], strides = [1, 1]} : vector<20x512xf32> to vector<4x128xf32>
    %c1_53 = arith.constant 1 : index
    %c0_54 = arith.constant 0 : index
    %69 = tpu.strided_load %arg12[%c1_53, %c0_54] {strides = array<i32: 2, 1>} : memref<82x128xf32, #tpu.memory_space<vmem>>, vector<4x128xf32>
    tpu.strided_store %arg12[%c1_53, %c0_54], %68 {strides = array<i32: 2, 1>} : memref<82x128xf32, #tpu.memory_space<vmem>>, vector<4x128xf32>
    %70 = vector.extract_strided_slice %59 {offsets = [5, 128], sizes = [4, 128], strides = [1, 1]} : vector<20x512xf32> to vector<4x128xf32>
    %c19 = arith.constant 19 : index
    %c0_55 = arith.constant 0 : index
    %71 = tpu.strided_load %arg12[%c19, %c0_55] {strides = array<i32: 2, 1>} : memref<82x128xf32, #tpu.memory_space<vmem>>, vector<4x128xf32>
    tpu.strided_store %arg12[%c19, %c0_55], %70 {strides = array<i32: 2, 1>} : memref<82x128xf32, #tpu.memory_space<vmem>>, vector<4x128xf32>
    %72 = vector.extract_strided_slice %59 {offsets = [10, 128], sizes = [4, 128], strides = [1, 1]} : vector<20x512xf32> to vector<4x128xf32>
    %c37 = arith.constant 37 : index
    %c0_56 = arith.constant 0 : index
    %73 = tpu.strided_load %arg12[%c37, %c0_56] {strides = array<i32: 2, 1>} : memref<82x128xf32, #tpu.memory_space<vmem>>, vector<4x128xf32>
    tpu.strided_store %arg12[%c37, %c0_56], %72 {strides = array<i32: 2, 1>} : memref<82x128xf32, #tpu.memory_space<vmem>>, vector<4x128xf32>
    %74 = vector.extract_strided_slice %59 {offsets = [15, 128], sizes = [4, 128], strides = [1, 1]} : vector<20x512xf32> to vector<4x128xf32>
    %c55 = arith.constant 55 : index
    %c0_57 = arith.constant 0 : index
    %75 = tpu.strided_load %arg12[%c55, %c0_57] {strides = array<i32: 2, 1>} : memref<82x128xf32, #tpu.memory_space<vmem>>, vector<4x128xf32>
    tpu.strided_store %arg12[%c55, %c0_57], %74 {strides = array<i32: 2, 1>} : memref<82x128xf32, #tpu.memory_space<vmem>>, vector<4x128xf32>
    %76 = vector.extract_strided_slice %59 {offsets = [0, 256], sizes = [4, 128], strides = [1, 1]} : vector<20x512xf32> to vector<4x128xf32>
    %c9 = arith.constant 9 : index
    %c0_58 = arith.constant 0 : index
    %77 = tpu.strided_load %arg12[%c9, %c0_58] {strides = array<i32: 2, 1>} : memref<82x128xf32, #tpu.memory_space<vmem>>, vector<4x128xf32>
    tpu.strided_store %arg12[%c9, %c0_58], %76 {strides = array<i32: 2, 1>} : memref<82x128xf32, #tpu.memory_space<vmem>>, vector<4x128xf32>
    %78 = vector.extract_strided_slice %59 {offsets = [5, 256], sizes = [4, 128], strides = [1, 1]} : vector<20x512xf32> to vector<4x128xf32>
    %c27 = arith.constant 27 : index
    %c0_59 = arith.constant 0 : index
    %79 = tpu.strided_load %arg12[%c27, %c0_59] {strides = array<i32: 2, 1>} : memref<82x128xf32, #tpu.memory_space<vmem>>, vector<4x128xf32>
    tpu.strided_store %arg12[%c27, %c0_59], %78 {strides = array<i32: 2, 1>} : memref<82x128xf32, #tpu.memory_space<vmem>>, vector<4x128xf32>
    %80 = vector.extract_strided_slice %59 {offsets = [10, 256], sizes = [4, 128], strides = [1, 1]} : vector<20x512xf32> to vector<4x128xf32>
    %c45 = arith.constant 45 : index
    %c0_60 = arith.constant 0 : index
    %81 = tpu.strided_load %arg12[%c45, %c0_60] {strides = array<i32: 2, 1>} : memref<82x128xf32, #tpu.memory_space<vmem>>, vector<4x128xf32>
    tpu.strided_store %arg12[%c45, %c0_60], %80 {strides = array<i32: 2, 1>} : memref<82x128xf32, #tpu.memory_space<vmem>>, vector<4x128xf32>
    %82 = vector.extract_strided_slice %59 {offsets = [15, 256], sizes = [4, 128], strides = [1, 1]} : vector<20x512xf32> to vector<4x128xf32>
    %c63 = arith.constant 63 : index
    %c0_61 = arith.constant 0 : index
    %83 = tpu.strided_load %arg12[%c63, %c0_61] {strides = array<i32: 2, 1>} : memref<82x128xf32, #tpu.memory_space<vmem>>, vector<4x128xf32>
    tpu.strided_store %arg12[%c63, %c0_61], %82 {strides = array<i32: 2, 1>} : memref<82x128xf32, #tpu.memory_space<vmem>>, vector<4x128xf32>
    %84 = vector.extract_strided_slice %59 {offsets = [0, 384], sizes = [4, 128], strides = [1, 1]} : vector<20x512xf32> to vector<4x128xf32>
    %c10_62 = arith.constant 10 : index
    %c0_63 = arith.constant 0 : index
    %85 = tpu.strided_load %arg12[%c10_62, %c0_63] {strides = array<i32: 2, 1>} : memref<82x128xf32, #tpu.memory_space<vmem>>, vector<4x128xf32>
    tpu.strided_store %arg12[%c10_62, %c0_63], %84 {strides = array<i32: 2, 1>} : memref<82x128xf32, #tpu.memory_space<vmem>>, vector<4x128xf32>
    %86 = vector.extract_strided_slice %59 {offsets = [5, 384], sizes = [4, 128], strides = [1, 1]} : vector<20x512xf32> to vector<4x128xf32>
    %c28 = arith.constant 28 : index
    %c0_64 = arith.constant 0 : index
    %87 = tpu.strided_load %arg12[%c28, %c0_64] {strides = array<i32: 2, 1>} : memref<82x128xf32, #tpu.memory_space<vmem>>, vector<4x128xf32>
    tpu.strided_store %arg12[%c28, %c0_64], %86 {strides = array<i32: 2, 1>} : memref<82x128xf32, #tpu.memory_space<vmem>>, vector<4x128xf32>
    %88 = vector.extract_strided_slice %59 {offsets = [10, 384], sizes = [4, 128], strides = [1, 1]} : vector<20x512xf32> to vector<4x128xf32>
    %c46 = arith.constant 46 : index
    %c0_65 = arith.constant 0 : index
    %89 = tpu.strided_load %arg12[%c46, %c0_65] {strides = array<i32: 2, 1>} : memref<82x128xf32, #tpu.memory_space<vmem>>, vector<4x128xf32>
    tpu.strided_store %arg12[%c46, %c0_65], %88 {strides = array<i32: 2, 1>} : memref<82x128xf32, #tpu.memory_space<vmem>>, vector<4x128xf32>
    %90 = vector.extract_strided_slice %59 {offsets = [15, 384], sizes = [4, 128], strides = [1, 1]} : vector<20x512xf32> to vector<4x128xf32>
    %c64 = arith.constant 64 : index
    %c0_66 = arith.constant 0 : index
    %91 = tpu.strided_load %arg12[%c64, %c0_66] {strides = array<i32: 2, 1>} : memref<82x128xf32, #tpu.memory_space<vmem>>, vector<4x128xf32>
    tpu.strided_store %arg12[%c64, %c0_66], %90 {strides = array<i32: 2, 1>} : memref<82x128xf32, #tpu.memory_space<vmem>>, vector<4x128xf32>
    %c0_67 = arith.constant 0 : index
    %c0_68 = arith.constant 0 : index
    %92 = vector.load %arg12[%c0_67, %c0_68] : memref<82x128xf32, #tpu.memory_space<vmem>>, vector<72x128xf32>
    %c1_69 = arith.constant 1 : index
    %c0_70 = arith.constant 0 : index
    %93 = vector.load %arg12[%c1_69, %c0_70] : memref<82x128xf32, #tpu.memory_space<vmem>>, vector<72x128xf32>
    %c9_71 = arith.constant 9 : index
    %c0_72 = arith.constant 0 : index
    %94 = vector.load %arg12[%c9_71, %c0_72] : memref<82x128xf32, #tpu.memory_space<vmem>>, vector<72x128xf32>
    %c10_73 = arith.constant 10 : index
    %c0_74 = arith.constant 0 : index
    %95 = vector.load %arg12[%c10_73, %c0_74] : memref<82x128xf32, #tpu.memory_space<vmem>>, vector<72x128xf32>
    %96 = tpu.concatenate %92, %93, %94, %95 in 1 : vector<72x128xf32>, vector<72x128xf32>, vector<72x128xf32>, vector<72x128xf32> -> vector<72x512xf32>
    %97 = arith.truncf %96 : vector<72x512xf32> to vector<72x512xbf16>
    %c0_75 = arith.constant 0 : index
    %c0_76 = arith.constant 0 : index
    %98 = vector.load %arg6[%c0_75, %c0_76] : memref<512x256xbf16, #tpu.memory_space<vmem>>, vector<512x256xbf16>
    %cst_77 = arith.constant dense<0.000000e+00> : vector<72x256xf32>
    %99 = tpu.matmul %97, %98, %cst_77 {dimension_numbers = #tpu.dot_dimension_numbers<[1], [0], [0], [1], [0, 0, 1, 1], [], []>} : vector<72x512xbf16>, vector<512x256xbf16>, vector<72x256xf32> -> vector<72x256xf32>
    %c0_78 = arith.constant 0 : index
    %c0_79 = arith.constant 0 : index
    %100 = vector.load %arg7[%c0_78, %c0_79] : memref<1x256xf32, #tpu.memory_space<vmem>>, vector<1x256xf32>
    %101 = vector.broadcast %100 : vector<1x256xf32> to vector<72x256xf32>
    %102 = arith.addf %99, %101 : vector<72x256xf32>
    %cst_80 = arith.constant 0.000000e+00 : f32
    %103 = vector.broadcast %cst_80 : f32 to vector<72x256xf32>
    %104 = arith.cmpf oge, %102, %103 : vector<72x256xf32>
    %cst_81 = arith.constant 0.00999999977 : f32
    %105 = vector.broadcast %cst_81 : f32 to vector<72x256xf32>
    %106 = arith.mulf %105, %102 : vector<72x256xf32>
    %107 = arith.select %104, %102, %106 : vector<72x256xi1>, vector<72x256xf32>
    %108 = vector.extract_strided_slice %107 {offsets = [0, 0], sizes = [8, 64], strides = [1, 1]} : vector<72x256xf32> to vector<8x64xf32>
    %c18_82 = arith.constant 18 : index
    %c0_83 = arith.constant 0 : index
    %109 = tpu.strided_load %arg13[%c18_82, %c0_83] {strides = array<i32: 2, 1>} : memref<308x64xf32, #tpu.memory_space<vmem>>, vector<8x64xf32>
    tpu.strided_store %arg13[%c18_82, %c0_83], %108 {strides = array<i32: 2, 1>} : memref<308x64xf32, #tpu.memory_space<vmem>>, vector<8x64xf32>
    %110 = vector.extract_strided_slice %107 {offsets = [9, 0], sizes = [8, 64], strides = [1, 1]} : vector<72x256xf32> to vector<8x64xf32>
    %c52 = arith.constant 52 : index
    %c0_84 = arith.constant 0 : index
    %111 = tpu.strided_load %arg13[%c52, %c0_84] {strides = array<i32: 2, 1>} : memref<308x64xf32, #tpu.memory_space<vmem>>, vector<8x64xf32>
    tpu.strided_store %arg13[%c52, %c0_84], %110 {strides = array<i32: 2, 1>} : memref<308x64xf32, #tpu.memory_space<vmem>>, vector<8x64xf32>
    %112 = vector.extract_strided_slice %107 {offsets = [18, 0], sizes = [8, 64], strides = [1, 1]} : vector<72x256xf32> to vector<8x64xf32>
    %c86 = arith.constant 86 : index
    %c0_85 = arith.constant 0 : index
    %113 = tpu.strided_load %arg13[%c86, %c0_85] {strides = array<i32: 2, 1>} : memref<308x64xf32, #tpu.memory_space<vmem>>, vector<8x64xf32>
    tpu.strided_store %arg13[%c86, %c0_85], %112 {strides = array<i32: 2, 1>} : memref<308x64xf32, #tpu.memory_space<vmem>>, vector<8x64xf32>
    %114 = vector.extract_strided_slice %107 {offsets = [27, 0], sizes = [8, 64], strides = [1, 1]} : vector<72x256xf32> to vector<8x64xf32>
    %c120 = arith.constant 120 : index
    %c0_86 = arith.constant 0 : index
    %115 = tpu.strided_load %arg13[%c120, %c0_86] {strides = array<i32: 2, 1>} : memref<308x64xf32, #tpu.memory_space<vmem>>, vector<8x64xf32>
    tpu.strided_store %arg13[%c120, %c0_86], %114 {strides = array<i32: 2, 1>} : memref<308x64xf32, #tpu.memory_space<vmem>>, vector<8x64xf32>
    %116 = vector.extract_strided_slice %107 {offsets = [36, 0], sizes = [8, 64], strides = [1, 1]} : vector<72x256xf32> to vector<8x64xf32>
    %c154 = arith.constant 154 : index
    %c0_87 = arith.constant 0 : index
    %117 = tpu.strided_load %arg13[%c154, %c0_87] {strides = array<i32: 2, 1>} : memref<308x64xf32, #tpu.memory_space<vmem>>, vector<8x64xf32>
    tpu.strided_store %arg13[%c154, %c0_87], %116 {strides = array<i32: 2, 1>} : memref<308x64xf32, #tpu.memory_space<vmem>>, vector<8x64xf32>
    %118 = vector.extract_strided_slice %107 {offsets = [45, 0], sizes = [8, 64], strides = [1, 1]} : vector<72x256xf32> to vector<8x64xf32>
    %c188 = arith.constant 188 : index
    %c0_88 = arith.constant 0 : index
    %119 = tpu.strided_load %arg13[%c188, %c0_88] {strides = array<i32: 2, 1>} : memref<308x64xf32, #tpu.memory_space<vmem>>, vector<8x64xf32>
    tpu.strided_store %arg13[%c188, %c0_88], %118 {strides = array<i32: 2, 1>} : memref<308x64xf32, #tpu.memory_space<vmem>>, vector<8x64xf32>
    %120 = vector.extract_strided_slice %107 {offsets = [54, 0], sizes = [8, 64], strides = [1, 1]} : vector<72x256xf32> to vector<8x64xf32>
    %c222 = arith.constant 222 : index
    %c0_89 = arith.constant 0 : index
    %121 = tpu.strided_load %arg13[%c222, %c0_89] {strides = array<i32: 2, 1>} : memref<308x64xf32, #tpu.memory_space<vmem>>, vector<8x64xf32>
    tpu.strided_store %arg13[%c222, %c0_89], %120 {strides = array<i32: 2, 1>} : memref<308x64xf32, #tpu.memory_space<vmem>>, vector<8x64xf32>
    %122 = vector.extract_strided_slice %107 {offsets = [63, 0], sizes = [8, 64], strides = [1, 1]} : vector<72x256xf32> to vector<8x64xf32>
    %c256 = arith.constant 256 : index
    %c0_90 = arith.constant 0 : index
    %123 = tpu.strided_load %arg13[%c256, %c0_90] {strides = array<i32: 2, 1>} : memref<308x64xf32, #tpu.memory_space<vmem>>, vector<8x64xf32>
    tpu.strided_store %arg13[%c256, %c0_90], %122 {strides = array<i32: 2, 1>} : memref<308x64xf32, #tpu.memory_space<vmem>>, vector<8x64xf32>
    %124 = vector.extract_strided_slice %107 {offsets = [0, 64], sizes = [8, 64], strides = [1, 1]} : vector<72x256xf32> to vector<8x64xf32>
    %c19_91 = arith.constant 19 : index
    %c0_92 = arith.constant 0 : index
    %125 = tpu.strided_load %arg13[%c19_91, %c0_92] {strides = array<i32: 2, 1>} : memref<308x64xf32, #tpu.memory_space<vmem>>, vector<8x64xf32>
    tpu.strided_store %arg13[%c19_91, %c0_92], %124 {strides = array<i32: 2, 1>} : memref<308x64xf32, #tpu.memory_space<vmem>>, vector<8x64xf32>
    %126 = vector.extract_strided_slice %107 {offsets = [9, 64], sizes = [8, 64], strides = [1, 1]} : vector<72x256xf32> to vector<8x64xf32>
    %c53 = arith.constant 53 : index
    %c0_93 = arith.constant 0 : index
    %127 = tpu.strided_load %arg13[%c53, %c0_93] {strides = array<i32: 2, 1>} : memref<308x64xf32, #tpu.memory_space<vmem>>, vector<8x64xf32>
    tpu.strided_store %arg13[%c53, %c0_93], %126 {strides = array<i32: 2, 1>} : memref<308x64xf32, #tpu.memory_space<vmem>>, vector<8x64xf32>
    %128 = vector.extract_strided_slice %107 {offsets = [18, 64], sizes = [8, 64], strides = [1, 1]} : vector<72x256xf32> to vector<8x64xf32>
    %c87 = arith.constant 87 : index
    %c0_94 = arith.constant 0 : index
    %129 = tpu.strided_load %arg13[%c87, %c0_94] {strides = array<i32: 2, 1>} : memref<308x64xf32, #tpu.memory_space<vmem>>, vector<8x64xf32>
    tpu.strided_store %arg13[%c87, %c0_94], %128 {strides = array<i32: 2, 1>} : memref<308x64xf32, #tpu.memory_space<vmem>>, vector<8x64xf32>
    %130 = vector.extract_strided_slice %107 {offsets = [27, 64], sizes = [8, 64], strides = [1, 1]} : vector<72x256xf32> to vector<8x64xf32>
    %c121 = arith.constant 121 : index
    %c0_95 = arith.constant 0 : index
    %131 = tpu.strided_load %arg13[%c121, %c0_95] {strides = array<i32: 2, 1>} : memref<308x64xf32, #tpu.memory_space<vmem>>, vector<8x64xf32>
    tpu.strided_store %arg13[%c121, %c0_95], %130 {strides = array<i32: 2, 1>} : memref<308x64xf32, #tpu.memory_space<vmem>>, vector<8x64xf32>
    %132 = vector.extract_strided_slice %107 {offsets = [36, 64], sizes = [8, 64], strides = [1, 1]} : vector<72x256xf32> to vector<8x64xf32>
    %c155 = arith.constant 155 : index
    %c0_96 = arith.constant 0 : index
    %133 = tpu.strided_load %arg13[%c155, %c0_96] {strides = array<i32: 2, 1>} : memref<308x64xf32, #tpu.memory_space<vmem>>, vector<8x64xf32>
    tpu.strided_store %arg13[%c155, %c0_96], %132 {strides = array<i32: 2, 1>} : memref<308x64xf32, #tpu.memory_space<vmem>>, vector<8x64xf32>
    %134 = vector.extract_strided_slice %107 {offsets = [45, 64], sizes = [8, 64], strides = [1, 1]} : vector<72x256xf32> to vector<8x64xf32>
    %c189 = arith.constant 189 : index
    %c0_97 = arith.constant 0 : index
    %135 = tpu.strided_load %arg13[%c189, %c0_97] {strides = array<i32: 2, 1>} : memref<308x64xf32, #tpu.memory_space<vmem>>, vector<8x64xf32>
    tpu.strided_store %arg13[%c189, %c0_97], %134 {strides = array<i32: 2, 1>} : memref<308x64xf32, #tpu.memory_space<vmem>>, vector<8x64xf32>
    %136 = vector.extract_strided_slice %107 {offsets = [54, 64], sizes = [8, 64], strides = [1, 1]} : vector<72x256xf32> to vector<8x64xf32>
    %c223 = arith.constant 223 : index
    %c0_98 = arith.constant 0 : index
    %137 = tpu.strided_load %arg13[%c223, %c0_98] {strides = array<i32: 2, 1>} : memref<308x64xf32, #tpu.memory_space<vmem>>, vector<8x64xf32>
    tpu.strided_store %arg13[%c223, %c0_98], %136 {strides = array<i32: 2, 1>} : memref<308x64xf32, #tpu.memory_space<vmem>>, vector<8x64xf32>
    %138 = vector.extract_strided_slice %107 {offsets = [63, 64], sizes = [8, 64], strides = [1, 1]} : vector<72x256xf32> to vector<8x64xf32>
    %c257 = arith.constant 257 : index
    %c0_99 = arith.constant 0 : index
    %139 = tpu.strided_load %arg13[%c257, %c0_99] {strides = array<i32: 2, 1>} : memref<308x64xf32, #tpu.memory_space<vmem>>, vector<8x64xf32>
    tpu.strided_store %arg13[%c257, %c0_99], %138 {strides = array<i32: 2, 1>} : memref<308x64xf32, #tpu.memory_space<vmem>>, vector<8x64xf32>
    %140 = vector.extract_strided_slice %107 {offsets = [0, 128], sizes = [8, 64], strides = [1, 1]} : vector<72x256xf32> to vector<8x64xf32>
    %c35 = arith.constant 35 : index
    %c0_100 = arith.constant 0 : index
    %141 = tpu.strided_load %arg13[%c35, %c0_100] {strides = array<i32: 2, 1>} : memref<308x64xf32, #tpu.memory_space<vmem>>, vector<8x64xf32>
    tpu.strided_store %arg13[%c35, %c0_100], %140 {strides = array<i32: 2, 1>} : memref<308x64xf32, #tpu.memory_space<vmem>>, vector<8x64xf32>
    %142 = vector.extract_strided_slice %107 {offsets = [9, 128], sizes = [8, 64], strides = [1, 1]} : vector<72x256xf32> to vector<8x64xf32>
    %c69 = arith.constant 69 : index
    %c0_101 = arith.constant 0 : index
    %143 = tpu.strided_load %arg13[%c69, %c0_101] {strides = array<i32: 2, 1>} : memref<308x64xf32, #tpu.memory_space<vmem>>, vector<8x64xf32>
    tpu.strided_store %arg13[%c69, %c0_101], %142 {strides = array<i32: 2, 1>} : memref<308x64xf32, #tpu.memory_space<vmem>>, vector<8x64xf32>
    %144 = vector.extract_strided_slice %107 {offsets = [18, 128], sizes = [8, 64], strides = [1, 1]} : vector<72x256xf32> to vector<8x64xf32>
    %c103 = arith.constant 103 : index
    %c0_102 = arith.constant 0 : index
    %145 = tpu.strided_load %arg13[%c103, %c0_102] {strides = array<i32: 2, 1>} : memref<308x64xf32, #tpu.memory_space<vmem>>, vector<8x64xf32>
    tpu.strided_store %arg13[%c103, %c0_102], %144 {strides = array<i32: 2, 1>} : memref<308x64xf32, #tpu.memory_space<vmem>>, vector<8x64xf32>
    %146 = vector.extract_strided_slice %107 {offsets = [27, 128], sizes = [8, 64], strides = [1, 1]} : vector<72x256xf32> to vector<8x64xf32>
    %c137 = arith.constant 137 : index
    %c0_103 = arith.constant 0 : index
    %147 = tpu.strided_load %arg13[%c137, %c0_103] {strides = array<i32: 2, 1>} : memref<308x64xf32, #tpu.memory_space<vmem>>, vector<8x64xf32>
    tpu.strided_store %arg13[%c137, %c0_103], %146 {strides = array<i32: 2, 1>} : memref<308x64xf32, #tpu.memory_space<vmem>>, vector<8x64xf32>
    %148 = vector.extract_strided_slice %107 {offsets = [36, 128], sizes = [8, 64], strides = [1, 1]} : vector<72x256xf32> to vector<8x64xf32>
    %c171 = arith.constant 171 : index
    %c0_104 = arith.constant 0 : index
    %149 = tpu.strided_load %arg13[%c171, %c0_104] {strides = array<i32: 2, 1>} : memref<308x64xf32, #tpu.memory_space<vmem>>, vector<8x64xf32>
    tpu.strided_store %arg13[%c171, %c0_104], %148 {strides = array<i32: 2, 1>} : memref<308x64xf32, #tpu.memory_space<vmem>>, vector<8x64xf32>
    %150 = vector.extract_strided_slice %107 {offsets = [45, 128], sizes = [8, 64], strides = [1, 1]} : vector<72x256xf32> to vector<8x64xf32>
    %c205 = arith.constant 205 : index
    %c0_105 = arith.constant 0 : index
    %151 = tpu.strided_load %arg13[%c205, %c0_105] {strides = array<i32: 2, 1>} : memref<308x64xf32, #tpu.memory_space<vmem>>, vector<8x64xf32>
    tpu.strided_store %arg13[%c205, %c0_105], %150 {strides = array<i32: 2, 1>} : memref<308x64xf32, #tpu.memory_space<vmem>>, vector<8x64xf32>
    %152 = vector.extract_strided_slice %107 {offsets = [54, 128], sizes = [8, 64], strides = [1, 1]} : vector<72x256xf32> to vector<8x64xf32>
    %c239 = arith.constant 239 : index
    %c0_106 = arith.constant 0 : index
    %153 = tpu.strided_load %arg13[%c239, %c0_106] {strides = array<i32: 2, 1>} : memref<308x64xf32, #tpu.memory_space<vmem>>, vector<8x64xf32>
    tpu.strided_store %arg13[%c239, %c0_106], %152 {strides = array<i32: 2, 1>} : memref<308x64xf32, #tpu.memory_space<vmem>>, vector<8x64xf32>
    %154 = vector.extract_strided_slice %107 {offsets = [63, 128], sizes = [8, 64], strides = [1, 1]} : vector<72x256xf32> to vector<8x64xf32>
    %c273 = arith.constant 273 : index
    %c0_107 = arith.constant 0 : index
    %155 = tpu.strided_load %arg13[%c273, %c0_107] {strides = array<i32: 2, 1>} : memref<308x64xf32, #tpu.memory_space<vmem>>, vector<8x64xf32>
    tpu.strided_store %arg13[%c273, %c0_107], %154 {strides = array<i32: 2, 1>} : memref<308x64xf32, #tpu.memory_space<vmem>>, vector<8x64xf32>
    %156 = vector.extract_strided_slice %107 {offsets = [0, 192], sizes = [8, 64], strides = [1, 1]} : vector<72x256xf32> to vector<8x64xf32>
    %c36_108 = arith.constant 36 : index
    %c0_109 = arith.constant 0 : index
    %157 = tpu.strided_load %arg13[%c36_108, %c0_109] {strides = array<i32: 2, 1>} : memref<308x64xf32, #tpu.memory_space<vmem>>, vector<8x64xf32>
    tpu.strided_store %arg13[%c36_108, %c0_109], %156 {strides = array<i32: 2, 1>} : memref<308x64xf32, #tpu.memory_space<vmem>>, vector<8x64xf32>
    %158 = vector.extract_strided_slice %107 {offsets = [9, 192], sizes = [8, 64], strides = [1, 1]} : vector<72x256xf32> to vector<8x64xf32>
    %c70 = arith.constant 70 : index
    %c0_110 = arith.constant 0 : index
    %159 = tpu.strided_load %arg13[%c70, %c0_110] {strides = array<i32: 2, 1>} : memref<308x64xf32, #tpu.memory_space<vmem>>, vector<8x64xf32>
    tpu.strided_store %arg13[%c70, %c0_110], %158 {strides = array<i32: 2, 1>} : memref<308x64xf32, #tpu.memory_space<vmem>>, vector<8x64xf32>
    %160 = vector.extract_strided_slice %107 {offsets = [18, 192], sizes = [8, 64], strides = [1, 1]} : vector<72x256xf32> to vector<8x64xf32>
    %c104 = arith.constant 104 : index
    %c0_111 = arith.constant 0 : index
    %161 = tpu.strided_load %arg13[%c104, %c0_111] {strides = array<i32: 2, 1>} : memref<308x64xf32, #tpu.memory_space<vmem>>, vector<8x64xf32>
    tpu.strided_store %arg13[%c104, %c0_111], %160 {strides = array<i32: 2, 1>} : memref<308x64xf32, #tpu.memory_space<vmem>>, vector<8x64xf32>
    %162 = vector.extract_strided_slice %107 {offsets = [27, 192], sizes = [8, 64], strides = [1, 1]} : vector<72x256xf32> to vector<8x64xf32>
    %c138 = arith.constant 138 : index
    %c0_112 = arith.constant 0 : index
    %163 = tpu.strided_load %arg13[%c138, %c0_112] {strides = array<i32: 2, 1>} : memref<308x64xf32, #tpu.memory_space<vmem>>, vector<8x64xf32>
    tpu.strided_store %arg13[%c138, %c0_112], %162 {strides = array<i32: 2, 1>} : memref<308x64xf32, #tpu.memory_space<vmem>>, vector<8x64xf32>
    %164 = vector.extract_strided_slice %107 {offsets = [36, 192], sizes = [8, 64], strides = [1, 1]} : vector<72x256xf32> to vector<8x64xf32>
    %c172 = arith.constant 172 : index
    %c0_113 = arith.constant 0 : index
    %165 = tpu.strided_load %arg13[%c172, %c0_113] {strides = array<i32: 2, 1>} : memref<308x64xf32, #tpu.memory_space<vmem>>, vector<8x64xf32>
    tpu.strided_store %arg13[%c172, %c0_113], %164 {strides = array<i32: 2, 1>} : memref<308x64xf32, #tpu.memory_space<vmem>>, vector<8x64xf32>
    %166 = vector.extract_strided_slice %107 {offsets = [45, 192], sizes = [8, 64], strides = [1, 1]} : vector<72x256xf32> to vector<8x64xf32>
    %c206 = arith.constant 206 : index
    %c0_114 = arith.constant 0 : index
    %167 = tpu.strided_load %arg13[%c206, %c0_114] {strides = array<i32: 2, 1>} : memref<308x64xf32, #tpu.memory_space<vmem>>, vector<8x64xf32>
    tpu.strided_store %arg13[%c206, %c0_114], %166 {strides = array<i32: 2, 1>} : memref<308x64xf32, #tpu.memory_space<vmem>>, vector<8x64xf32>
    %168 = vector.extract_strided_slice %107 {offsets = [54, 192], sizes = [8, 64], strides = [1, 1]} : vector<72x256xf32> to vector<8x64xf32>
    %c240 = arith.constant 240 : index
    %c0_115 = arith.constant 0 : index
    %169 = tpu.strided_load %arg13[%c240, %c0_115] {strides = array<i32: 2, 1>} : memref<308x64xf32, #tpu.memory_space<vmem>>, vector<8x64xf32>
    tpu.strided_store %arg13[%c240, %c0_115], %168 {strides = array<i32: 2, 1>} : memref<308x64xf32, #tpu.memory_space<vmem>>, vector<8x64xf32>
    %170 = vector.extract_strided_slice %107 {offsets = [63, 192], sizes = [8, 64], strides = [1, 1]} : vector<72x256xf32> to vector<8x64xf32>
    %c274 = arith.constant 274 : index
    %c0_116 = arith.constant 0 : index
    %171 = tpu.strided_load %arg13[%c274, %c0_116] {strides = array<i32: 2, 1>} : memref<308x64xf32, #tpu.memory_space<vmem>>, vector<8x64xf32>
    tpu.strided_store %arg13[%c274, %c0_116], %170 {strides = array<i32: 2, 1>} : memref<308x64xf32, #tpu.memory_space<vmem>>, vector<8x64xf32>
    %cst_117 = arith.constant 0.000000e+00 : f32
    %172 = vector.broadcast %cst_117 : f32 to vector<272x64xf32>
    %c0_118 = arith.constant 0 : index
    %c0_119 = arith.constant 0 : index
    %173 = vector.load %arg13[%c0_118, %c0_119] : memref<308x64xf32, #tpu.memory_space<vmem>>, vector<272x64xf32>
    %c0_120 = arith.constant 0 : index
    %c0_121 = arith.constant 0 : index
    %174 = vector.load %arg8[%c0_120, %c0_121] : memref<9x64xf32, #tpu.memory_space<vmem>>, vector<1x64xf32>
    %175 = vector.broadcast %174 : vector<1x64xf32> to vector<272x64xf32>
    %176 = arith.mulf %173, %175 : vector<272x64xf32>
    %177 = arith.addf %172, %176 : vector<272x64xf32>
    %c1_122 = arith.constant 1 : index
    %c0_123 = arith.constant 0 : index
    %178 = vector.load %arg13[%c1_122, %c0_123] : memref<308x64xf32, #tpu.memory_space<vmem>>, vector<272x64xf32>
    %c1_124 = arith.constant 1 : index
    %c0_125 = arith.constant 0 : index
    %179 = vector.load %arg8[%c1_124, %c0_125] : memref<9x64xf32, #tpu.memory_space<vmem>>, vector<1x64xf32>
    %180 = vector.broadcast %179 : vector<1x64xf32> to vector<272x64xf32>
    %181 = arith.mulf %178, %180 : vector<272x64xf32>
    %182 = arith.addf %177, %181 : vector<272x64xf32>
    %c2_126 = arith.constant 2 : index
    %c0_127 = arith.constant 0 : index
    %183 = vector.load %arg13[%c2_126, %c0_127] : memref<308x64xf32, #tpu.memory_space<vmem>>, vector<272x64xf32>
    %c2_128 = arith.constant 2 : index
    %c0_129 = arith.constant 0 : index
    %184 = vector.load %arg8[%c2_128, %c0_129] : memref<9x64xf32, #tpu.memory_space<vmem>>, vector<1x64xf32>
    %185 = vector.broadcast %184 : vector<1x64xf32> to vector<272x64xf32>
    %186 = arith.mulf %183, %185 : vector<272x64xf32>
    %187 = arith.addf %182, %186 : vector<272x64xf32>
    %c17_130 = arith.constant 17 : index
    %c0_131 = arith.constant 0 : index
    %188 = vector.load %arg13[%c17_130, %c0_131] : memref<308x64xf32, #tpu.memory_space<vmem>>, vector<272x64xf32>
    %c3_132 = arith.constant 3 : index
    %c0_133 = arith.constant 0 : index
    %189 = vector.load %arg8[%c3_132, %c0_133] : memref<9x64xf32, #tpu.memory_space<vmem>>, vector<1x64xf32>
    %190 = vector.broadcast %189 : vector<1x64xf32> to vector<272x64xf32>
    %191 = arith.mulf %188, %190 : vector<272x64xf32>
    %192 = arith.addf %187, %191 : vector<272x64xf32>
    %c18_134 = arith.constant 18 : index
    %c0_135 = arith.constant 0 : index
    %193 = vector.load %arg13[%c18_134, %c0_135] : memref<308x64xf32, #tpu.memory_space<vmem>>, vector<272x64xf32>
    %c4 = arith.constant 4 : index
    %c0_136 = arith.constant 0 : index
    %194 = vector.load %arg8[%c4, %c0_136] : memref<9x64xf32, #tpu.memory_space<vmem>>, vector<1x64xf32>
    %195 = vector.broadcast %194 : vector<1x64xf32> to vector<272x64xf32>
    %196 = arith.mulf %193, %195 : vector<272x64xf32>
    %197 = arith.addf %192, %196 : vector<272x64xf32>
    %c19_137 = arith.constant 19 : index
    %c0_138 = arith.constant 0 : index
    %198 = vector.load %arg13[%c19_137, %c0_138] : memref<308x64xf32, #tpu.memory_space<vmem>>, vector<272x64xf32>
    %c5_139 = arith.constant 5 : index
    %c0_140 = arith.constant 0 : index
    %199 = vector.load %arg8[%c5_139, %c0_140] : memref<9x64xf32, #tpu.memory_space<vmem>>, vector<1x64xf32>
    %200 = vector.broadcast %199 : vector<1x64xf32> to vector<272x64xf32>
    %201 = arith.mulf %198, %200 : vector<272x64xf32>
    %202 = arith.addf %197, %201 : vector<272x64xf32>
    %c34 = arith.constant 34 : index
    %c0_141 = arith.constant 0 : index
    %203 = vector.load %arg13[%c34, %c0_141] : memref<308x64xf32, #tpu.memory_space<vmem>>, vector<272x64xf32>
    %c6_142 = arith.constant 6 : index
    %c0_143 = arith.constant 0 : index
    %204 = vector.load %arg8[%c6_142, %c0_143] : memref<9x64xf32, #tpu.memory_space<vmem>>, vector<1x64xf32>
    %205 = vector.broadcast %204 : vector<1x64xf32> to vector<272x64xf32>
    %206 = arith.mulf %203, %205 : vector<272x64xf32>
    %207 = arith.addf %202, %206 : vector<272x64xf32>
    %c35_144 = arith.constant 35 : index
    %c0_145 = arith.constant 0 : index
    %208 = vector.load %arg13[%c35_144, %c0_145] : memref<308x64xf32, #tpu.memory_space<vmem>>, vector<272x64xf32>
    %c7_146 = arith.constant 7 : index
    %c0_147 = arith.constant 0 : index
    %209 = vector.load %arg8[%c7_146, %c0_147] : memref<9x64xf32, #tpu.memory_space<vmem>>, vector<1x64xf32>
    %210 = vector.broadcast %209 : vector<1x64xf32> to vector<272x64xf32>
    %211 = arith.mulf %208, %210 : vector<272x64xf32>
    %212 = arith.addf %207, %211 : vector<272x64xf32>
    %c36_148 = arith.constant 36 : index
    %c0_149 = arith.constant 0 : index
    %213 = vector.load %arg13[%c36_148, %c0_149] : memref<308x64xf32, #tpu.memory_space<vmem>>, vector<272x64xf32>
    %c8_150 = arith.constant 8 : index
    %c0_151 = arith.constant 0 : index
    %214 = vector.load %arg8[%c8_150, %c0_151] : memref<9x64xf32, #tpu.memory_space<vmem>>, vector<1x64xf32>
    %215 = vector.broadcast %214 : vector<1x64xf32> to vector<272x64xf32>
    %216 = arith.mulf %213, %215 : vector<272x64xf32>
    %217 = arith.addf %212, %216 : vector<272x64xf32>
    %cst_152 = arith.constant dense<0.000000e+00> : vector<272xf32>
    %218 = vector.multi_reduction <add>, %217, %cst_152 [1] : vector<272x64xf32> to vector<272xf32>
    %219 = vector.shape_cast %218 : vector<272xf32> to vector<272x1xf32>
    %c0_153 = arith.constant 0 : index
    %c0_154 = arith.constant 0 : index
    %220 = vector.load %arg9[%c0_153, %c0_154] : memref<1x1xf32, #tpu.memory_space<vmem>>, vector<1x1xf32>
    %221 = vector.broadcast %220 : vector<1x1xf32> to vector<272x1xf32>
    %222 = arith.addf %219, %221 : vector<272x1xf32>
    %223 = vector.extract_strided_slice %222 {offsets = [0, 0], sizes = [16, 1], strides = [1, 1]} : vector<272x1xf32> to vector<16x1xf32>
    %c0_155 = arith.constant 0 : index
    %c0_156 = arith.constant 0 : index
    %c0_157 = arith.constant 0 : index
    %224 = vector.load %arg10[%c0_155, %c0_156, %c0_157] : memref<1x256x1xf32, #tpu.memory_space<vmem>>, vector<1x16x1xf32>
    %225 = vector.shape_cast %224 : vector<1x16x1xf32> to vector<16x1xf32>
    %226 = vector.shape_cast %223 : vector<16x1xf32> to vector<1x16x1xf32>
    tpu.vector_store %arg10[%c0_155, %c0_156, %c0_157], %226 {strides = array<i32>} : memref<1x256x1xf32, #tpu.memory_space<vmem>>, vector<1x16x1xf32>,
    %227 = vector.extract_strided_slice %222 {offsets = [17, 0], sizes = [16, 1], strides = [1, 1]} : vector<272x1xf32> to vector<16x1xf32>
    %c0_158 = arith.constant 0 : index
    %c16_159 = arith.constant 16 : index
    %c0_160 = arith.constant 0 : index
    %228 = vector.load %arg10[%c0_158, %c16_159, %c0_160] : memref<1x256x1xf32, #tpu.memory_space<vmem>>, vector<1x16x1xf32>
    %229 = vector.shape_cast %228 : vector<1x16x1xf32> to vector<16x1xf32>
    %230 = vector.shape_cast %227 : vector<16x1xf32> to vector<1x16x1xf32>
    tpu.vector_store %arg10[%c0_158, %c16_159, %c0_160], %230 {strides = array<i32>} : memref<1x256x1xf32, #tpu.memory_space<vmem>>, vector<1x16x1xf32>,
    %231 = vector.extract_strided_slice %222 {offsets = [34, 0], sizes = [16, 1], strides = [1, 1]} : vector<272x1xf32> to vector<16x1xf32>
    %c0_161 = arith.constant 0 : index
    %c32 = arith.constant 32 : index
    %c0_162 = arith.constant 0 : index
    %232 = vector.load %arg10[%c0_161, %c32, %c0_162] : memref<1x256x1xf32, #tpu.memory_space<vmem>>, vector<1x16x1xf32>
    %233 = vector.shape_cast %232 : vector<1x16x1xf32> to vector<16x1xf32>
    %234 = vector.shape_cast %231 : vector<16x1xf32> to vector<1x16x1xf32>
    tpu.vector_store %arg10[%c0_161, %c32, %c0_162], %234 {strides = array<i32>} : memref<1x256x1xf32, #tpu.memory_space<vmem>>, vector<1x16x1xf32>,
    %235 = vector.extract_strided_slice %222 {offsets = [51, 0], sizes = [16, 1], strides = [1, 1]} : vector<272x1xf32> to vector<16x1xf32>
    %c0_163 = arith.constant 0 : index
    %c48 = arith.constant 48 : index
    %c0_164 = arith.constant 0 : index
    %236 = vector.load %arg10[%c0_163, %c48, %c0_164] : memref<1x256x1xf32, #tpu.memory_space<vmem>>, vector<1x16x1xf32>
    %237 = vector.shape_cast %236 : vector<1x16x1xf32> to vector<16x1xf32>
    %238 = vector.shape_cast %235 : vector<16x1xf32> to vector<1x16x1xf32>
    tpu.vector_store %arg10[%c0_163, %c48, %c0_164], %238 {strides = array<i32>} : memref<1x256x1xf32, #tpu.memory_space<vmem>>, vector<1x16x1xf32>,
    %239 = vector.extract_strided_slice %222 {offsets = [68, 0], sizes = [16, 1], strides = [1, 1]} : vector<272x1xf32> to vector<16x1xf32>
    %c0_165 = arith.constant 0 : index
    %c64_166 = arith.constant 64 : index
    %c0_167 = arith.constant 0 : index
    %240 = vector.load %arg10[%c0_165, %c64_166, %c0_167] : memref<1x256x1xf32, #tpu.memory_space<vmem>>, vector<1x16x1xf32>
    %241 = vector.shape_cast %240 : vector<1x16x1xf32> to vector<16x1xf32>
    %242 = vector.shape_cast %239 : vector<16x1xf32> to vector<1x16x1xf32>
    tpu.vector_store %arg10[%c0_165, %c64_166, %c0_167], %242 {strides = array<i32>} : memref<1x256x1xf32, #tpu.memory_space<vmem>>, vector<1x16x1xf32>,
    %243 = vector.extract_strided_slice %222 {offsets = [85, 0], sizes = [16, 1], strides = [1, 1]} : vector<272x1xf32> to vector<16x1xf32>
    %c0_168 = arith.constant 0 : index
    %c80 = arith.constant 80 : index
    %c0_169 = arith.constant 0 : index
    %244 = vector.load %arg10[%c0_168, %c80, %c0_169] : memref<1x256x1xf32, #tpu.memory_space<vmem>>, vector<1x16x1xf32>
    %245 = vector.shape_cast %244 : vector<1x16x1xf32> to vector<16x1xf32>
    %246 = vector.shape_cast %243 : vector<16x1xf32> to vector<1x16x1xf32>
    tpu.vector_store %arg10[%c0_168, %c80, %c0_169], %246 {strides = array<i32>} : memref<1x256x1xf32, #tpu.memory_space<vmem>>, vector<1x16x1xf32>,
    %247 = vector.extract_strided_slice %222 {offsets = [102, 0], sizes = [16, 1], strides = [1, 1]} : vector<272x1xf32> to vector<16x1xf32>
    %c0_170 = arith.constant 0 : index
    %c96 = arith.constant 96 : index
    %c0_171 = arith.constant 0 : index
    %248 = vector.load %arg10[%c0_170, %c96, %c0_171] : memref<1x256x1xf32, #tpu.memory_space<vmem>>, vector<1x16x1xf32>
    %249 = vector.shape_cast %248 : vector<1x16x1xf32> to vector<16x1xf32>
    %250 = vector.shape_cast %247 : vector<16x1xf32> to vector<1x16x1xf32>
    tpu.vector_store %arg10[%c0_170, %c96, %c0_171], %250 {strides = array<i32>} : memref<1x256x1xf32, #tpu.memory_space<vmem>>, vector<1x16x1xf32>,
    %251 = vector.extract_strided_slice %222 {offsets = [119, 0], sizes = [16, 1], strides = [1, 1]} : vector<272x1xf32> to vector<16x1xf32>
    %c0_172 = arith.constant 0 : index
    %c112 = arith.constant 112 : index
    %c0_173 = arith.constant 0 : index
    %252 = vector.load %arg10[%c0_172, %c112, %c0_173] : memref<1x256x1xf32, #tpu.memory_space<vmem>>, vector<1x16x1xf32>
    %253 = vector.shape_cast %252 : vector<1x16x1xf32> to vector<16x1xf32>
    %254 = vector.shape_cast %251 : vector<16x1xf32> to vector<1x16x1xf32>
    tpu.vector_store %arg10[%c0_172, %c112, %c0_173], %254 {strides = array<i32>} : memref<1x256x1xf32, #tpu.memory_space<vmem>>, vector<1x16x1xf32>,
    %255 = vector.extract_strided_slice %222 {offsets = [136, 0], sizes = [16, 1], strides = [1, 1]} : vector<272x1xf32> to vector<16x1xf32>
    %c0_174 = arith.constant 0 : index
    %c128 = arith.constant 128 : index
    %c0_175 = arith.constant 0 : index
    %256 = vector.load %arg10[%c0_174, %c128, %c0_175] : memref<1x256x1xf32, #tpu.memory_space<vmem>>, vector<1x16x1xf32>
    %257 = vector.shape_cast %256 : vector<1x16x1xf32> to vector<16x1xf32>
    %258 = vector.shape_cast %255 : vector<16x1xf32> to vector<1x16x1xf32>
    tpu.vector_store %arg10[%c0_174, %c128, %c0_175], %258 {strides = array<i32>} : memref<1x256x1xf32, #tpu.memory_space<vmem>>, vector<1x16x1xf32>,
    %259 = vector.extract_strided_slice %222 {offsets = [153, 0], sizes = [16, 1], strides = [1, 1]} : vector<272x1xf32> to vector<16x1xf32>
    %c0_176 = arith.constant 0 : index
    %c144 = arith.constant 144 : index
    %c0_177 = arith.constant 0 : index
    %260 = vector.load %arg10[%c0_176, %c144, %c0_177] : memref<1x256x1xf32, #tpu.memory_space<vmem>>, vector<1x16x1xf32>
    %261 = vector.shape_cast %260 : vector<1x16x1xf32> to vector<16x1xf32>
    %262 = vector.shape_cast %259 : vector<16x1xf32> to vector<1x16x1xf32>
    tpu.vector_store %arg10[%c0_176, %c144, %c0_177], %262 {strides = array<i32>} : memref<1x256x1xf32, #tpu.memory_space<vmem>>, vector<1x16x1xf32>,
    %263 = vector.extract_strided_slice %222 {offsets = [170, 0], sizes = [16, 1], strides = [1, 1]} : vector<272x1xf32> to vector<16x1xf32>
    %c0_178 = arith.constant 0 : index
    %c160 = arith.constant 160 : index
    %c0_179 = arith.constant 0 : index
    %264 = vector.load %arg10[%c0_178, %c160, %c0_179] : memref<1x256x1xf32, #tpu.memory_space<vmem>>, vector<1x16x1xf32>
    %265 = vector.shape_cast %264 : vector<1x16x1xf32> to vector<16x1xf32>
    %266 = vector.shape_cast %263 : vector<16x1xf32> to vector<1x16x1xf32>
    tpu.vector_store %arg10[%c0_178, %c160, %c0_179], %266 {strides = array<i32>} : memref<1x256x1xf32, #tpu.memory_space<vmem>>, vector<1x16x1xf32>,
    %267 = vector.extract_strided_slice %222 {offsets = [187, 0], sizes = [16, 1], strides = [1, 1]} : vector<272x1xf32> to vector<16x1xf32>
    %c0_180 = arith.constant 0 : index
    %c176 = arith.constant 176 : index
    %c0_181 = arith.constant 0 : index
    %268 = vector.load %arg10[%c0_180, %c176, %c0_181] : memref<1x256x1xf32, #tpu.memory_space<vmem>>, vector<1x16x1xf32>
    %269 = vector.shape_cast %268 : vector<1x16x1xf32> to vector<16x1xf32>
    %270 = vector.shape_cast %267 : vector<16x1xf32> to vector<1x16x1xf32>
    tpu.vector_store %arg10[%c0_180, %c176, %c0_181], %270 {strides = array<i32>} : memref<1x256x1xf32, #tpu.memory_space<vmem>>, vector<1x16x1xf32>,
    %271 = vector.extract_strided_slice %222 {offsets = [204, 0], sizes = [16, 1], strides = [1, 1]} : vector<272x1xf32> to vector<16x1xf32>
    %c0_182 = arith.constant 0 : index
    %c192 = arith.constant 192 : index
    %c0_183 = arith.constant 0 : index
    %272 = vector.load %arg10[%c0_182, %c192, %c0_183] : memref<1x256x1xf32, #tpu.memory_space<vmem>>, vector<1x16x1xf32>
    %273 = vector.shape_cast %272 : vector<1x16x1xf32> to vector<16x1xf32>
    %274 = vector.shape_cast %271 : vector<16x1xf32> to vector<1x16x1xf32>
    tpu.vector_store %arg10[%c0_182, %c192, %c0_183], %274 {strides = array<i32>} : memref<1x256x1xf32, #tpu.memory_space<vmem>>, vector<1x16x1xf32>,
    %275 = vector.extract_strided_slice %222 {offsets = [221, 0], sizes = [16, 1], strides = [1, 1]} : vector<272x1xf32> to vector<16x1xf32>
    %c0_184 = arith.constant 0 : index
    %c208 = arith.constant 208 : index
    %c0_185 = arith.constant 0 : index
    %276 = vector.load %arg10[%c0_184, %c208, %c0_185] : memref<1x256x1xf32, #tpu.memory_space<vmem>>, vector<1x16x1xf32>
    %277 = vector.shape_cast %276 : vector<1x16x1xf32> to vector<16x1xf32>
    %278 = vector.shape_cast %275 : vector<16x1xf32> to vector<1x16x1xf32>
    tpu.vector_store %arg10[%c0_184, %c208, %c0_185], %278 {strides = array<i32>} : memref<1x256x1xf32, #tpu.memory_space<vmem>>, vector<1x16x1xf32>,
    %279 = vector.extract_strided_slice %222 {offsets = [238, 0], sizes = [16, 1], strides = [1, 1]} : vector<272x1xf32> to vector<16x1xf32>
    %c0_186 = arith.constant 0 : index
    %c224 = arith.constant 224 : index
    %c0_187 = arith.constant 0 : index
    %280 = vector.load %arg10[%c0_186, %c224, %c0_187] : memref<1x256x1xf32, #tpu.memory_space<vmem>>, vector<1x16x1xf32>
    %281 = vector.shape_cast %280 : vector<1x16x1xf32> to vector<16x1xf32>
    %282 = vector.shape_cast %279 : vector<16x1xf32> to vector<1x16x1xf32>
    tpu.vector_store %arg10[%c0_186, %c224, %c0_187], %282 {strides = array<i32>} : memref<1x256x1xf32, #tpu.memory_space<vmem>>, vector<1x16x1xf32>,
    %283 = vector.extract_strided_slice %222 {offsets = [255, 0], sizes = [16, 1], strides = [1, 1]} : vector<272x1xf32> to vector<16x1xf32>
    %c0_188 = arith.constant 0 : index
    %c240_189 = arith.constant 240 : index
    %c0_190 = arith.constant 0 : index
    %284 = vector.load %arg10[%c0_188, %c240_189, %c0_190] : memref<1x256x1xf32, #tpu.memory_space<vmem>>, vector<1x16x1xf32>
    %285 = vector.shape_cast %284 : vector<1x16x1xf32> to vector<16x1xf32>
    %286 = vector.shape_cast %283 : vector<16x1xf32> to vector<1x16x1xf32>
    tpu.vector_store %arg10[%c0_188, %c240_189, %c0_190], %286 {strides = array<i32>} : memref<1x256x1xf32, #tpu.memory_space<vmem>>, vector<1x16x1xf32>,
    return
  }
  func.func @transform_0(%arg0: i32) -> (i32, i32, i32) {
    %c0_i32 = arith.constant 0 : i32
    %c0_i32_0 = arith.constant 0 : i32
    %c0_i32_1 = arith.constant 0 : i32
    return %arg0, %c0_i32, %c0_i32_0 : i32, i32, i32
  }
  func.func @transform_1(%arg0: i32) -> (i32, i32) {
    %c0_i32 = arith.constant 0 : i32
    %c0_i32_0 = arith.constant 0 : i32
    %c0_i32_1 = arith.constant 0 : i32
    return %c0_i32, %c0_i32_0 : i32, i32
  }
  func.func @transform_2(%arg0: i32) -> (i32, i32) {
    %c0_i32 = arith.constant 0 : i32
    %c0_i32_0 = arith.constant 0 : i32
    %c0_i32_1 = arith.constant 0 : i32
    return %c0_i32, %c0_i32_0 : i32, i32
  }
  func.func @transform_3(%arg0: i32) -> (i32, i32) {
    %c0_i32 = arith.constant 0 : i32
    %c0_i32_0 = arith.constant 0 : i32
    %c0_i32_1 = arith.constant 0 : i32
    return %c0_i32, %c0_i32_0 : i32, i32
  }
  func.func @transform_4(%arg0: i32) -> (i32, i32) {
    %c0_i32 = arith.constant 0 : i32
    %c0_i32_0 = arith.constant 0 : i32
    %c0_i32_1 = arith.constant 0 : i32
    return %c0_i32, %c0_i32_0 : i32, i32
  }
  func.func @transform_5(%arg0: i32) -> (i32, i32) {
    %c0_i32 = arith.constant 0 : i32
    %c0_i32_0 = arith.constant 0 : i32
    %c0_i32_1 = arith.constant 0 : i32
    return %c0_i32, %c0_i32_0 : i32, i32
  }
  func.func @transform_6(%arg0: i32) -> (i32, i32) {
    %c0_i32 = arith.constant 0 : i32
    %c0_i32_0 = arith.constant 0 : i32
    %c0_i32_1 = arith.constant 0 : i32
    return %c0_i32, %c0_i32_0 : i32, i32
  }
  func.func @transform_7(%arg0: i32) -> (i32, i32) {
    %c0_i32 = arith.constant 0 : i32
    %c0_i32_0 = arith.constant 0 : i32
    %c0_i32_1 = arith.constant 0 : i32
    return %c0_i32, %c0_i32_0 : i32, i32
  }
  func.func @transform_8(%arg0: i32) -> (i32, i32) {
    %c0_i32 = arith.constant 0 : i32
    %c0_i32_0 = arith.constant 0 : i32
    %c0_i32_1 = arith.constant 0 : i32
    return %c0_i32, %c0_i32_0 : i32, i32
  }
  func.func @transform_9(%arg0: i32) -> (i32, i32, i32) {
    %c0_i32 = arith.constant 0 : i32
    %c0_i32_0 = arith.constant 0 : i32
    %c0_i32_1 = arith.constant 0 : i32
    return %arg0, %c0_i32, %c0_i32_0 : i32, i32, i32
  }
}

</mosaic_0001>

<bundles_post_ra>
// kernel: generator_forward.1
= control target key start
LH: loop header
LB: loop body
LE: loop exit
PB: predicated region body
PF: predicated region fallthrough
CT: control target
= control target key end

     0   :  { %s8551_s0 = inlined_call_operand.vmem [shape: bf16[2,1,32], index: 0, kind: input, shape index: {}]   ;;  %s8552_s1 = inlined_call_operand.hbm [shape: bf16[32,4096], index: 1, kind: input, shape index: {}]   ;;  %s8553_s2 = inlined_call_operand.hbm [shape: f32[1,4096], index: 2, kind: input, shape index: {}]   ;;  %s8554_s3 = inlined_call_operand.hbm [shape: bf16[1024,512], index: 3, kind: input, shape index: {}]   ;;  %s8555_s4 = inlined_call_operand.vmem [shape: f32[1,512], index: 4, kind: input, shape index: {}]   ;;  %s8556_s5 = inlined_call_operand.hbm [shape: bf16[512,256], index: 5, kind: input, shape index: {}]   ;;  %s8557_s6 = inlined_call_operand.vmem [shape: f32[1,256], index: 6, kind: input, shape index: {}]   ;;  %s8558_s7 = inlined_call_operand.hbm [shape: f32[9,64], index: 7, kind: input, shape index: {}]   ;;  %s8559_s8 = inlined_call_operand.<no memory space> [shape: f32[1,1], index: 8, kind: input, shape index: {}]   ;;  %s8560_s9 = inlined_call_operand.vmem [shape: f32[2,256,1], index: 9, kind: output, shape index: {}]  }
   0x1   :  { %v14_v0 = vstv %s8559_s8 }
   0x2   :  { %15 = vst [vmem:[#allocation5] sm:$0x1] %v14_v0 }
   0x3   :  { %16 = vsyncpa [#allocation7], 0 }
   0x4   :  { %17 = vsyncpa [#allocation9], 0 }
   0x5   :  { %18 = vsyncpa [#allocation12], 0  ;;  %s7406_s11 = smov 0  }
   0x6 LB: > { %s7339_s12 = smov [#allocation8]   ;;  %s7412_s14 = sadd.s32 4294967295, %s7337_s11   ;;  %s7337_s11 = sphi %s7406_s11, %s24_s11  }
   0x7   : > { %s275_s13 = sshll.u32 %s7339_s12, 4  ;;  %p6202_p0 = scmp.ge.s32.totalorder %s7337_s11, 1  ;;  %s276_s13 = int_to_ptr.vmem [resolvable:$true] %s275_s13 }
   0x8   : > { %p249_p1 = scmp.lt.s32.totalorder %s7337_s11, 3  ;;  %p6666_p2 = scmp.eq.s32.totalorder %s7412_s14, 0 }
   0x9   : > { %s7340_s15 = smov [#allocation11]   ;;  %s7341_s18 = smov [#allocation6]  }
   0xa   : > { %p7417_p3 = pnand %p6202_p0, %p249_p1  ;;  %s301_s16 = sshll.u32 %s7340_s15, 4  ;;  %s7423_s16 = int_to_ptr.vmem [resolvable:$true] %s301_s16 }
   0xb   : > { %s261_s19 = sshll.u32 %s7341_s18, 4  ;;  %s7200_s21 = scalar_lea.vmem %s276_s13, 512  ;;  %s7431_s19 = int_to_ptr.vmem [resolvable:$true] %s261_s19 }
   0xc   : > { %p6650_p4 = pneg %p7417_p3  ;;  %p7201_p7 = scmp.ne.s32.totalorder %s276_s13, %s7200_s21 }
   0xd   : > { %p7208_p10 = scmp.lt.s32.totalorder %s276_s13, %s276_s13  ;;  %p7209_p11 = scmp.lt.s32.totalorder %s7200_s21, %s7200_s21 }
   0xe   : > { %p7427_p5 = pnand %p6666_p2, %p6650_p4 }
   0xf   : > { %p7210_p12 = por %p7209_p11, %p7208_p10 }
  0x10   : > { %p7435_p6 = pneg %p7427_p5 }
  0x12   : > { %p7203_p8 = pnand %p7201_p7, %p7435_p6 }
  0x14   : > { %p7204_p9 = pneg %p7203_p8 }
  0x16   : > { %p7211_p13 = pnand %p7210_p12, %p7204_p9 }
  0x18   : > { %7214 = shalt.err (!%p7211_p13)
}
  0x19   : > { %6656 = dma.hbm_to_vmem [thread:$0]  (!%p7427_p5), %s8553_s2, 512, %s276_s13, [#allocation9]  }
  0x1a   : > { %s7226_s24 = scalar_lea.vmem %s7423_s16, 8192  ;;  %p7234_p7 = scmp.lt.s32.totalorder %s7423_s16, %s7423_s16 }
  0x1b   : > { %p7227_p0 = scmp.ne.s32.totalorder %s7423_s16, %s7226_s24  ;;  %p7235_p8 = scmp.lt.s32.totalorder %s7226_s24, %s7226_s24 }
  0x1d   : > { %p7229_p1 = pnand %p7227_p0, %p7435_p6  ;;  %p7236_p9 = por %p7235_p8, %p7234_p7 }
  0x1f   : > { %p7230_p4 = pneg %p7229_p1 }
  0x21   : > { %p7237_p10 = pnand %p7236_p9, %p7230_p4 }
  0x23   : > { %7240 = shalt.err (!%p7237_p10)
}
  0x24   : > { %s7342_s25 = smov 128   ;;  %s7343_s26 = smov 8  }
  0x25   : > { %6662 = dma.hbm_to_vmem [thread:$0]  (!%p7427_p5), %s8556_s5, 8192, %s7423_s16, [#allocation12], %s7342_s25, %s7342_s25, %s7343_s26  }
  0x26   : > { %s7252_s29 = scalar_lea.vmem %s7431_s19, 8192  ;;  %p7260_p0 = scmp.lt.s32.totalorder %s7431_s19, %s7431_s19 }
  0x27   : > { %p7253_p11 = scmp.ne.s32.totalorder %s7431_s19, %s7252_s29  ;;  %p7261_p1 = scmp.lt.s32.totalorder %s7252_s29, %s7252_s29 }
  0x29   : > { %p7255_p12 = pnand %p7253_p11, %p7435_p6  ;;  %p7262_p4 = por %p7261_p1, %p7260_p0 }
  0x2b   : > { %p7256_p13 = pneg %p7255_p12 }
  0x2d   : > { %p7263_p7 = pnand %p7262_p4, %p7256_p13 }
  0x2f   : > { %7266 = shalt.err (!%p7263_p7)
}
  0x30   : > { %s7344_s30 = smov 2048   ;;  %s7345_s13 = smov [#allocation10]  }
  0x31   : > { %6653 = dma.hbm_to_vmem [thread:$0]  (!%p7427_p5), %s8552_s1, 8192, %s7431_s19, [#allocation7], %s7344_s30, %s7344_s30, %s7342_s25  }
  0x32   : > { %s285_s15 = sshll.u32 %s7345_s13, 4  ;;  %s286_s15 = int_to_ptr.vmem [resolvable:$true] %s285_s15 }
  0x33   : > { %s7278_s16 = scalar_lea.vmem %s286_s15, 32768  ;;  %p7286_p11 = scmp.lt.s32.totalorder %s286_s15, %s286_s15 }
  0x34   : > { %p7279_p8 = scmp.ne.s32.totalorder %s286_s15, %s7278_s16  ;;  %p7287_p12 = scmp.lt.s32.totalorder %s7278_s16, %s7278_s16 }
  0x36   : > { %p7281_p9 = pnand %p7279_p8, %p7435_p6  ;;  %p7288_p13 = por %p7287_p12, %p7286_p11 }
  0x38   : > { %p7282_p10 = pneg %p7281_p9 }
  0x3a   : > { %p7289_p0 = pnand %p7288_p13, %p7282_p10 }
  0x3c   : > { %7292 = shalt.err (!%p7289_p0)
}
  0x3d   : > { %s7346_s18 = smov 256   ;;  %s7347_s21 = smov 16  }
  0x3e   : > { %6659 = dma.hbm_to_vmem [thread:$0]  (!%p7427_p5), %s8554_s3, 32768, %s286_s15, [#allocation9], %s7346_s18, %s7346_s18, %s7347_s21  }
  0x3f   : > { %s7348_s23 = smov [#allocation13]  }
  0x40   : > { %s317_s24 = sshll.u32 %s7348_s23, 4  ;;  %s318_s24 = int_to_ptr.vmem [resolvable:$true] %s317_s24 }
  0x41   : > { %s7304_s27 = scalar_lea.vmem %s318_s24, 256  ;;  %p7312_p8 = scmp.lt.s32.totalorder %s318_s24, %s318_s24 }
  0x42   : > { %p7305_p1 = scmp.ne.s32.totalorder %s318_s24, %s7304_s27  ;;  %p7313_p9 = scmp.lt.s32.totalorder %s7304_s27, %s7304_s27 }
  0x44   : > { %p7307_p4 = pnand %p7305_p1, %p7435_p6  ;;  %p7314_p10 = por %p7313_p9, %p7312_p8 }
  0x46   : > { %p7308_p7 = pneg %p7307_p4 }
  0x48   : > { %p7315_p11 = pnand %p7314_p10, %p7308_p7 }
  0x4a   : > { %7318 = shalt.err (!%p7315_p11)
}
  0x4b   : > { %6665 = dma.hbm_to_vmem [thread:$0]  (!%p7427_p5), %s8558_s7, 256, %s318_s24, [#allocation12], %s7342_s25, %s7342_s25, %s7343_s26  }
  0x4c   : > { %342 = sbr.rel (%p7417_p3) target bundleno = 1400 (0x578), region = 56 }
  0x51   : > { %7324 = dma.done.wait (%p6666_p2), [#allocation7], 8192  }
  0x52   : > { %7326 = vsyncadd (%p6666_p2), [#allocation7], 4294959104 }
  0x53   : > { %7328 = dma.done.wait (%p6666_p2), [#allocation9], 33280  }
  0x54   : > { %7330 = vsyncadd (%p6666_p2), [#allocation9], 4294934016 }
  0x55   : > { %7332 = dma.done.wait (%p6666_p2), [#allocation12], 8448  }
  0x56   : > { %7334 = vsyncadd (%p6666_p2), [#allocation12], 4294958848  ;;  %v7349_v1 = vmov 0   ;;  %p392_p3 = scmp.lt.s32.totalorder %s7412_s14, 1  ;;  %v494_v2 = vld [vmem:[#allocation6 + $0x100] sm:$0xff]  ;;  %v495_v4 = vld [vmem:[#allocation6 + $0x108] sm:$0xff] }
  0x57   : > { %1050 = vmatprep.mubr.bf16.mxu0 %v7349_v1  ;;  %1091 = vmatprep.mubr.bf16.mxu1 %v7349_v1  ;;  %v510_v3 = vld [vmem:[#allocation6 + $0x180] sm:$0xff]  ;;  %v511_v6 = vld [vmem:[#allocation6 + $0x188] sm:$0xff]  ;;  %v496_v16 = vld [vmem:[#allocation6 + $0x110] sm:$0xff]  ;;  %vm1014_vm0 = vcmask 261120   ;;  %vm2039_vm2 = vcmask 1046528   ;;  %vm2062_vm3 = vcmask 1042432  }
  0x58   : > { %v6250_v5 = vcombine.high %v494_v2, %v510_v3  ;;  %v6249_v7 = vcombine.low %v494_v2, %v510_v3  ;;  %v462_v8 = vld [vmem:[#allocation6] sm:$0xff]  ;;  %s8567_s14 = smov (!%p392_p3, %s7412_s14), 1  ;;  %v6252_v10 = vcombine.high %v495_v4, %v511_v6  ;;  %v6251_v11 = vcombine.low %v495_v4, %v511_v6  ;;  %v463_v13 = vld [vmem:[#allocation6 + $0x8] sm:$0xff]  ;;  %v512_v17 = vld [vmem:[#allocation6 + $0x190] sm:$0xff]  ;;  %s7352_s12 = smov 64  }
  0x59   : > { %v478_v9 = vld [vmem:[#allocation6 + $0x80] sm:$0xff]  ;;  %v479_v14 = vld [vmem:[#allocation6 + $0x88] sm:$0xff]  ;;  %v497_v18 = vld [vmem:[#allocation6 + $0x118] sm:$0xff]  ;;  %s394_s20 = scalar_lea.vmem %s8551_s0, %s8567_s14  ;;  %v6254_v22 = vcombine.high %v496_v16, %v512_v17  ;;  %v6253_v29 = vcombine.low %v496_v16, %v512_v17  ;;  %vm2087_vm4 = vcmask 1041408   ;;  %vm4140_vm10 = vcmask 1040384   ;;  %s6629_s13 = sshll.u32 %s8567_s14, 8 }
  0x5a   : > { %v6218_v12 = vcombine.high %v462_v8, %v478_v9  ;;  %1030 = vmatprep.subr.bf16.mxu0 %v6250_v5  ;;  %v6220_v15 = vcombine.high %v463_v13, %v479_v14  ;;  %1071 = vmatprep.subr.bf16.mxu1 %v6252_v10  ;;  %v6217_v19 = vcombine.low %v462_v8, %v478_v9  ;;  %v513_v20 = vld [vmem:[#allocation6 + $0x198] sm:$0xff]  ;;  %v464_v24 = vld [vmem:[#allocation6 + $0x10] sm:$0xff]  ;;  %v7515_v28 = vld [vmem:[%s394_s20] sm:$0x1]  ;;  %s8414_s16 = scalar_lea.vmem %s8560_s9, %s6629_s13 }
  0x5b   : > { %1031 = vmatpush1.bf16.msra.mxu0 %v6249_v7  ;;  %1072 = vmatpush1.bf16.msra.mxu1 %v6251_v11  ;;  %v6219_v21 = vcombine.low %v463_v13, %v479_v14  ;;  %v6256_v23 = vcombine.high %v497_v18, %v513_v20  ;;  %v480_v25 = vld [vmem:[#allocation6 + $0x90] sm:$0xff]  ;;  %v465_v26 = vld [vmem:[#allocation6 + $0x18] sm:$0xff]  ;;  %v6255_v30 = vcombine.low %v497_v18, %v513_v20  ;;  %v498_v33 = vld [vmem:[#allocation6 + $0x120] sm:$0xff] }
  0x5c   : > { %1032 = vmatprep.subr.bf16.mxu0 %v6218_v12  ;;  %1073 = vmatprep.subr.bf16.mxu1 %v6220_v15  ;;  %v481_v27 = vld [vmem:[#allocation6 + $0x98] sm:$0xff]  ;;  %v6222_v31 = vcombine.high %v464_v24, %v480_v25  ;;  %v514_v34 = vld [vmem:[#allocation6 + $0x1a0] sm:$0xff]  ;;  %v499_v35 = vld [vmem:[#allocation6 + $0x128] sm:$0xff]  ;;  %v6221_v37 = vcombine.low %v464_v24, %v480_v25 }
  0x5d   : > { %v6224_v32 = vcombine.high %v465_v26, %v481_v27  ;;  %v515_v36 = vld [vmem:[#allocation6 + $0x1a8] sm:$0xff]  ;;  %v6223_v38 = vcombine.low %v465_v26, %v481_v27  ;;  %v6258_v39 = vcombine.high %v498_v33, %v514_v34  ;;  %v466_v41 = vld [vmem:[#allocation6 + $0x20] sm:$0xff]  ;;  %v6257_v45 = vcombine.low %v498_v33, %v514_v34  ;;  %v500_v49 = vld [vmem:[#allocation6 + $0x130] sm:$0xff] }
  0x5e   : > { %v6260_v40 = vcombine.high %v499_v35, %v515_v36  ;;  %v482_v42 = vld [vmem:[#allocation6 + $0xa0] sm:$0xff]  ;;  %v467_v43 = vld [vmem:[#allocation6 + $0x28] sm:$0xff]  ;;  %v6259_v46 = vcombine.low %v499_v35, %v515_v36  ;;  %v516_v50 = vld [vmem:[#allocation6 + $0x1b0] sm:$0xff] }
  0x5f   : > { %1033 = vmatpush1.bf16.msra.mxu0 %v6217_v19  ;;  %1074 = vmatpush1.bf16.msra.mxu1 %v6219_v21  ;;  %v483_v44 = vld [vmem:[#allocation6 + $0xa8] sm:$0xff]  ;;  %v6226_v47 = vcombine.high %v466_v41, %v482_v42  ;;  %v501_v51 = vld [vmem:[#allocation6 + $0x138] sm:$0xff]  ;;  %v6225_v53 = vcombine.low %v466_v41, %v482_v42  ;;  %v468_v54 = vld [vmem:[#allocation6 + $0x30] sm:$0xff]  ;;  %v6262_v56 = vcombine.high %v500_v49, %v516_v50 }
  0x60   : > { %1112 = vmatprep.subr.bf16.mxu0 %v6254_v22  ;;  %1153 = vmatprep.subr.bf16.mxu1 %v6256_v23  ;;  %v6228_v48 = vcombine.high %v467_v43, %v483_v44  ;;  %v517_v52 = vld [vmem:[#allocation6 + $0x1b8] sm:$0xff]  ;;  %v6227_v55 = vcombine.low %v467_v43, %v483_v44  ;;  %v484_v57 = vld [vmem:[#allocation6 + $0xb0] sm:$0xff]  ;;  %v6261_v61 = vcombine.low %v500_v49, %v516_v50  ;;  %v502_v62 = vld [vmem:[#allocation6 + $0x140] sm:$0xff] }
  0x61   : > { %v469_v58 = vld [vmem:[#allocation6 + $0x38] sm:$0xff]  ;;  %v6264_v60 = vcombine.high %v501_v51, %v517_v52  ;;  %v518_v63 = vld [vmem:[#allocation6 + $0x1c0] sm:$0xff]  ;;  %v6263_v0 = vcombine.low %v501_v51, %v517_v52  ;;  %v6230_v2 = vcombine.high %v468_v54, %v484_v57  ;;  %v503_v3 = vld [vmem:[#allocation6 + $0x148] sm:$0xff]  ;;  %v6229_v6 = vcombine.low %v468_v54, %v484_v57 }
  0x62   : > { %6281 = vmatmul.mubr.msk.bf16.vlgmr.msra.gmra.mxu0 %vm1014_vm0, %v7515_v28  ;;  %6282 = vmatmul.mubr.msk.bf16.vlgmr.msra.gmra.mxu1 %vm1014_vm0, %v7515_v28  ;;  %v485_v59 = vld [vmem:[#allocation6 + $0xb8] sm:$0xff]  ;;  %v519_v4 = vld [vmem:[#allocation6 + $0x1c8] sm:$0xff]  ;;  %v470_v7 = vld [vmem:[#allocation6 + $0x40] sm:$0xff]  ;;  %v6266_v10 = vcombine.high %v502_v62, %v518_v63  ;;  %v6265_v14 = vcombine.low %v502_v62, %v518_v63 }
  0x63   : > { %1113 = vmatpush1.bf16.msra.mxu0 %v6253_v29  ;;  %1154 = vmatpush1.bf16.msra.mxu1 %v6255_v30  ;;  %v6232_v5 = vcombine.high %v469_v58, %v485_v59  ;;  %v486_v8 = vld [vmem:[#allocation6 + $0xc0] sm:$0xff]  ;;  %v6231_v9 = vcombine.low %v469_v58, %v485_v59  ;;  %v471_v11 = vld [vmem:[#allocation6 + $0x48] sm:$0xff]  ;;  %v6268_v13 = vcombine.high %v503_v3, %v519_v4  ;;  %v504_v15 = vld [vmem:[#allocation6 + $0x150] sm:$0xff] }
  0x64   : > { %1114 = vmatprep.subr.bf16.mxu0 %v6222_v31  ;;  %1155 = vmatprep.subr.bf16.mxu1 %v6224_v32  ;;  %v487_v12 = vld [vmem:[#allocation6 + $0xc8] sm:$0xff]  ;;  %v520_v16 = vld [vmem:[#allocation6 + $0x1d0] sm:$0xff]  ;;  %v6267_v17 = vcombine.low %v503_v3, %v519_v4  ;;  %v6234_v18 = vcombine.high %v470_v7, %v486_v8  ;;  %v505_v19 = vld [vmem:[#allocation6 + $0x158] sm:$0xff]  ;;  %v6233_v22 = vcombine.low %v470_v7, %v486_v8 }
  0x65   : > { %1132 = vmatprep.mubr.bf16.mxu0 %v7349_v1  ;;  %1173 = vmatprep.mubr.bf16.mxu1 %v7349_v1  ;;  %v521_v20 = vld [vmem:[#allocation6 + $0x1d8] sm:$0xff]  ;;  %v6236_v21 = vcombine.high %v471_v11, %v487_v12  ;;  %v472_v23 = vld [vmem:[#allocation6 + $0x50] sm:$0xff]  ;;  %v6235_v25 = vcombine.low %v471_v11, %v487_v12  ;;  %v6270_v26 = vcombine.high %v504_v15, %v520_v16  ;;  %v506_v32 = vld [vmem:[#allocation6 + $0x160] sm:$0xff] }
  0x66   : > { %v488_v24 = vld [vmem:[#allocation6 + $0xd0] sm:$0xff]  ;;  %v473_v27 = vld [vmem:[#allocation6 + $0x58] sm:$0xff]  ;;  %v6272_v30 = vcombine.high %v505_v19, %v521_v20  ;;  %v6269_v31 = vcombine.low %v504_v15, %v520_v16  ;;  %v522_v33 = vld [vmem:[#allocation6 + $0x1e0] sm:$0xff]  ;;  %v6271_v34 = vcombine.low %v505_v19, %v521_v20 }
  0x67   : > { %1115 = vmatpush1.bf16.msra.mxu0 %v6221_v37  ;;  %1156 = vmatpush1.bf16.msra.mxu1 %v6223_v38  ;;  %v489_v29 = vld [vmem:[#allocation6 + $0xd8] sm:$0xff]  ;;  %v6238_v35 = vcombine.high %v472_v23, %v488_v24  ;;  %v507_v36 = vld [vmem:[#allocation6 + $0x168] sm:$0xff]  ;;  %v490_v41 = vld [vmem:[#allocation6 + $0xe0] sm:$0xff]  ;;  %v6274_v43 = vcombine.high %v506_v32, %v522_v33 }
  0x68   : > { %1194 = vmatprep.subr.bf16.mxu0 %v6258_v39  ;;  %1235 = vmatprep.subr.bf16.mxu1 %v6260_v40  ;;  %v523_v37 = vld [vmem:[#allocation6 + $0x1e8] sm:$0xff]  ;;  %v6240_v38 = vcombine.high %v473_v27, %v489_v29  ;;  %v6237_v39 = vcombine.low %v472_v23, %v488_v24  ;;  %v474_v40 = vld [vmem:[#allocation6 + $0x60] sm:$0xff]  ;;  %v6239_v42 = vcombine.low %v473_v27, %v489_v29  ;;  %v524_v49 = vld [vmem:[#allocation6 + $0x1f0] sm:$0xff] }
  0x69   : > { %v475_v44 = vld [vmem:[#allocation6 + $0x68] sm:$0xff]  ;;  %v6275_v50 = vcombine.low %v507_v36, %v523_v37  ;;  %v6242_v51 = vcombine.high %v474_v40, %v490_v41  ;;  %v509_v52 = vld [vmem:[#allocation6 + $0x178] sm:$0xff]  ;;  %v492_v57 = vld [vmem:[#allocation6 + $0xf0] sm:$0xff] }
  0x6a   : > { %6283 = vmatmul.mubr.msk.bf16.vlgmr.msra.gmra.mxu0 %vm1014_vm0, %v7515_v28  ;;  %6284 = vmatmul.mubr.msk.bf16.vlgmr.msra.gmra.mxu1 %vm1014_vm0, %v7515_v28  ;;  %v6703_v7 = vld [vmem:[#allocation10 + $0xc4] ss:$16 sps:$4 sm:$0xff]   ;;  %v6701_v8 = vld [vmem:[#allocation10 + $0xc0] ss:$16 sps:$4 sm:$0xff]  }
  0x6b   : > { %1195 = vmatpush1.bf16.msra.mxu0 %v6257_v45  ;;  %1236 = vmatpush1.bf16.msra.mxu1 %v6259_v46  ;;  %v491_v45 = vld [vmem:[#allocation6 + $0xe8] sm:$0xff]  ;;  %v6276_v46 = vcombine.high %v507_v36, %v523_v37  ;;  %v6709_v11 = vld [vmem:[#allocation10 + $0x2e4] ss:$16 sps:$4 sm:$0xff]   ;;  %v6707_v12 = vld [vmem:[#allocation10 + $0x2e0] ss:$16 sps:$4 sm:$0xff]  }
  0x6c   : > { %1196 = vmatprep.subr.bf16.mxu0 %v6226_v47  ;;  %1237 = vmatprep.subr.bf16.mxu1 %v6228_v48  ;;  %v6273_v47 = vcombine.low %v506_v32, %v522_v33  ;;  %v508_v48 = vld [vmem:[#allocation6 + $0x170] sm:$0xff]  ;;  %v6244_v54 = vcombine.high %v475_v44, %v491_v45  ;;  %v6243_v58 = vcombine.low %v475_v44, %v491_v45 }
  0x6d   : > { %1214 = vmatprep.mubr.bf16.mxu0 %v7349_v1  ;;  %1255 = vmatprep.mubr.bf16.mxu1 %v7349_v1  ;;  %v6278_v59 = vcombine.high %v508_v48, %v524_v49  ;;  %v6277_v63 = vcombine.low %v508_v48, %v524_v49  ;;  %v6715_v15 = vld [vmem:[#allocation10 + $0x2c4] ss:$16 sps:$4 sm:$0xff]   ;;  %v6713_v16 = vld [vmem:[#allocation10 + $0x2c0] ss:$16 sps:$4 sm:$0xff]  }
  0x6e   : > { %v6721_v19 = vld [vmem:[#allocation10 + $0x2a4] ss:$16 sps:$4 sm:$0xff]   ;;  %v6719_v20 = vld [vmem:[#allocation10 + $0x2a0] ss:$16 sps:$4 sm:$0xff]  }
  0x6f   : > { %1197 = vmatpush1.bf16.msra.mxu0 %v6225_v53  ;;  %1238 = vmatpush1.bf16.msra.mxu1 %v6227_v55  ;;  %v525_v53 = vld [vmem:[#allocation6 + $0x1f8] sm:$0xff]  ;;  %v6241_v55 = vcombine.low %v474_v40, %v490_v41  ;;  %v6727_v23 = vld [vmem:[#allocation10 + $0x284] ss:$16 sps:$4 sm:$0xff]   ;;  %v6725_v24 = vld [vmem:[#allocation10 + $0x280] ss:$16 sps:$4 sm:$0xff]  }
  0x70   : > { %1276 = vmatprep.subr.bf16.mxu0 %v6262_v56  ;;  %1317 = vmatprep.subr.bf16.mxu1 %v6264_v60  ;;  %v476_v56 = vld [vmem:[#allocation6 + $0x70] sm:$0xff]  ;;  %v477_v60 = vld [vmem:[#allocation6 + $0x78] sm:$0xff]  ;;  %v6280_v62 = vcombine.high %v509_v52, %v525_v53 }
  0x71   : > { %v6245_v4 = vcombine.low %v476_v56, %v492_v57  ;;  %v6733_v27 = vld [vmem:[#allocation10 + $0x264] ss:$16 sps:$4 sm:$0xff]   ;;  %v6731_v29 = vld [vmem:[#allocation10 + $0x260] ss:$16 sps:$4 sm:$0xff]  }
  0x72   : > { %6285 = vmatmul.mubr.msk.bf16.vlgmr.msra.gmra.mxu0 %vm1014_vm0, %v7515_v28  ;;  %6286 = vmatmul.mubr.msk.bf16.vlgmr.msra.gmra.mxu1 %vm1014_vm0, %v7515_v28  ;;  %v6739_v32 = vld [vmem:[#allocation10 + $0x244] ss:$16 sps:$4 sm:$0xff]   ;;  %v6737_v33 = vld [vmem:[#allocation10 + $0x240] ss:$16 sps:$4 sm:$0xff]  }
  0x73   : > { %1277 = vmatpush1.bf16.msra.mxu0 %v6261_v61  ;;  %1318 = vmatpush1.bf16.msra.mxu1 %v6263_v0  ;;  %v493_v61 = vld [vmem:[#allocation6 + $0xf8] sm:$0xff]  ;;  %v6279_v0 = vcombine.low %v509_v52, %v525_v53  ;;  %v6745_v36 = vld [vmem:[#allocation10 + $0x224] ss:$16 sps:$4 sm:$0xff]   ;;  %v6743_v37 = vld [vmem:[#allocation10 + $0x220] ss:$16 sps:$4 sm:$0xff]  }
  0x74   : > { %1278 = vmatprep.subr.bf16.mxu0 %v6230_v2  ;;  %1319 = vmatprep.subr.bf16.mxu1 %v6232_v5  ;;  %v6246_v2 = vcombine.high %v476_v56, %v492_v57  ;;  %v6248_v3 = vcombine.high %v477_v60, %v493_v61  ;;  %v6247_v5 = vcombine.low %v477_v60, %v493_v61  ;;  %v6751_v40 = vld [vmem:[#allocation10 + $0x204] ss:$16 sps:$4 sm:$0xff]   ;;  %v6749_v41 = vld [vmem:[#allocation10 + $0x200] ss:$16 sps:$4 sm:$0xff]  }
  0x75   : > { %1296 = vmatprep.mubr.bf16.mxu0 %v7349_v1  ;;  %1337 = vmatprep.mubr.bf16.mxu1 %v7349_v1  ;;  %v6757_v44 = vld [vmem:[#allocation10 + $0x3e4] ss:$16 sps:$4 sm:$0xff]   ;;  %v6755_v45 = vld [vmem:[#allocation10 + $0x3e0] ss:$16 sps:$4 sm:$0xff]  }
  0x76   : > { %v6763_v48 = vld [vmem:[#allocation10 + $0x3c4] ss:$16 sps:$4 sm:$0xff]   ;;  %v6761_v49 = vld [vmem:[#allocation10 + $0x3c0] ss:$16 sps:$4 sm:$0xff]  }
  0x77   : > { %1279 = vmatpush1.bf16.msra.mxu0 %v6229_v6  ;;  %1320 = vmatpush1.bf16.msra.mxu1 %v6231_v9  ;;  %v7350_v6 = vmov 0.0   ;;  %v6706_v9 = vld [vmem:[#allocation10 + $0xa4] ss:$16 sps:$4 sm:$0xff]   ;;  %v6767_v53 = vld [vmem:[#allocation10 + $0x3a0] ss:$16 sps:$4 sm:$0xff]  }
  0x78   : > { %1358 = vmatprep.subr.bf16.mxu0 %v6266_v10  ;;  %1399 = vmatprep.subr.bf16.mxu1 %v6268_v13  ;;  %401 = vst [vmem:[#allocation2] sm:$0xff] %v7350_v6  ;;  %402 = vst [vmem:[#allocation2 + $0x8] sm:$0xff] %v7350_v6  ;;  %v6704_v10 = vld [vmem:[#allocation10 + $0xa0] ss:$16 sps:$4 sm:$0xff]   ;;  %v6712_v13 = vld [vmem:[#allocation10 + $0x84] ss:$16 sps:$4 sm:$0xff]  }
  0x79   : > { %403 = vst [vmem:[#allocation2 + $0x10] sm:$0xff] %v7350_v6  ;;  %404 = vst [vmem:[#allocation2 + $0x18] sm:$0xff] %v7350_v6  ;;  %v6769_v52 = vld [vmem:[#allocation10 + $0x3a4] ss:$16 sps:$4 sm:$0xff]   ;;  %v6773_v57 = vld [vmem:[#allocation10 + $0x380] ss:$16 sps:$4 sm:$0xff]  }
  0x7a   : > { %6287 = vmatmul.mubr.msk.bf16.vlgmr.msra.gmra.mxu0 %vm1014_vm0, %v7515_v28  ;;  %6288 = vmatmul.mubr.msk.bf16.vlgmr.msra.gmra.mxu1 %vm1014_vm0, %v7515_v28  ;;  %405 = vst [vmem:[#allocation2 + $0x20] sm:$0xff] %v7350_v6  ;;  %406 = vst [vmem:[#allocation2 + $0x28] sm:$0xff] %v7350_v6  ;;  %v6775_v56 = vld [vmem:[#allocation10 + $0x384] ss:$16 sps:$4 sm:$0xff]   ;;  %v6779_v61 = vld [vmem:[#allocation10 + $0x360] ss:$16 sps:$4 sm:$0xff]  }
  0x7b   : > { %1359 = vmatpush1.bf16.msra.mxu0 %v6265_v14  ;;  %1400 = vmatpush1.bf16.msra.mxu1 %v6267_v17  ;;  %407 = vst [vmem:[#allocation2 + $0x30] sm:$0x3] %v7350_v6  ;;  %408 = vst [vmem:[#allocation2 + $0x38] sm:$0x3] %v7350_v6  ;;  %v6710_v14 = vld [vmem:[#allocation10 + $0x80] ss:$16 sps:$4 sm:$0xff]  }
  0x7c   : > { %1360 = vmatprep.subr.bf16.mxu0 %v6234_v18  ;;  %1401 = vmatprep.subr.bf16.mxu1 %v6236_v21  ;;  %409 = vst [vmem:[#allocation3] sm:$0xff] %v7350_v6  ;;  %410 = vst [vmem:[#allocation3 + $0x8] sm:$0xff] %v7350_v6  ;;  %v6718_v17 = vld [vmem:[#allocation10 + $0x64] ss:$16 sps:$4 sm:$0xff]   ;;  %v6716_v18 = vld [vmem:[#allocation10 + $0x60] ss:$16 sps:$4 sm:$0xff]  }
  0x7d   : > { %1378 = vmatprep.mubr.bf16.mxu0 %v7349_v1  ;;  %1419 = vmatprep.mubr.bf16.mxu1 %v7349_v1  ;;  %411 = vst [vmem:[#allocation3 + $0x10] sm:$0xff] %v7350_v6  ;;  %412 = vst [vmem:[#allocation3 + $0x18] sm:$0xff] %v7350_v6  ;;  %v6724_v21 = vld [vmem:[#allocation10 + $0x44] ss:$16 sps:$4 sm:$0xff]  }
  0x7e   : > { %413 = vst [vmem:[#allocation3 + $0x20] sm:$0xff] %v7350_v6  ;;  %414 = vst [vmem:[#allocation3 + $0x28] sm:$0xff] %v7350_v6  ;;  %v6781_v60 = vld [vmem:[#allocation10 + $0x364] ss:$16 sps:$4 sm:$0xff]  }
  0x7f   : > { %1361 = vmatpush1.bf16.msra.mxu0 %v6233_v22  ;;  %1402 = vmatpush1.bf16.msra.mxu1 %v6235_v25  ;;  %415 = vst [vmem:[#allocation3 + $0x30] sm:$0xff] %v7350_v6  ;;  %416 = vst [vmem:[#allocation3 + $0x38] sm:$0xff] %v7350_v6  ;;  %v6722_v22 = vld [vmem:[#allocation10 + $0x40] ss:$16 sps:$4 sm:$0xff]   ;;  %v6730_v25 = vld [vmem:[#allocation10 + $0x24] ss:$16 sps:$4 sm:$0xff]  }
  0x80   : > { %1440 = vmatprep.subr.bf16.mxu0 %v6270_v26  ;;  %1481 = vmatprep.subr.bf16.mxu1 %v6272_v30  ;;  %417 = vst [vmem:[#allocation3 + $0x40] sm:$0xff] %v7350_v6  ;;  %418 = vst [vmem:[#allocation3 + $0x48] sm:$0xff] %v7350_v6  ;;  %v6728_v26 = vld [vmem:[#allocation10 + $0x20] ss:$16 sps:$4 sm:$0xff]   ;;  %v6736_v30 = vld [vmem:[#allocation10 + $0x4] ss:$16 sps:$4 sm:$0xff]  }
  0x81   : > { %419 = vst [vmem:[#allocation3 + $0x50] sm:$0x3] %v7350_v6  ;;  %v6797_v6 = vld [vmem:[#allocation10 + $0x300] ss:$16 sps:$4 sm:$0xff]  }
  0x82   : > { %6289 = vmatmul.mubr.msk.bf16.vlgmr.msra.gmra.mxu0 %vm1014_vm0, %v7515_v28  ;;  %6290 = vmatmul.mubr.msk.bf16.vlgmr.msra.gmra.mxu1 %vm1014_vm0, %v7515_v28 }
  0x83   : > { %1441 = vmatpush1.bf16.msra.mxu0 %v6269_v31  ;;  %1482 = vmatpush1.bf16.msra.mxu1 %v6271_v34  ;;  %v6734_v31 = vld [vmem:[#allocation10] ss:$16 sps:$4 sm:$0xff]   ;;  %v6742_v34 = vld [vmem:[#allocation10 + $0x1e4] ss:$16 sps:$4 sm:$0xff]  }
  0x84   : > { %1442 = vmatprep.subr.bf16.mxu0 %v6238_v35  ;;  %1483 = vmatprep.subr.bf16.mxu1 %v6240_v38  ;;  %v6740_v35 = vld [vmem:[#allocation10 + $0x1e0] ss:$16 sps:$4 sm:$0xff]   ;;  %v6748_v38 = vld [vmem:[#allocation10 + $0x1c4] ss:$16 sps:$4 sm:$0xff]  }
  0x85   : > { %1460 = vmatprep.mubr.bf16.mxu0 %v7349_v1  ;;  %1501 = vmatprep.mubr.bf16.mxu1 %v7349_v1 }
  0x87   : > { %1443 = vmatpush1.bf16.msra.mxu0 %v6237_v39  ;;  %1484 = vmatpush1.bf16.msra.mxu1 %v6239_v42  ;;  %v6746_v39 = vld [vmem:[#allocation10 + $0x1c0] ss:$16 sps:$4 sm:$0xff]   ;;  %v6754_v42 = vld [vmem:[#allocation10 + $0x1a4] ss:$16 sps:$4 sm:$0xff]  }
  0x88   : > { %1522 = vmatprep.subr.bf16.mxu0 %v6274_v43  ;;  %1563 = vmatprep.subr.bf16.mxu1 %v6276_v46  ;;  %v6752_v43 = vld [vmem:[#allocation10 + $0x1a0] ss:$16 sps:$4 sm:$0xff]   ;;  %v6760_v46 = vld [vmem:[#allocation10 + $0x184] ss:$16 sps:$4 sm:$0xff]  }
  0x8a   : > { %6291 = vmatmul.mubr.msk.bf16.vlgmr.msra.gmra.mxu0 %vm1014_vm0, %v7515_v28  ;;  %6292 = vmatmul.mubr.msk.bf16.vlgmr.msra.gmra.mxu1 %vm1014_vm0, %v7515_v28 }
  0x8b   : > { %1523 = vmatpush1.bf16.msra.mxu0 %v6273_v47  ;;  %1564 = vmatpush1.bf16.msra.mxu1 %v6275_v50  ;;  %v6758_v47 = vld [vmem:[#allocation10 + $0x180] ss:$16 sps:$4 sm:$0xff]   ;;  %v6766_v50 = vld [vmem:[#allocation10 + $0x164] ss:$16 sps:$4 sm:$0xff]  }
  0x8c   : > { %1524 = vmatprep.subr.bf16.mxu0 %v6242_v51  ;;  %1565 = vmatprep.subr.bf16.mxu1 %v6244_v54  ;;  %v6764_v51 = vld [vmem:[#allocation10 + $0x160] ss:$16 sps:$4 sm:$0xff]   ;;  %v6772_v54 = vld [vmem:[#allocation10 + $0x144] ss:$16 sps:$4 sm:$0xff]  }
  0x8d   : > { %1542 = vmatprep.mubr.bf16.mxu0 %v7349_v1  ;;  %1583 = vmatprep.mubr.bf16.mxu1 %v7349_v1 }
  0x8f   : > { %1525 = vmatpush1.bf16.msra.mxu0 %v6241_v55  ;;  %1566 = vmatpush1.bf16.msra.mxu1 %v6243_v58  ;;  %v6770_v55 = vld [vmem:[#allocation10 + $0x140] ss:$16 sps:$4 sm:$0xff]   ;;  %v6778_v58 = vld [vmem:[#allocation10 + $0x124] ss:$16 sps:$4 sm:$0xff]  }
  0x90   : > { %1604 = vmatprep.subr.bf16.mxu0 %v6278_v59  ;;  %1645 = vmatprep.subr.bf16.mxu1 %v6280_v62  ;;  %v6776_v59 = vld [vmem:[#allocation10 + $0x120] ss:$16 sps:$4 sm:$0xff]   ;;  %v6784_v62 = vld [vmem:[#allocation10 + $0x104] ss:$16 sps:$4 sm:$0xff]  }
  0x92   : > { %6293 = vmatmul.mubr.msk.bf16.vlgmr.msra.gmra.mxu0 %vm1014_vm0, %v7515_v28  ;;  %6294 = vmatmul.mubr.msk.bf16.vlgmr.msra.gmra.mxu1 %vm1014_vm0, %v7515_v28 }
  0x93   : > { %1605 = vmatpush1.bf16.msra.mxu0 %v6277_v63  ;;  %1646 = vmatpush1.bf16.msra.mxu1 %v6279_v0  ;;  %v6782_v63 = vld [vmem:[#allocation10 + $0x100] ss:$16 sps:$4 sm:$0xff]   ;;  %v6787_v0 = vld [vmem:[#allocation10 + $0x344] ss:$16 sps:$4 sm:$0xff]  }
  0x94   : > { %1606 = vmatprep.subr.bf16.mxu0 %v6246_v2  ;;  %1647 = vmatprep.subr.bf16.mxu1 %v6248_v3  ;;  %v6785_v2 = vld [vmem:[#allocation10 + $0x340] ss:$16 sps:$4 sm:$0xff]   ;;  %v6790_v3 = vld [vmem:[#allocation10 + $0x4e4] ss:$16 sps:$4 sm:$0xff]  }
  0x95   : > { %1624 = vmatprep.mubr.bf16.mxu0 %v7349_v1  ;;  %1665 = vmatprep.mubr.bf16.mxu1 %v7349_v1  ;;  %v6700_v1 = vld [vmem:[#allocation10 + $0xe4] ss:$16 sps:$4 sm:$0xff]  }
  0x97   : > { %1607 = vmatpush1.bf16.msra.mxu0 %v6245_v4  ;;  %1648 = vmatpush1.bf16.msra.mxu1 %v6247_v5  ;;  %v6791_v4 = vld [vmem:[#allocation10 + $0x320] ss:$16 sps:$4 sm:$0xff]   ;;  %v6793_v5 = vld [vmem:[#allocation10 + $0x324] ss:$16 sps:$4 sm:$0xff]  }
  0x98   : > { %3682 = vmatprep.subr.bf16.mxu0 %v6700_v1  ;;  %3733 = vmatprep.subr.bf16.mxu1 %v6709_v11  ;;  %v6799_v1 = vld [vmem:[#allocation10 + $0x304] ss:$16 sps:$4 sm:$0xff]  }
  0x9a   : > { %6295 = vmatmul.mubr.msk.bf16.vlgmr.msra.gmra.mxu0 %vm1014_vm0, %v7515_v28  ;;  %6296 = vmatmul.mubr.msk.bf16.vlgmr.msra.gmra.mxu1 %vm1014_vm0, %v7515_v28  ;;  %v6698_v28 = vld [vmem:[#allocation10 + $0xe0] ss:$16 sps:$4 sm:$0xff]  }
  0x9b   : > { %3683 = vmatpush1.bf16.msra.mxu0 %v6698_v28  ;;  %3734 = vmatpush1.bf16.msra.mxu1 %v6707_v12  ;;  %v6805_v28 = vld [vmem:[#allocation10 + $0x6e4] ss:$16 sps:$4 sm:$0xff]  }
  0x9c   : > { %3684 = vmatprep.subr.bf16.mxu0 %v6703_v7  ;;  %3735 = vmatprep.subr.bf16.mxu1 %v6715_v15  ;;  %v854_v7 = vlaneseq }
  0x9e   : > { %vm7588_vm1 = vcmp.lt.s32.totalorder %v854_v7, 256 }
  0x9f   : > { %3685 = vmatpush1.bf16.msra.mxu0 %v6701_v8  ;;  %3736 = vmatpush1.bf16.msra.mxu1 %v6713_v16  ;;  %v855_v8 = vshrl.u32 %v854_v7, 7 }
  0xa0   : > { %3686 = vmatprep.subr.bf16.mxu0 %v6706_v9  ;;  %3737 = vmatprep.subr.bf16.mxu1 %v6721_v19  ;;  %v7351_v9 = vmov 1966171168  }
  0xa1   : > { %v7563_v11 = vsub.s32 0, %v855_v8  ;;  %v7565_v12 = vsub.s32 1, %v855_v8  ;;  %v7569_v15 = vsub.s32 3, %v855_v8 }
  0xa3   : > { %3687 = vmatpush1.bf16.msra.mxu0 %v6704_v10  ;;  %3738 = vmatpush1.bf16.msra.mxu1 %v6719_v20  ;;  %v1678_v10 = vunpack.c.l.s4 %v7351_v9 }
  0xa4   : > { %3688 = vmatprep.subr.bf16.mxu0 %v6712_v13  ;;  %3739 = vmatprep.subr.bf16.mxu1 %v6727_v23  ;;  %v526_v13 = vld [vmem:[#allocation8] sm:$0xff] }
  0xa5   : > { %v1679_v16 = vunpack.c.0.s8 %v1678_v10 }
  0xa7   : > { %3689 = vmatpush1.bf16.msra.mxu0 %v6710_v14  ;;  %3740 = vmatpush1.bf16.msra.mxu1 %v6725_v24  ;;  %v7567_v14 = vsub.s32 2, %v855_v8  ;;  %v7575_v24 = vsub.s32 %v1679_v16, %v855_v8 }
  0xa8   : > { %3690 = vmatprep.subr.bf16.mxu0 %v6718_v17  ;;  %3741 = vmatprep.subr.bf16.mxu1 %v6733_v27  ;;  %v857_v17 = vrot.slane %v526_v13, %v7563_v11 }
  0xa9   : > { %v865_v20 = vrot.slane %v526_v13, %v7567_v14 }
  0xab   : > { %3691 = vmatpush1.bf16.msra.mxu0 %v6716_v18  ;;  %3742 = vmatpush1.bf16.msra.mxu1 %v6731_v29  ;;  %v861_v18 = vrot.slane %v526_v13, %v7565_v12  ;;  %v7577_v29 = vsub.s32 4, %v855_v8 }
  0xac   : > { %3692 = vmatprep.subr.bf16.mxu0 %v6724_v21  ;;  %3743 = vmatprep.subr.bf16.mxu1 %v6739_v32  ;;  %v869_v21 = vrot.slane %v526_v13, %v7569_v15 }
  0xaf   : > { %3693 = vmatpush1.bf16.msra.mxu0 %v6722_v22  ;;  %3744 = vmatpush1.bf16.msra.mxu1 %v6737_v33 }
  0xb0   : > { %3694 = vmatprep.subr.bf16.mxu0 %v6730_v25  ;;  %3745 = vmatprep.subr.bf16.mxu1 %v6745_v36 }
  0xb3   : > { %3695 = vmatpush1.bf16.msra.mxu0 %v6728_v26  ;;  %3746 = vmatpush1.bf16.msra.mxu1 %v6743_v37 }
  0xb4   : > { %3696 = vmatprep.subr.bf16.mxu0 %v6736_v30  ;;  %3747 = vmatprep.subr.bf16.mxu1 %v6751_v40  ;;  %v7579_v30 = vsub.s32 5, %v855_v8 }
  0xb7   : > { %3697 = vmatpush1.bf16.msra.mxu0 %v6734_v31  ;;  %3748 = vmatpush1.bf16.msra.mxu1 %v6749_v41 }
  0xb8   : > { %3698 = vmatprep.subr.bf16.mxu0 %v6742_v34  ;;  %3749 = vmatprep.subr.bf16.mxu1 %v6757_v44  ;;  %v7581_v34 = vsub.s32 6, %v855_v8 }
  0xbb   : > { %3699 = vmatpush2.bf16.msra.mxu0 %v6740_v35  ;;  %3750 = vmatpush2.bf16.msra.mxu1 %v6755_v45  ;;  %v7583_v35 = vsub.s32 7, %v855_v8 }
  0xbc   : > { %3700 = vmatprep.subr.bf16.mxu0 %v6748_v38  ;;  %3751 = vmatprep.subr.bf16.mxu1 %v6763_v48 }
  0xbd   : > { %v885_v48 = vrot.slane %v526_v13, %v7583_v35 }
  0xbf   : > { %3701 = vmatpush2.bf16.msra.mxu0 %v6746_v39  ;;  %3752 = vmatpush2.bf16.msra.mxu1 %v6761_v49 }
  0xc0   : > { %3702 = vmatprep.subr.bf16.mxu0 %v6754_v42  ;;  %3753 = vmatprep.subr.bf16.mxu1 %v6769_v52  ;;  %v873_v42 = vrot.slane %v526_v13, %v7577_v29 }
  0xc3   : > { %3703 = vmatpush2.bf16.msra.mxu0 %v6752_v43  ;;  %3754 = vmatpush2.bf16.msra.mxu1 %v6767_v53  ;;  %v877_v43 = vrot.slane %v526_v13, %v7579_v30 }
  0xc4   : > { %3704 = vmatprep.subr.bf16.mxu0 %v6760_v46  ;;  %3755 = vmatprep.subr.bf16.mxu1 %v6775_v56 }
  0xc7   : > { %3705 = vmatpush2.bf16.msra.mxu0 %v6758_v47  ;;  %3756 = vmatpush2.bf16.msra.mxu1 %v6773_v57  ;;  %v881_v47 = vrot.slane %v526_v13, %v7581_v34 }
  0xc8   : > { %3706 = vmatprep.subr.bf16.mxu0 %v6766_v50  ;;  %3757 = vmatprep.subr.bf16.mxu1 %v6781_v60 }
  0xcb   : > { %3707 = vmatpush2.bf16.msra.mxu0 %v6764_v51  ;;  %3758 = vmatpush2.bf16.msra.mxu1 %v6779_v61 }
  0xcc   : > { %3708 = vmatprep.subr.bf16.mxu0 %v6772_v54  ;;  %3759 = vmatprep.subr.bf16.mxu1 %v6787_v0 }
  0xcf   : > { %3709 = vmatpush2.bf16.msra.mxu0 %v6770_v55  ;;  %3760 = vmatpush2.bf16.msra.mxu1 %v6785_v2 }
  0xd0   : > { %3710 = vmatprep.subr.bf16.mxu0 %v6778_v58  ;;  %3761 = vmatprep.subr.bf16.mxu1 %v6793_v5 }
  0xd3   : > { %3711 = vmatpush2.bf16.msra.mxu0 %v6776_v59  ;;  %3762 = vmatpush2.bf16.msra.mxu1 %v6791_v4  ;;  %v527_v59 = vld [vmem:[#allocation8 + $0x8] sm:$0xff] }
  0xd4   : > { %3712 = vmatprep.subr.bf16.mxu0 %v6784_v62  ;;  %3763 = vmatprep.subr.bf16.mxu1 %v6799_v1  ;;  %v893_v4 = vrot.slane %v527_v59, %v7565_v12  ;;  %v897_v1 = vrot.slane %v527_v59, %v7567_v14 }
  0xd7   : > { %3713 = vmatpush2.bf16.msra.mxu0 %v6782_v63  ;;  %3764 = vmatpush2.bf16.msra.mxu1 %v6797_v6 }
  0xd8   : > { %3784 = vmatprep.subr.bf16.mxu0 %v6790_v3  ;;  %3835 = vmatprep.subr.bf16.mxu1 %v6805_v28  ;;  %v889_v3 = vrot.slane %v527_v59, %v7563_v11  ;;  %v901_v28 = vrot.slane %v527_v59, %v7569_v15 }
 0x122   : > { %v1052_v19 = vpop.f32.mrf.mxu0  ;;  %v1093_v22 = vpop.f32.mrf.mxu1 }
 0x123   : > { %v1053_v25 = vadd.f32 %v1052_v19, %v857_v17  ;;  %v1094_v31 = vadd.f32 %v1093_v22, %v865_v20 }
 0x124   : > { %v1054_v23 = vpop.f32.mrf.mxu0  ;;  %v1095_v27 = vpop.f32.mrf.mxu1 }
 0x125   : > { %v1055_v26 = vadd.f32 %v1054_v23, %v861_v18  ;;  %v1096_v32 = vadd.f32 %v1095_v27, %v869_v21 }
 0x126   : > { %v1056_v33 = vpop.f32.mrf.mxu0  ;;  %v1097_v37 = vpop.f32.mrf.mxu1 }
 0x127   : > { %v1676_v36 = vcombine.low %v1053_v25, %v1055_v26  ;;  %v1700_v38 = vcombine.low %v1094_v31, %v1096_v32  ;;  %v905_v31 = vrot.slane %v527_v59, %v7577_v29  ;;  %v909_v32 = vrot.slane %v527_v59, %v7579_v30 }
 0x128   : > { %v1057_v39 = vpop.f32.mrf.mxu0  ;;  %v1098_v41 = vpop.f32.mrf.mxu1  ;;  %v913_v37 = vrot.slane %v527_v59, %v7581_v34 }
 0x129   : > { %v1683_v40 = vrot.slane %v1676_v36, %v7575_v24  ;;  %v1707_v45 = vrot.slane %v1700_v38, %v7575_v24  ;;  %v917_v38 = vrot.slane %v527_v59, %v7583_v35 }
 0x12a   : > { %v1134_v46 = vpop.f32.mrf.mxu0  ;;  %v1175_v50 = vpop.f32.mrf.mxu1 }
 0x12b   : > { %v1690_v49 = vrot.slane %v1683_v40, %v7575_v24  ;;  %v1714_v51 = vrot.slane %v1707_v45, %v7575_v24  ;;  %v1135_v53 = vadd.f32 %v1134_v46, %v873_v42  ;;  %v1176_v56 = vadd.f32 %v1175_v50, %v881_v47  ;;  %v528_v50 = vld [vmem:[#allocation8 + $0x10] sm:$0xff] }
 0x12c   : > { %v1136_v52 = vpop.f32.mrf.mxu0  ;;  %v1177_v55 = vpop.f32.mrf.mxu1 }
 0x12d   : > { %1696 = vst.msk [vmem:[#allocation2] ss:$8 sm:$0x3] %vm7588_vm1, %v1690_v49  ;;  %v1137_v54 = vadd.f32 %v1136_v52, %v877_v43  ;;  %1717 = vst.msk [vmem:[#allocation2 + $0x1] ss:$8 sm:$0x3] %vm7588_vm1, %v1714_v51  ;;  %v1178_v57 = vadd.f32 %v1177_v55, %v885_v48 }
 0x12e   : > { %v1138_v58 = vpop.f32.mrf.mxu0  ;;  %v1179_v61 = vpop.f32.mrf.mxu1 }
 0x12f   : > { %v1721_v60 = vcombine.low %v1135_v53, %v1137_v54  ;;  %v1742_v62 = vcombine.low %v1176_v56, %v1178_v57  ;;  %v921_v57 = vrot.slane %v528_v50, %v7563_v11  ;;  %v925_v58 = vrot.slane %v528_v50, %v7565_v12 }
 0x130   : > { %v1139_v63 = vpop.f32.mrf.mxu0  ;;  %v1180_v2 = vpop.f32.mrf.mxu1  ;;  %v929_v61 = vrot.slane %v528_v50, %v7567_v14 }
 0x131   : > { %v1728_v0 = vrot.slane %v1721_v60, %v7575_v24  ;;  %v1749_v5 = vrot.slane %v1742_v62, %v7575_v24  ;;  %v933_v62 = vrot.slane %v528_v50, %v7569_v15 }
 0x132   : > { %v1216_v6 = vpop.f32.mrf.mxu0  ;;  %v1257_v8 = vpop.f32.mrf.mxu1 }
 0x133   : > { %v1735_v7 = vrot.slane %v1728_v0, %v7575_v24  ;;  %v1756_v9 = vrot.slane %v1749_v5, %v7575_v24  ;;  %v1217_v13 = vadd.f32 %v1216_v6, %v889_v3  ;;  %v1258_v18 = vadd.f32 %v1257_v8, %v897_v1 }
 0x134   : > { %v1218_v10 = vpop.f32.mrf.mxu0  ;;  %v1259_v17 = vpop.f32.mrf.mxu1 }
 0x135   : > { %1738 = vst.msk [vmem:[#allocation2 + $0x2] ss:$8 sm:$0x3] %vm7588_vm1, %v1735_v7  ;;  %v1219_v16 = vadd.f32 %v1218_v10, %v893_v4  ;;  %1759 = vst.msk [vmem:[#allocation2 + $0x3] ss:$8 sm:$0x3] %vm7588_vm1, %v1756_v9  ;;  %v1260_v19 = vadd.f32 %v1259_v17, %v901_v28 }
 0x136   : > { %v1220_v20 = vpop.f32.mrf.mxu0  ;;  %v1261_v22 = vpop.f32.mrf.mxu1 }
 0x137   : > { %v1763_v21 = vcombine.low %v1217_v13, %v1219_v16  ;;  %v1784_v23 = vcombine.low %v1258_v18, %v1260_v19  ;;  %v937_v18 = vrot.slane %v528_v50, %v7577_v29  ;;  %v941_v19 = vrot.slane %v528_v50, %v7579_v30 }
 0x138   : > { %v1221_v25 = vpop.f32.mrf.mxu0  ;;  %v1262_v27 = vpop.f32.mrf.mxu1  ;;  %v945_v22 = vrot.slane %v528_v50, %v7581_v34 }
 0x139   : > { %v1770_v26 = vrot.slane %v1763_v21, %v7575_v24  ;;  %v1791_v33 = vrot.slane %v1784_v23, %v7575_v24  ;;  %v949_v23 = vrot.slane %v528_v50, %v7583_v35 }
 0x13a   : > { %v1298_v36 = vpop.f32.mrf.mxu0  ;;  %v1339_v40 = vpop.f32.mrf.mxu1 }
 0x13b   : > { %v1777_v39 = vrot.slane %v1770_v26, %v7575_v24  ;;  %v1798_v41 = vrot.slane %v1791_v33, %v7575_v24  ;;  %v1299_v43 = vadd.f32 %v1298_v36, %v905_v31  ;;  %v1340_v47 = vadd.f32 %v1339_v40, %v913_v37  ;;  %v529_v40 = vld [vmem:[#allocation8 + $0x18] sm:$0xff] }
 0x13c   : > { %v1300_v42 = vpop.f32.mrf.mxu0  ;;  %v1341_v46 = vpop.f32.mrf.mxu1 }
 0x13d   : > { %1780 = vst.msk [vmem:[#allocation2 + $0x5] ss:$8 sm:$0x3] %vm7588_vm1, %v1777_v39  ;;  %v1301_v45 = vadd.f32 %v1300_v42, %v909_v32  ;;  %1801 = vst.msk [vmem:[#allocation2 + $0x6] ss:$8 sm:$0x3] %vm7588_vm1, %v1798_v41  ;;  %v1342_v48 = vadd.f32 %v1341_v46, %v917_v38 }
 0x13e   : > { %v1302_v49 = vpop.f32.mrf.mxu0  ;;  %v1343_v52 = vpop.f32.mrf.mxu1 }
 0x13f   : > { %v1805_v51 = vcombine.low %v1299_v43, %v1301_v45  ;;  %v1826_v53 = vcombine.low %v1340_v47, %v1342_v48  ;;  %v953_v48 = vrot.slane %v529_v40, %v7563_v11  ;;  %v957_v49 = vrot.slane %v529_v40, %v7565_v12 }
 0x140   : > { %v1303_v54 = vpop.f32.mrf.mxu0  ;;  %v1344_v56 = vpop.f32.mrf.mxu1  ;;  %v961_v52 = vrot.slane %v529_v40, %v7567_v14 }
 0x141   : > { %v1812_v55 = vrot.slane %v1805_v51, %v7575_v24  ;;  %v1833_v59 = vrot.slane %v1826_v53, %v7575_v24  ;;  %v965_v53 = vrot.slane %v529_v40, %v7569_v15 }
 0x142   : > { %v1380_v60 = vpop.f32.mrf.mxu0  ;;  %v1421_v0 = vpop.f32.mrf.mxu1 }
 0x143   : > { %v1819_v63 = vrot.slane %v1812_v55, %v7575_v24  ;;  %v1840_v2 = vrot.slane %v1833_v59, %v7575_v24  ;;  %v1381_v4 = vadd.f32 %v1380_v60, %v921_v57  ;;  %v1422_v1 = vadd.f32 %v1421_v0, %v929_v61 }
 0x144   : > { %v1382_v3 = vpop.f32.mrf.mxu0  ;;  %v1423_v6 = vpop.f32.mrf.mxu1 }
 0x145   : > { %1822 = vst.msk [vmem:[#allocation2 + $0x7] ss:$8 sm:$0x3] %vm7588_vm1, %v1819_v63  ;;  %v1383_v5 = vadd.f32 %v1382_v3, %v925_v58  ;;  %1843 = vst.msk [vmem:[#allocation2 + $0x10] ss:$8 sm:$0x3] %vm7588_vm1, %v1840_v2  ;;  %v1424_v28 = vadd.f32 %v1423_v6, %v933_v62 }
 0x146   : > { %v1384_v7 = vpop.f32.mrf.mxu0  ;;  %v1425_v9 = vpop.f32.mrf.mxu1 }
 0x147   : > { %v1847_v8 = vcombine.low %v1381_v4, %v1383_v5  ;;  %v1868_v10 = vcombine.low %v1422_v1, %v1424_v28  ;;  %v969_v1 = vrot.slane %v529_v40, %v7577_v29  ;;  %v973_v28 = vrot.slane %v529_v40, %v7579_v30 }
 0x148   : > { %v1385_v13 = vpop.f32.mrf.mxu0  ;;  %v1426_v17 = vpop.f32.mrf.mxu1  ;;  %v977_v9 = vrot.slane %v529_v40, %v7581_v34 }
 0x149   : > { %v1854_v16 = vrot.slane %v1847_v8, %v7575_v24  ;;  %v1875_v20 = vrot.slane %v1868_v10, %v7575_v24  ;;  %v981_v10 = vrot.slane %v529_v40, %v7583_v35 }
 0x14a   : > { %v1462_v21 = vpop.f32.mrf.mxu0  ;;  %v1503_v26 = vpop.f32.mrf.mxu1 }
 0x14b   : > { %v1861_v25 = vrot.slane %v1854_v16, %v7575_v24  ;;  %v1882_v27 = vrot.slane %v1875_v20, %v7575_v24  ;;  %v1463_v32 = vadd.f32 %v1462_v21, %v937_v18  ;;  %v1504_v37 = vadd.f32 %v1503_v26, %v945_v22 }
 0x14c   : > { %v1464_v31 = vpop.f32.mrf.mxu0  ;;  %v1505_v36 = vpop.f32.mrf.mxu1 }
 0x14d   : > { %1864 = vst.msk [vmem:[#allocation2 + $0x12] ss:$8 sm:$0x3] %vm7588_vm1, %v1861_v25  ;;  %v1465_v33 = vadd.f32 %v1464_v31, %v941_v19  ;;  %1885 = vst.msk [vmem:[#allocation2 + $0x13] ss:$8 sm:$0x3] %vm7588_vm1, %v1882_v27  ;;  %v1506_v38 = vadd.f32 %v1505_v36, %v949_v23 }
 0x14e   : > { %v1466_v39 = vpop.f32.mrf.mxu0  ;;  %v1507_v42 = vpop.f32.mrf.mxu1 }
 0x14f   : > { %v1889_v41 = vcombine.low %v1463_v32, %v1465_v33  ;;  %v1910_v43 = vcombine.low %v1504_v37, %v1506_v38  ;;  %v2014_v33 = vld [vmem:[#allocation2 + $0x8] sm:$0xff]  ;;  %v2013_v38 = vld [vmem:[#allocation2] sm:$0xff] }
 0x150   : > { %v1467_v45 = vpop.f32.mrf.mxu0  ;;  %v1508_v47 = vpop.f32.mrf.mxu1 }
 0x151   : > { %v1896_v46 = vrot.slane %v1889_v41, %v7575_v24  ;;  %v1917_v50 = vrot.slane %v1910_v43, %v7575_v24  ;;  %v6788_v41 = vld [vmem:[#allocation10 + $0x4e0] ss:$16 sps:$4 sm:$0xff]   ;;  %v6796_v43 = vld [vmem:[#allocation10 + $0x4c4] ss:$16 sps:$4 sm:$0xff]   ;;  %v2020_v45 = vld [vmem:[#allocation2 + $0x8] sm:$0xfe] }
 0x152   : > { %v1544_v51 = vpop.f32.mrf.mxu0  ;;  %v1585_v55 = vpop.f32.mrf.mxu1  ;;  %v2024_v47 = vld [vmem:[#allocation2 + $0x8] sm:$0xe0] }
 0x153   : > { %v1903_v54 = vrot.slane %v1896_v46, %v7575_v24  ;;  %v1924_v56 = vrot.slane %v1917_v50, %v7575_v24  ;;  %v1545_v58 = vadd.f32 %v1544_v51, %v953_v48  ;;  %v1586_v61 = vadd.f32 %v1585_v55, %v961_v52  ;;  %v6802_v46 = vld [vmem:[#allocation10 + $0x4a4] ss:$16 sps:$4 sm:$0xff]   ;;  %v6800_v48 = vld [vmem:[#allocation10 + $0x4a0] ss:$16 sps:$4 sm:$0xff]  }
 0x154   : > { %v1546_v57 = vpop.f32.mrf.mxu0  ;;  %v1587_v60 = vpop.f32.mrf.mxu1  ;;  %v2019_v51 = vld [vmem:[#allocation2] sm:$0xfe] }
 0x155   : > { %1906 = vst.msk [vmem:[#allocation2 + $0x14] ss:$8 sm:$0x3] %vm7588_vm1, %v1903_v54  ;;  %v1547_v59 = vadd.f32 %v1546_v57, %v957_v49  ;;  %1927 = vst.msk [vmem:[#allocation2 + $0x15] ss:$8 sm:$0x3] %vm7588_vm1, %v1924_v56  ;;  %v1588_v62 = vadd.f32 %v1587_v60, %v965_v53 }
 0x156   : > { %v1548_v63 = vpop.f32.mrf.mxu0  ;;  %v1589_v2 = vpop.f32.mrf.mxu1  ;;  %v2043_v49 = vrot.slane %v2020_v45, 1  ;;  %v2066_v60 = vrot.slane %v2024_v47, 5  ;;  %v6830_v45 = vld [vmem:[#allocation10 + $0x400] ss:$16 sps:$4 sm:$0xff]   ;;  %v6838_v47 = vld [vmem:[#allocation10 + $0x5e4] ss:$16 sps:$4 sm:$0xff]  }
 0x157   : > { %v1931_v0 = vcombine.low %v1545_v58, %v1547_v59  ;;  %v1952_v3 = vcombine.low %v1586_v61, %v1588_v62  ;;  %v2040_v63 = vrot.slane %v2019_v51, 1  ;;  %v6808_v2 = vld [vmem:[#allocation10 + $0x484] ss:$16 sps:$4 sm:$0xff]   ;;  %v6839_v51 = vld [vmem:[#allocation10 + $0x620] ss:$16 sps:$4 sm:$0xff]  }
 0x158   : > { %v1549_v4 = vpop.f32.mrf.mxu0  ;;  %v1590_v6 = vpop.f32.mrf.mxu1 }
 0x159   : > { %v1938_v5 = vrot.slane %v1931_v0, %v7575_v24  ;;  %v1959_v7 = vrot.slane %v1952_v3, %v7575_v24 }
 0x15a   : > { %v1626_v8 = vpop.f32.mrf.mxu0  ;;  %v1667_v16 = vpop.f32.mrf.mxu1 }
 0x15b   : > { %v1945_v13 = vrot.slane %v1938_v5, %v7575_v24  ;;  %v1966_v17 = vrot.slane %v1959_v7, %v7575_v24  ;;  %v1627_v19 = vadd.f32 %v1626_v8, %v969_v1  ;;  %v1668_v30 = vadd.f32 %v1667_v16, %v977_v9  ;;  %v6811_v16 = vld [vmem:[#allocation10 + $0x6c4] ss:$16 sps:$4 sm:$0xff]  }
 0x15c   : > { %v1628_v18 = vpop.f32.mrf.mxu0  ;;  %v1669_v20 = vpop.f32.mrf.mxu1 }
 0x15d   : > { %1948 = vst.msk [vmem:[#allocation2 + $0x17] ss:$8 sm:$0x3] %vm7588_vm1, %v1945_v13  ;;  %v1629_v29 = vadd.f32 %v1628_v18, %v973_v28  ;;  %1969 = vst.msk [vmem:[#allocation2 + $0x20] ss:$8 sm:$0x3] %vm7588_vm1, %v1966_v17  ;;  %v1670_v21 = vadd.f32 %v1669_v20, %v981_v10 }
 0x15e   : > { %v1630_v34 = vpop.f32.mrf.mxu0  ;;  %v1671_v35 = vpop.f32.mrf.mxu1  ;;  %v6803_v28 = vld [vmem:[#allocation10 + $0x6e0] ss:$16 sps:$4 sm:$0xff]   ;;  %v6814_v18 = vld [vmem:[#allocation10 + $0x464] ss:$16 sps:$4 sm:$0xff]   ;;  %v2030_v20 = vld [vmem:[#allocation2 + $0x8] sm:$0xc0] }
 0x15f   : > { %v1973_v22 = vcombine.low %v1627_v19, %v1629_v29  ;;  %v1994_v23 = vcombine.low %v1668_v30, %v1670_v21  ;;  %v6806_v13 = vld [vmem:[#allocation10 + $0x480] ss:$16 sps:$4 sm:$0xff]   ;;  %v6817_v21 = vld [vmem:[#allocation10 + $0x6a4] ss:$16 sps:$4 sm:$0xff]   ;;  %v2091_v35 = vrot.slane %v2030_v20, 6 }
 0x160   : > { %v1631_v25 = vpop.f32.mrf.mxu0  ;;  %v1672_v27 = vpop.f32.mrf.mxu1  ;;  %v6809_v29 = vld [vmem:[#allocation10 + $0x6c0] ss:$16 sps:$4 sm:$0xff]  }
 0x161   : > { %v1980_v26 = vrot.slane %v1973_v22, %v7575_v24  ;;  %v2001_v31 = vrot.slane %v1994_v23, %v7575_v24  ;;  %v6812_v30 = vld [vmem:[#allocation10 + $0x460] ss:$16 sps:$4 sm:$0xff]   ;;  %v6820_v22 = vld [vmem:[#allocation10 + $0x444] ss:$16 sps:$4 sm:$0xff]  }
 0x162   : > { %v6815_v25 = vld [vmem:[#allocation10 + $0x6a0] ss:$16 sps:$4 sm:$0xff]  }
 0x163   : > { %v1987_v32 = vrot.slane %v1980_v26, %v7575_v24  ;;  %v2008_v36 = vrot.slane %v2001_v31, %v7575_v24  ;;  %v6794_v24 = vld [vmem:[#allocation10 + $0x4c0] ss:$16 sps:$4 sm:$0xff]  }
 0x164   : > { %v7677_v37 = vld [vmem:[#allocation2 + $0x18] sm:$0xff]  ;;  %v7679_v39 = vld [vmem:[#allocation2 + $0x10] sm:$0xff] }
 0x165   : > { %1990 = vst.msk [vmem:[#allocation2 + $0x21] ss:$8 sm:$0x3] %vm7588_vm1, %v1987_v32  ;;  %v7684_v40 = vpack.c.bf16 %v7677_v37, %v2014_v33  ;;  %v7687_v42 = vpack.c.bf16 %v7679_v39, %v2013_v38  ;;  %2011 = vst.msk [vmem:[#allocation2 + $0x22] ss:$8 sm:$0x3] %vm7588_vm1, %v2008_v36 }
 0x166   : > { %v2044_v50 = vrot.slane %v7677_v37, 1  ;;  %v2067_v44 = vrot.slane %v7677_v37, 5  ;;  %v2041_v52 = vrot.slane %v7679_v39, 1  ;;  %v2092_v34 = vrot.slane %v7677_v37, 6  ;;  %v6818_v27 = vld [vmem:[#allocation10 + $0x440] ss:$16 sps:$4 sm:$0xff]  }
 0x167   : > { %3714 = vmatprep.mubr.bf16.mxu0 %v7684_v40  ;;  %v6823_v32 = vld [vmem:[#allocation10 + $0x684] ss:$16 sps:$4 sm:$0xff]   ;;  %v6821_v37 = vld [vmem:[#allocation10 + $0x680] ss:$16 sps:$4 sm:$0xff]  }
 0x168   : > { %3715 = vmatmul.mubr.bf16.vlgmr.msra.gmra.mxu0 %v7687_v42  ;;  %v2045_v3 = vsel %vm2039_vm2, %v2043_v49, %v2044_v50  ;;  %v2068_v5 = vsel %vm2062_vm3, %v2066_v60, %v2067_v44  ;;  %v2042_v7 = vsel %vm2039_vm2, %v2040_v63, %v2041_v52  ;;  %v2093_v31 = vsel %vm2087_vm4, %v2091_v35, %v2092_v34  ;;  %v6826_v36 = vld [vmem:[#allocation10 + $0x424] ss:$16 sps:$4 sm:$0xff]   ;;  %v6824_v38 = vld [vmem:[#allocation10 + $0x420] ss:$16 sps:$4 sm:$0xff]  }
 0x169   : > { %3785 = vmatpush1.bf16.msra.mxu0 %v6788_v41  ;;  %v6829_v41 = vld [vmem:[#allocation10 + $0x664] ss:$16 sps:$4 sm:$0xff]   ;;  %v6836_v49 = vld [vmem:[#allocation10 + $0x5e0] ss:$16 sps:$4 sm:$0xff]  }
 0x16a   : > { %3786 = vmatprep.subr.bf16.mxu0 %v6796_v43  ;;  %v6832_v43 = vld [vmem:[#allocation10 + $0x404] ss:$16 sps:$4 sm:$0xff]   ;;  %v6851_v63 = vld [vmem:[#allocation10 + $0x7e0] ss:$16 sps:$4 sm:$0xff]  }
 0x16b   : > { %v6853_v60 = vld [vmem:[#allocation10 + $0x7e4] ss:$16 sps:$4 sm:$0xff]   ;;  %v6872_v20 = vld [vmem:[#allocation10 + $0x520] ss:$16 sps:$4 sm:$0xff]  }
 0x16c   : > { %v2018_v53 = vld [vmem:[#allocation2 + $0x28] sm:$0xf]  ;;  %v2017_v54 = vld [vmem:[#allocation2 + $0x20] sm:$0xf] }
 0x16d   : > { %3787 = vmatpush1.bf16.msra.mxu0 %v6794_v24  ;;  %v2022_v55 = vld [vmem:[#allocation2 + $0x28] sm:$0x1f]  ;;  %v7696_v56 = vpack.c.bf16 %v2018_v53, %v2018_v53  ;;  %v7698_v57 = vpack.c.bf16 %v2017_v54, %v2017_v54  ;;  %v2021_v61 = vld [vmem:[#allocation2 + $0x20] sm:$0x1f] }
 0x16e   : > { %3788 = vmatprep.subr.bf16.mxu0 %v6802_v46  ;;  %v2048_v58 = vrot.slane %v2022_v55, 1  ;;  %v7700_v59 = vld [vmem:[#allocation2 + $0x28] sm:$0xff]  ;;  %v2046_v0 = vrot.slane %v2021_v61, 1  ;;  %v6827_v24 = vld [vmem:[#allocation10 + $0x660] ss:$16 sps:$4 sm:$0xff]  }
 0x16f   : > { %v2071_v62 = vrot.slane %v7700_v59, 5  ;;  %3724 = vmatprep.mubr.bf16.mxu0 %v7696_v56  ;;  %v2096_v19 = vrot.slane %v7700_v59, 6  ;;  %v6835_v46 = vld [vmem:[#allocation10 + $0x644] ss:$16 sps:$4 sm:$0xff]   ;;  %v6845_v55 = vld [vmem:[#allocation10 + $0x600] ss:$16 sps:$4 sm:$0xff]  }
 0x170   : > { %v2049_v4 = vsel %vm2039_vm2, %v2044_v50, %v2048_v58  ;;  %3725 = vmatmul.mubr.bf16.gmra.mxu0 %v7698_v57  ;;  %v2047_v8 = vsel %vm2039_vm2, %v2041_v52, %v2046_v0  ;;  %v7720_v17 = vpack.c.bf16 %v2048_v58, %v2048_v58  ;;  %v7730_v26 = vpack.c.bf16 %v2046_v0, %v2046_v0  ;;  %v6841_v50 = vld [vmem:[#allocation10 + $0x624] ss:$16 sps:$4 sm:$0xff]   ;;  %v6842_v52 = vld [vmem:[#allocation10 + $0x5c0] ss:$16 sps:$4 sm:$0xff]   ;;  %v6910_v59 = vld [vmem:[#allocation10 + $0x6c] ss:$16 sps:$4 sm:$0xff]  }
 0x171   : > { %v7708_v6 = vpack.c.bf16 %v2049_v4, %v2045_v3  ;;  %v2072_v1 = vsel %vm2062_vm3, %v2067_v44, %v2071_v62  ;;  %3789 = vmatpush1.bf16.msra.mxu0 %v6800_v48  ;;  %v7717_v10 = vpack.c.bf16 %v2047_v8, %v2042_v7  ;;  %v2097_v23 = vsel %vm2087_vm4, %v2092_v34, %v2096_v19  ;;  %v6833_v48 = vld [vmem:[#allocation10 + $0x640] ss:$16 sps:$4 sm:$0xff]   ;;  %v6844_v44 = vld [vmem:[#allocation10 + $0x5c4] ss:$16 sps:$4 sm:$0xff]  }
 0x172   : > { %v7715_v9 = vpack.c.bf16 %v2072_v1, %v2068_v5  ;;  %3790 = vmatprep.subr.bf16.mxu0 %v6808_v2  ;;  %v7733_v33 = vpack.c.bf16 %v2097_v23, %v2093_v31  ;;  %v6847_v53 = vld [vmem:[#allocation10 + $0x604] ss:$16 sps:$4 sm:$0xff]   ;;  %v6848_v58 = vld [vmem:[#allocation10 + $0x5a0] ss:$16 sps:$4 sm:$0xff]  }
 0x173   : > { %3765 = vmatprep.mubr.bf16.mxu1 %v7708_v6  ;;  %v6850_v54 = vld [vmem:[#allocation10 + $0x5a4] ss:$16 sps:$4 sm:$0xff]   ;;  %v6854_v0 = vld [vmem:[#allocation10 + $0x580] ss:$16 sps:$4 sm:$0xff]  }
 0x174   : > { %3816 = vmatprep.mubr.bf16.mxu0 %v7715_v9  ;;  %3766 = vmatmul.mubr.bf16.vlgmr.msra.gmra.mxu1 %v7717_v10  ;;  %v6856_v61 = vld [vmem:[#allocation10 + $0x584] ss:$16 sps:$4 sm:$0xff]   ;;  %v6857_v4 = vld [vmem:[#allocation10 + $0x7c0] ss:$16 sps:$4 sm:$0xff]  }
 0x175   : > { %3836 = vmatpush1.bf16.msra.mxu1 %v6803_v28  ;;  %3775 = vmatprep.mubr.bf16.mxu1 %v7720_v17  ;;  %v6859_v2 = vld [vmem:[#allocation10 + $0x7c4] ss:$16 sps:$4 sm:$0xff]   ;;  %v6860_v5 = vld [vmem:[#allocation10 + $0x560] ss:$16 sps:$4 sm:$0xff]  }
 0x176   : > { %3791 = vmatpush1.bf16.msra.mxu0 %v6806_v13  ;;  %3837 = vmatprep.subr.bf16.mxu1 %v6811_v16  ;;  %v6862_v3 = vld [vmem:[#allocation10 + $0x564] ss:$16 sps:$4 sm:$0xff]   ;;  %v6863_v7 = vld [vmem:[#allocation10 + $0x7a0] ss:$16 sps:$4 sm:$0xff]  }
 0x177   : > { %3792 = vmatprep.subr.bf16.mxu0 %v6814_v18  ;;  %v6865_v1 = vld [vmem:[#allocation10 + $0x7a4] ss:$16 sps:$4 sm:$0xff]   ;;  %v6866_v8 = vld [vmem:[#allocation10 + $0x540] ss:$16 sps:$4 sm:$0xff]  }
 0x178   : > { %v6868_v28 = vld [vmem:[#allocation10 + $0x544] ss:$16 sps:$4 sm:$0xff]   ;;  %v6869_v18 = vld [vmem:[#allocation10 + $0x780] ss:$16 sps:$4 sm:$0xff]  }
 0x179   : > { %3838 = vmatpush1.bf16.msra.mxu1 %v6809_v29  ;;  %v6871_v13 = vld [vmem:[#allocation10 + $0x784] ss:$16 sps:$4 sm:$0xff]   ;;  %v6875_v35 = vld [vmem:[#allocation10 + $0x760] ss:$16 sps:$4 sm:$0xff]  }
 0x17a   : > { %3793 = vmatpush1.bf16.msra.mxu0 %v6812_v30  ;;  %3839 = vmatprep.subr.bf16.mxu1 %v6817_v21  ;;  %v6874_v16 = vld [vmem:[#allocation10 + $0x524] ss:$16 sps:$4 sm:$0xff]   ;;  %v6878_v31 = vld [vmem:[#allocation10 + $0x500] ss:$16 sps:$4 sm:$0xff]  }
 0x17b   : > { %3794 = vmatprep.subr.bf16.mxu0 %v6820_v22  ;;  %v7737_v29 = vld [vmem:[#allocation2 + $0x20] sm:$0xff]  ;;  %v2028_v21 = vld [vmem:[#allocation2 + $0x38] sm:$0x1] }
 0x17c   : > { %3776 = vmatmul.mubr.bf16.gmra.mxu1 %v7730_v26  ;;  %v6877_v30 = vld [vmem:[#allocation10 + $0x764] ss:$16 sps:$4 sm:$0xff]   ;;  %v2069_v22 = vrot.slane %v7737_v29, 5 }
 0x17d   : > { %3840 = vmatpush1.bf16.msra.mxu1 %v6815_v25  ;;  %3867 = vmatprep.mubr.bf16.mxu1 %v7733_v33  ;;  %v6880_v34 = vld [vmem:[#allocation10 + $0x504] ss:$16 sps:$4 sm:$0xff]   ;;  %v2075_v25 = vrot.slane %v2028_v21, 5  ;;  %v6908_v21 = vld [vmem:[#allocation10 + $0x68] ss:$16 sps:$4 sm:$0xff]  }
 0x17e   : > { %3795 = vmatpush1.bf16.msra.mxu0 %v6818_v27  ;;  %3841 = vmatprep.subr.bf16.mxu1 %v6823_v32  ;;  %v2023_v23 = vld [vmem:[#allocation2] sm:$0xe0]  ;;  %v2064_v27 = vrot.slane %v7679_v39, 5 }
 0x17f   : > { %3796 = vmatprep.subr.bf16.mxu0 %v6826_v36  ;;  %v6883_v32 = vld [vmem:[#allocation10 + $0x744] ss:$16 sps:$4 sm:$0xff]   ;;  %v6886_v36 = vld [vmem:[#allocation10 + $0xec] ss:$16 sps:$4 sm:$0xff]  }
 0x181   : > { %3842 = vmatpush1.bf16.msra.mxu1 %v6821_v37  ;;  %v2063_v37 = vrot.slane %v2023_v23, 5 }
 0x182   : > { %3797 = vmatpush1.bf16.msra.mxu0 %v6824_v38  ;;  %3843 = vmatprep.subr.bf16.mxu1 %v6829_v41  ;;  %v2070_v38 = vsel %vm2062_vm3, %v2064_v27, %v2069_v22  ;;  %v6881_v41 = vld [vmem:[#allocation10 + $0x740] ss:$16 sps:$4 sm:$0xff]  }
 0x183   : > { %3798 = vmatprep.subr.bf16.mxu0 %v6832_v43  ;;  %v2076_v43 = vsel %vm2062_vm3, %v2071_v62, %v2075_v25  ;;  %v6890_v62 = vld [vmem:[#allocation10 + $0xc8] ss:$16 sps:$4 sm:$0xff]  }
 0x184   : > { %v6914_v25 = vld [vmem:[#allocation10 + $0x48] ss:$16 sps:$4 sm:$0xff]  }
 0x185   : > { %3844 = vmatpush1.bf16.msra.mxu1 %v6827_v24  ;;  %v2027_v24 = vld [vmem:[#allocation2 + $0x30] sm:$0x1] }
 0x186   : > { %3799 = vmatpush1.bf16.msra.mxu0 %v6830_v45  ;;  %3845 = vmatprep.subr.bf16.mxu1 %v6835_v46  ;;  %v2065_v45 = vsel %vm2062_vm3, %v2063_v37, %v2064_v27  ;;  %v6884_v46 = vld [vmem:[#allocation10 + $0xe8] ss:$16 sps:$4 sm:$0xff]   ;;  %v6919_v27 = vld [vmem:[#allocation10 + $0x28c] ss:$16 sps:$4 sm:$0xff]  }
 0x187   : > { %3800 = vmatprep.subr.bf16.mxu0 %v6838_v47  ;;  %v7746_v47 = vpack.c.bf16 %v2070_v38, %v2065_v45  ;;  %v6925_v37 = vld [vmem:[#allocation10 + $0x26c] ss:$16 sps:$4 sm:$0xff]  }
 0x188   : > { %v6928_v38 = vld [vmem:[#allocation10 + $0xc] ss:$16 sps:$4 sm:$0xff]  }
 0x189   : > { %3846 = vmatpush1.bf16.msra.mxu1 %v6833_v48  ;;  %v6889_v48 = vld [vmem:[#allocation10 + $0x724] ss:$16 sps:$4 sm:$0xff]   ;;  %v6934_v45 = vld [vmem:[#allocation10 + $0x1ec] ss:$16 sps:$4 sm:$0xff]  }
 0x18a   : > { %3801 = vmatpush2.bf16.msra.mxu0 %v6836_v49  ;;  %3847 = vmatprep.subr.bf16.mxu1 %v6841_v50  ;;  %v6892_v49 = vld [vmem:[#allocation10 + $0xcc] ss:$16 sps:$4 sm:$0xff]   ;;  %v7748_v50 = vpack.c.bf16 %v2076_v43, %v2076_v43  ;;  %v6926_v43 = vld [vmem:[#allocation10 + $0x8] ss:$16 sps:$4 sm:$0xff]  }
 0x18b   : > { %3802 = vmatprep.subr.bf16.mxu0 %v6844_v44  ;;  %v2073_v44 = vrot.slane %v2027_v24, 5  ;;  %v6931_v24 = vld [vmem:[#allocation10 + $0x24c] ss:$16 sps:$4 sm:$0xff]  }
 0x18d   : > { %3848 = vmatpush1.bf16.msra.mxu1 %v6839_v51  ;;  %v6887_v51 = vld [vmem:[#allocation10 + $0x720] ss:$16 sps:$4 sm:$0xff]  }
 0x18e   : > { %3803 = vmatpush2.bf16.msra.mxu0 %v6842_v52  ;;  %3849 = vmatprep.subr.bf16.mxu1 %v6847_v53  ;;  %v2032_v52 = vld [vmem:[#allocation2 + $0x38] sm:$0x3] }
 0x18f   : > { %3804 = vmatprep.subr.bf16.mxu0 %v6850_v54  ;;  %v6895_v53 = vld [vmem:[#allocation10 + $0x704] ss:$16 sps:$4 sm:$0xff]   ;;  %v6898_v54 = vld [vmem:[#allocation10 + $0xac] ss:$16 sps:$4 sm:$0xff]  }
 0x191   : > { %3850 = vmatpush1.bf16.msra.mxu1 %v6845_v55  ;;  %v2094_v55 = vrot.slane %v7737_v29, 6  ;;  %v6907_v29 = vld [vmem:[#allocation10 + $0x2cc] ss:$16 sps:$4 sm:$0xff]  }
 0x192   : > { %3805 = vmatpush2.bf16.msra.mxu0 %v6848_v58  ;;  %3851 = vmatprep.subr.bf16.mxu1 %v6853_v60  ;;  %v2074_v58 = vsel %vm2062_vm3, %v2069_v22, %v2073_v44  ;;  %v2029_v60 = vld [vmem:[#allocation2] sm:$0xc0]  ;;  %v6916_v22 = vld [vmem:[#allocation10 + $0x4c] ss:$16 sps:$4 sm:$0xff]   ;;  %v6935_v44 = vld [vmem:[#allocation10 + $0x228] ss:$16 sps:$4 sm:$0xff]  }
 0x193   : > { %3806 = vmatprep.subr.bf16.mxu0 %v6856_v61  ;;  %v2100_v61 = vrot.slane %v2032_v52, 6  ;;  %v6943_v52 = vld [vmem:[#allocation10 + $0x20c] ss:$16 sps:$4 sm:$0xff]  }
 0x195   : > { %3852 = vmatpush2.bf16.msra.mxu1 %v6851_v63  ;;  %v2089_v63 = vrot.slane %v7679_v39, 6 }
 0x196   : > { %3807 = vmatpush2.bf16.msra.mxu0 %v6854_v0  ;;  %3853 = vmatprep.subr.bf16.mxu1 %v6859_v2  ;;  %v6893_v0 = vld [vmem:[#allocation10 + $0x700] ss:$16 sps:$4 sm:$0xff]   ;;  %v6896_v2 = vld [vmem:[#allocation10 + $0xa8] ss:$16 sps:$4 sm:$0xff]  }
 0x197   : > { %3808 = vmatprep.subr.bf16.mxu0 %v6862_v3  ;;  %v7755_v3 = vpack.c.bf16 %v2074_v58, %v2074_v58  ;;  %v6952_v58 = vld [vmem:[#allocation10 + $0x18c] ss:$16 sps:$4 sm:$0xff]  }
 0x199   : > { %3854 = vmatpush2.bf16.msra.mxu1 %v6857_v4  ;;  %v2088_v4 = vrot.slane %v2029_v60, 6  ;;  %v6947_v60 = vld [vmem:[#allocation10 + $0x3e8] ss:$16 sps:$4 sm:$0xff]  }
 0x19a   : > { %3809 = vmatpush2.bf16.msra.mxu0 %v6860_v5  ;;  %3855 = vmatprep.subr.bf16.mxu1 %v6865_v1  ;;  %v2095_v5 = vsel %vm2087_vm4, %v2089_v63, %v2094_v55  ;;  %v6901_v1 = vld [vmem:[#allocation10 + $0x2ec] ss:$16 sps:$4 sm:$0xff]  }
 0x19b   : > { %3810 = vmatprep.subr.bf16.mxu0 %v6868_v28  ;;  %v6904_v28 = vld [vmem:[#allocation10 + $0x8c] ss:$16 sps:$4 sm:$0xff]   ;;  %v2090_v39 = vsel %vm2087_vm4, %v2088_v4, %v2089_v63  ;;  %v6956_v4 = vld [vmem:[#allocation10 + $0x168] ss:$16 sps:$4 sm:$0xff]  }
 0x19c   : > { %v6955_v63 = vld [vmem:[#allocation10 + $0x3cc] ss:$16 sps:$4 sm:$0xff]  }
 0x19d   : > { %3856 = vmatpush2.bf16.msra.mxu1 %v6863_v7  ;;  %v2101_v7 = vsel %vm2087_vm4, %v2096_v19, %v2100_v61  ;;  %v6950_v61 = vld [vmem:[#allocation10 + $0x188] ss:$16 sps:$4 sm:$0xff]  }
 0x19e   : > { %3811 = vmatpush2.bf16.msra.mxu0 %v6866_v8  ;;  %3857 = vmatprep.subr.bf16.mxu1 %v6871_v13  ;;  %v2031_v8 = vld [vmem:[#allocation2 + $0x30] sm:$0x3]  ;;  %v6899_v13 = vld [vmem:[#allocation10 + $0x2e8] ss:$16 sps:$4 sm:$0xff]  }
 0x19f   : > { %3812 = vmatprep.subr.bf16.mxu0 %v6874_v16  ;;  %v7764_v16 = vpack.c.bf16 %v2095_v5, %v2090_v39  ;;  %v2098_v19 = vrot.slane %v2031_v8, 6  ;;  %v6961_v5 = vld [vmem:[#allocation10 + $0x3ac] ss:$16 sps:$4 sm:$0xff]  }
 0x1a0   : > { %v6967_v8 = vld [vmem:[#allocation10 + $0x38c] ss:$16 sps:$4 sm:$0xff]  }
 0x1a1   : > { %3858 = vmatpush2.bf16.msra.mxu1 %v6869_v18  ;;  %v6902_v18 = vld [vmem:[#allocation10 + $0x88] ss:$16 sps:$4 sm:$0xff]   ;;  %v6970_v39 = vld [vmem:[#allocation10 + $0x12c] ss:$16 sps:$4 sm:$0xff]  }
 0x1a2   : > { %3813 = vmatpush2.bf16.msra.mxu0 %v6872_v20  ;;  %3859 = vmatprep.subr.bf16.mxu1 %v6877_v30  ;;  %v7766_v20 = vpack.c.bf16 %v2101_v7, %v2101_v7  ;;  %v6905_v30 = vld [vmem:[#allocation10 + $0x2c8] ss:$16 sps:$4 sm:$0xff]  }
 0x1a3   : > { %3814 = vmatprep.subr.bf16.mxu0 %v6880_v34  ;;  %v2099_v34 = vsel %vm2087_vm4, %v2094_v55, %v2098_v19  ;;  %v6949_v55 = vld [vmem:[#allocation10 + $0x3ec] ss:$16 sps:$4 sm:$0xff]   ;;  %v6962_v7 = vld [vmem:[#allocation10 + $0x148] ss:$16 sps:$4 sm:$0xff]  }
 0x1a4   : > { %v7771_v23 = vpack.c.bf16 %v2099_v34, %v2099_v34  ;;  %v6971_v19 = vld [vmem:[#allocation10 + $0x368] ss:$16 sps:$4 sm:$0xff]  }
 0x1a5   : > { %3860 = vmatpush2.bf16.msra.mxu1 %v6875_v35  ;;  %v6911_v35 = vld [vmem:[#allocation10 + $0x2a8] ss:$16 sps:$4 sm:$0xff]  }
 0x1a6   : > { %3815 = vmatpush2.bf16.msra.mxu0 %v6878_v31  ;;  %3861 = vmatprep.subr.bf16.mxu1 %v6883_v32  ;;  %v6922_v31 = vld [vmem:[#allocation10 + $0x2c] ss:$16 sps:$4 sm:$0xff]   ;;  %v6917_v32 = vld [vmem:[#allocation10 + $0x288] ss:$16 sps:$4 sm:$0xff]  }
 0x1a7   : > { %3886 = vmatprep.subr.bf16.mxu0 %v6886_v36  ;;  %v6920_v36 = vld [vmem:[#allocation10 + $0x28] ss:$16 sps:$4 sm:$0xff]  }
 0x1a8   : > { %v6977_v34 = vld [vmem:[#allocation10 + $0x348] ss:$16 sps:$4 sm:$0xff]  }
 0x1a9   : > { %3817 = vmatmul.mubr.bf16.vlgmr.msra.gmra.mxu0 %v7746_v47  ;;  %3862 = vmatpush2.bf16.msra.mxu1 %v6881_v41  ;;  %v6923_v41 = vld [vmem:[#allocation10 + $0x268] ss:$16 sps:$4 sm:$0xff]  }
 0x1aa   : > { %3826 = vmatprep.mubr.bf16.mxu0 %v7748_v50  ;;  %3887 = vmatpush1.bf16.msra.mxu0 %v6884_v46  ;;  %v6929_v46 = vld [vmem:[#allocation10 + $0x248] ss:$16 sps:$4 sm:$0xff]  }
 0x1ab   : > { %3863 = vmatprep.subr.bf16.mxu1 %v6889_v48  ;;  %3888 = vmatprep.subr.bf16.mxu0 %v6892_v49  ;;  %v6937_v48 = vld [vmem:[#allocation10 + $0x22c] ss:$16 sps:$4 sm:$0xff]  }
 0x1ac   : > { %v6940_v49 = vld [vmem:[#allocation10 + $0x1cc] ss:$16 sps:$4 sm:$0xff]  }
 0x1ad   : > { %3864 = vmatpush2.bf16.msra.mxu1 %v6887_v51  ;;  %v6938_v51 = vld [vmem:[#allocation10 + $0x1c8] ss:$16 sps:$4 sm:$0xff]  }
 0x1ae   : > { %3889 = vmatpush1.bf16.msra.mxu0 %v6890_v62  ;;  %3865 = vmatprep.subr.bf16.mxu1 %v6895_v53  ;;  %v6946_v62 = vld [vmem:[#allocation10 + $0x1ac] ss:$16 sps:$4 sm:$0xff]   ;;  %v6941_v53 = vld [vmem:[#allocation10 + $0x208] ss:$16 sps:$4 sm:$0xff]  }
 0x1af   : > { %3890 = vmatprep.subr.bf16.mxu0 %v6898_v54  ;;  %v6944_v54 = vld [vmem:[#allocation10 + $0x1a8] ss:$16 sps:$4 sm:$0xff]  }
 0x1b1   : > { %3827 = vmatmul.mubr.bf16.gmra.mxu0 %v7755_v3  ;;  %3866 = vmatpush2.bf16.msra.mxu1 %v6893_v0  ;;  %v6958_v0 = vld [vmem:[#allocation10 + $0x16c] ss:$16 sps:$4 sm:$0xff]  }
 0x1b2   : > { %3891 = vmatpush1.bf16.msra.mxu0 %v6896_v2  ;;  %3918 = vmatprep.mubr.bf16.mxu0 %v7684_v40  ;;  %v6913_v40 = vld [vmem:[#allocation10 + $0x2ac] ss:$16 sps:$4 sm:$0xff]   ;;  %v6953_v2 = vld [vmem:[#allocation10 + $0x3c8] ss:$16 sps:$4 sm:$0xff]  }
 0x1b3   : > { %3937 = vmatprep.subr.bf16.mxu1 %v6901_v1  ;;  %3892 = vmatprep.subr.bf16.mxu0 %v6904_v28  ;;  %v6964_v1 = vld [vmem:[#allocation10 + $0x14c] ss:$16 sps:$4 sm:$0xff]   ;;  %v6959_v28 = vld [vmem:[#allocation10 + $0x3a8] ss:$16 sps:$4 sm:$0xff]  }
 0x1b4   : > { %3868 = vmatmul.mubr.bf16.vlgmr.msra.gmra.mxu1 %v7764_v16 }
 0x1b5   : > { %3877 = vmatprep.mubr.bf16.mxu1 %v7766_v20  ;;  %3938 = vmatpush1.bf16.msra.mxu1 %v6899_v13  ;;  %v6965_v13 = vld [vmem:[#allocation10 + $0x388] ss:$16 sps:$4 sm:$0xff]  }
 0x1b6   : > { %3893 = vmatpush1.bf16.msra.mxu0 %v6902_v18  ;;  %3939 = vmatprep.subr.bf16.mxu1 %v6907_v29  ;;  %v6968_v18 = vld [vmem:[#allocation10 + $0x128] ss:$16 sps:$4 sm:$0xff]   ;;  %v6973_v29 = vld [vmem:[#allocation10 + $0x36c] ss:$16 sps:$4 sm:$0xff]  }
 0x1b7   : > { %3894 = vmatprep.subr.bf16.mxu0 %v6910_v59  ;;  %v6976_v59 = vld [vmem:[#allocation10 + $0x10c] ss:$16 sps:$4 sm:$0xff]  }
 0x1b9   : > { %3940 = vmatpush1.bf16.msra.mxu1 %v6905_v30  ;;  %v6974_v30 = vld [vmem:[#allocation10 + $0x108] ss:$16 sps:$4 sm:$0xff]  }
 0x1ba   : > { %3895 = vmatpush1.bf16.msra.mxu0 %v6908_v21  ;;  %3941 = vmatprep.subr.bf16.mxu1 %v6913_v40  ;;  %v6979_v21 = vld [vmem:[#allocation10 + $0x34c] ss:$16 sps:$4 sm:$0xff]  }
 0x1bb   : > { %3896 = vmatprep.subr.bf16.mxu0 %v6916_v22  ;;  %v6982_v40 = vld [vmem:[#allocation10 + $0x4ec] ss:$16 sps:$4 sm:$0xff]   ;;  %v6980_v22 = vld [vmem:[#allocation10 + $0x4e8] ss:$16 sps:$4 sm:$0xff]  }
 0x1bc   : > { %3878 = vmatmul.mubr.bf16.gmra.mxu1 %v7771_v23 }
 0x1bd   : > { %3942 = vmatpush1.bf16.msra.mxu1 %v6911_v35  ;;  %3969 = vmatprep.mubr.bf16.mxu1 %v7708_v6  ;;  %v6932_v6 = vld [vmem:[#allocation10 + $0x1e8] ss:$16 sps:$4 sm:$0xff]   ;;  %v6985_v35 = vld [vmem:[#allocation10 + $0x32c] ss:$16 sps:$4 sm:$0xff]  }
 0x1be   : > { %3897 = vmatpush1.bf16.msra.mxu0 %v6914_v25  ;;  %3943 = vmatprep.subr.bf16.mxu1 %v6919_v27  ;;  %v6988_v25 = vld [vmem:[#allocation10 + $0x4cc] ss:$16 sps:$4 sm:$0xff]   ;;  %v6983_v27 = vld [vmem:[#allocation10 + $0x328] ss:$16 sps:$4 sm:$0xff]  }
 0x1bf   : > { %3898 = vmatprep.subr.bf16.mxu0 %v6922_v31  ;;  %v6986_v31 = vld [vmem:[#allocation10 + $0x4c8] ss:$16 sps:$4 sm:$0xff]  }
 0x1c1   : > { %3944 = vmatpush1.bf16.msra.mxu1 %v6917_v32  ;;  %v6991_v32 = vld [vmem:[#allocation10 + $0x30c] ss:$16 sps:$4 sm:$0xff]  }
 0x1c2   : > { %3899 = vmatpush1.bf16.msra.mxu0 %v6920_v36  ;;  %3945 = vmatprep.subr.bf16.mxu1 %v6925_v37  ;;  %v6994_v36 = vld [vmem:[#allocation10 + $0x4ac] ss:$16 sps:$4 sm:$0xff]   ;;  %v6989_v37 = vld [vmem:[#allocation10 + $0x308] ss:$16 sps:$4 sm:$0xff]  }
 0x1c3   : > { %3900 = vmatprep.subr.bf16.mxu0 %v6928_v38  ;;  %v6992_v38 = vld [vmem:[#allocation10 + $0x4a8] ss:$16 sps:$4 sm:$0xff]  }
 0x1c5   : > { %3946 = vmatpush1.bf16.msra.mxu1 %v6923_v41  ;;  %v6997_v41 = vld [vmem:[#allocation10 + $0x6ec] ss:$16 sps:$4 sm:$0xff]  }
 0x1c6   : > { %3901 = vmatpush1.bf16.msra.mxu0 %v6926_v43  ;;  %3947 = vmatprep.subr.bf16.mxu1 %v6931_v24  ;;  %v7000_v43 = vld [vmem:[#allocation10 + $0x48c] ss:$16 sps:$4 sm:$0xff]  }
 0x1c7   : > { %3902 = vmatprep.subr.bf16.mxu0 %v6934_v45  ;;  %v7003_v24 = vld [vmem:[#allocation10 + $0x6cc] ss:$16 sps:$4 sm:$0xff]  }
 0x1c8   : > { %v7006_v45 = vld [vmem:[#allocation10 + $0x46c] ss:$16 sps:$4 sm:$0xff]  }
 0x1c9   : > { %3948 = vmatpush1.bf16.msra.mxu1 %v6929_v46  ;;  %v7001_v46 = vld [vmem:[#allocation10 + $0x6c8] ss:$16 sps:$4 sm:$0xff]  }
 0x1ca   : > { %3903 = vmatpush2.bf16.msra.mxu0 %v6932_v6  ;;  %3949 = vmatprep.subr.bf16.mxu1 %v6937_v48  ;;  %v7004_v6 = vld [vmem:[#allocation10 + $0x468] ss:$16 sps:$4 sm:$0xff]   ;;  %v7012_v48 = vld [vmem:[#allocation10 + $0x44c] ss:$16 sps:$4 sm:$0xff]  }
 0x1cb   : > { %3904 = vmatprep.subr.bf16.mxu0 %v6940_v49  ;;  %v7007_v49 = vld [vmem:[#allocation10 + $0x6a8] ss:$16 sps:$4 sm:$0xff]  }
 0x1cd   : > { %3950 = vmatpush1.bf16.msra.mxu1 %v6935_v44  ;;  %v7015_v44 = vld [vmem:[#allocation10 + $0x68c] ss:$16 sps:$4 sm:$0xff]  }
 0x1ce   : > { %3905 = vmatpush2.bf16.msra.mxu0 %v6938_v51  ;;  %3951 = vmatprep.subr.bf16.mxu1 %v6943_v52  ;;  %v7018_v51 = vld [vmem:[#allocation10 + $0x42c] ss:$16 sps:$4 sm:$0xff]  }
 0x1cf   : > { %3906 = vmatprep.subr.bf16.mxu0 %v6946_v62  ;;  %v7021_v52 = vld [vmem:[#allocation10 + $0x66c] ss:$16 sps:$4 sm:$0xff]  }
 0x1d0   : > { %v7024_v62 = vld [vmem:[#allocation10 + $0x40c] ss:$16 sps:$4 sm:$0xff]  }
 0x1d1   : > { %3952 = vmatpush1.bf16.msra.mxu1 %v6941_v53  ;;  %v7019_v53 = vld [vmem:[#allocation10 + $0x668] ss:$16 sps:$4 sm:$0xff]  }
 0x1d2   : > { %3907 = vmatpush2.bf16.msra.mxu0 %v6944_v54  ;;  %3953 = vmatprep.subr.bf16.mxu1 %v6949_v55  ;;  %v7022_v54 = vld [vmem:[#allocation10 + $0x408] ss:$16 sps:$4 sm:$0xff]   ;;  %v7027_v55 = vld [vmem:[#allocation10 + $0x64c] ss:$16 sps:$4 sm:$0xff]  }
 0x1d3   : > { %3908 = vmatprep.subr.bf16.mxu0 %v6952_v58  ;;  %v7030_v58 = vld [vmem:[#allocation10 + $0x5ec] ss:$16 sps:$4 sm:$0xff]  }
 0x1d5   : > { %3954 = vmatpush2.bf16.msra.mxu1 %v6947_v60  ;;  %v7033_v60 = vld [vmem:[#allocation10 + $0x62c] ss:$16 sps:$4 sm:$0xff]  }
 0x1d6   : > { %3909 = vmatpush2.bf16.msra.mxu0 %v6950_v61  ;;  %3955 = vmatprep.subr.bf16.mxu1 %v6955_v63  ;;  %v7036_v61 = vld [vmem:[#allocation10 + $0x5cc] ss:$16 sps:$4 sm:$0xff]   ;;  %v7031_v63 = vld [vmem:[#allocation10 + $0x628] ss:$16 sps:$4 sm:$0xff]  }
 0x1d7   : > { %3910 = vmatprep.subr.bf16.mxu0 %v6958_v0  ;;  %v7034_v0 = vld [vmem:[#allocation10 + $0x5c8] ss:$16 sps:$4 sm:$0xff]  }
 0x1d9   : > { %3956 = vmatpush2.bf16.msra.mxu1 %v6953_v2  ;;  %v7039_v2 = vld [vmem:[#allocation10 + $0x60c] ss:$16 sps:$4 sm:$0xff]  }
 0x1da   : > { %3911 = vmatpush2.bf16.msra.mxu0 %v6956_v4  ;;  %3957 = vmatprep.subr.bf16.mxu1 %v6961_v5  ;;  %v7042_v4 = vld [vmem:[#allocation10 + $0x5ac] ss:$16 sps:$4 sm:$0xff]   ;;  %v7037_v5 = vld [vmem:[#allocation10 + $0x608] ss:$16 sps:$4 sm:$0xff]  }
 0x1db   : > { %3912 = vmatprep.subr.bf16.mxu0 %v6964_v1  ;;  %v7040_v1 = vld [vmem:[#allocation10 + $0x5a8] ss:$16 sps:$4 sm:$0xff]  }
 0x1dd   : > { %3958 = vmatpush2.bf16.msra.mxu1 %v6959_v28  ;;  %v7045_v28 = vld [vmem:[#allocation10 + $0x7ec] ss:$16 sps:$4 sm:$0xff]  }
 0x1de   : > { %3913 = vmatpush2.bf16.msra.mxu0 %v6962_v7  ;;  %3959 = vmatprep.subr.bf16.mxu1 %v6967_v8  ;;  %v7048_v7 = vld [vmem:[#allocation10 + $0x58c] ss:$16 sps:$4 sm:$0xff]   ;;  %v7043_v8 = vld [vmem:[#allocation10 + $0x7e8] ss:$16 sps:$4 sm:$0xff]  }
 0x1df   : > { %3914 = vmatprep.subr.bf16.mxu0 %v6970_v39  ;;  %v7046_v39 = vld [vmem:[#allocation10 + $0x588] ss:$16 sps:$4 sm:$0xff]  }
 0x1e1   : > { %3960 = vmatpush2.bf16.msra.mxu1 %v6965_v13  ;;  %v7051_v13 = vld [vmem:[#allocation10 + $0x7cc] ss:$16 sps:$4 sm:$0xff]  }
 0x1e2   : > { %3915 = vmatpush2.bf16.msra.mxu0 %v6968_v18  ;;  %3961 = vmatprep.subr.bf16.mxu1 %v6973_v29  ;;  %v7054_v18 = vld [vmem:[#allocation10 + $0x56c] ss:$16 sps:$4 sm:$0xff]   ;;  %v7049_v29 = vld [vmem:[#allocation10 + $0x7c8] ss:$16 sps:$4 sm:$0xff]  }
 0x1e3   : > { %3916 = vmatprep.subr.bf16.mxu0 %v6976_v59  ;;  %v7052_v59 = vld [vmem:[#allocation10 + $0x568] ss:$16 sps:$4 sm:$0xff]  }
 0x1e5   : > { %3962 = vmatpush2.bf16.msra.mxu1 %v6971_v19  ;;  %v7057_v19 = vld [vmem:[#allocation10 + $0x7ac] ss:$16 sps:$4 sm:$0xff]  }
 0x1e6   : > { %3917 = vmatpush2.bf16.msra.mxu0 %v6974_v30  ;;  %3963 = vmatprep.subr.bf16.mxu1 %v6979_v21  ;;  %v7060_v30 = vld [vmem:[#allocation10 + $0x54c] ss:$16 sps:$4 sm:$0xff]   ;;  %v7055_v21 = vld [vmem:[#allocation10 + $0x7a8] ss:$16 sps:$4 sm:$0xff]  }
 0x1e7   : > { %3988 = vmatprep.subr.bf16.mxu0 %v6982_v40  ;;  %v7058_v40 = vld [vmem:[#allocation10 + $0x548] ss:$16 sps:$4 sm:$0xff]  }
 0x1e9   : > { %3919 = vmatmul.mubr.bf16.vlgmr.msra.gmra.mxu0 %v7687_v42  ;;  %3964 = vmatpush2.bf16.msra.mxu1 %v6977_v34  ;;  %v6995_v42 = vld [vmem:[#allocation10 + $0x6e8] ss:$16 sps:$4 sm:$0xff]   ;;  %v7063_v34 = vld [vmem:[#allocation10 + $0x78c] ss:$16 sps:$4 sm:$0xff]  }
 0x1ea   : > { %3928 = vmatprep.mubr.bf16.mxu0 %v7696_v56  ;;  %3989 = vmatpush1.bf16.msra.mxu0 %v6980_v22  ;;  %v6998_v56 = vld [vmem:[#allocation10 + $0x488] ss:$16 sps:$4 sm:$0xff]   ;;  %v7066_v22 = vld [vmem:[#allocation10 + $0x52c] ss:$16 sps:$4 sm:$0xff]  }
 0x1eb   : > { %3965 = vmatprep.subr.bf16.mxu1 %v6985_v35  ;;  %3990 = vmatprep.subr.bf16.mxu0 %v6988_v25  ;;  %v7061_v35 = vld [vmem:[#allocation10 + $0x788] ss:$16 sps:$4 sm:$0xff]  }
 0x1ec   : > { %v7064_v25 = vld [vmem:[#allocation10 + $0x528] ss:$16 sps:$4 sm:$0xff]  }
 0x1ed   : > { %3966 = vmatpush2.bf16.msra.mxu1 %v6983_v27  ;;  %v7069_v27 = vld [vmem:[#allocation10 + $0x76c] ss:$16 sps:$4 sm:$0xff]  }
 0x1ee   : > { %3991 = vmatpush1.bf16.msra.mxu0 %v6986_v31  ;;  %3967 = vmatprep.subr.bf16.mxu1 %v6991_v32  ;;  %v7072_v31 = vld [vmem:[#allocation10 + $0x50c] ss:$16 sps:$4 sm:$0xff]   ;;  %v7067_v32 = vld [vmem:[#allocation10 + $0x768] ss:$16 sps:$4 sm:$0xff]  }
 0x1ef   : > { %3992 = vmatprep.subr.bf16.mxu0 %v6994_v36  ;;  %v7070_v36 = vld [vmem:[#allocation10 + $0x508] ss:$16 sps:$4 sm:$0xff]  }
 0x1f1   : > { %3929 = vmatmul.mubr.bf16.gmra.mxu0 %v7698_v57  ;;  %3968 = vmatpush2.bf16.msra.mxu1 %v6989_v37  ;;  %v7009_v57 = vld [vmem:[#allocation10 + $0x6ac] ss:$16 sps:$4 sm:$0xff]  }
 0x1f2   : > { %3993 = vmatpush1.bf16.msra.mxu0 %v6992_v38  ;;  %4020 = vmatprep.mubr.bf16.mxu0 %v7715_v9  ;;  %v7010_v9 = vld [vmem:[#allocation10 + $0x448] ss:$16 sps:$4 sm:$0xff]   ;;  %v7075_v37 = vld [vmem:[#allocation10 + $0x74c] ss:$16 sps:$4 sm:$0xff]  }
 0x1f3   : > { %4039 = vmatprep.subr.bf16.mxu1 %v6997_v41  ;;  %3994 = vmatprep.subr.bf16.mxu0 %v7000_v43  ;;  %v7073_v38 = vld [vmem:[#allocation10 + $0x748] ss:$16 sps:$4 sm:$0xff]   ;;  %v7078_v41 = vld [vmem:[#allocation10 + $0x72c] ss:$16 sps:$4 sm:$0xff]  }
 0x1f4   : > { %3970 = vmatmul.mubr.bf16.vlgmr.msra.gmra.mxu1 %v7717_v10  ;;  %v7013_v10 = vld [vmem:[#allocation10 + $0x688] ss:$16 sps:$4 sm:$0xff]  }
 0x1f5   : > { %3979 = vmatprep.mubr.bf16.mxu1 %v7720_v17  ;;  %4040 = vmatpush1.bf16.msra.mxu1 %v6995_v42  ;;  %v7016_v17 = vld [vmem:[#allocation10 + $0x428] ss:$16 sps:$4 sm:$0xff]  }
 0x1f6   : > { %3995 = vmatpush1.bf16.msra.mxu0 %v6998_v56  ;;  %4041 = vmatprep.subr.bf16.mxu1 %v7003_v24  ;;  %v7076_v42 = vld [vmem:[#allocation10 + $0x728] ss:$16 sps:$4 sm:$0xff]   ;;  %v7081_v24 = vld [vmem:[#allocation10 + $0x70c] ss:$16 sps:$4 sm:$0xff]  }
 0x1f7   : > { %3996 = vmatprep.subr.bf16.mxu0 %v7006_v45 }
 0x1f9   : > { %4042 = vmatpush1.bf16.msra.mxu1 %v7001_v46  ;;  %v7079_v46 = vld [vmem:[#allocation10 + $0x708] ss:$16 sps:$4 sm:$0xff]  }
 0x1fa   : > { %3997 = vmatpush1.bf16.msra.mxu0 %v7004_v6  ;;  %4043 = vmatprep.subr.bf16.mxu1 %v7009_v57 }
 0x1fb   : > { %3998 = vmatprep.subr.bf16.mxu0 %v7012_v48 }
 0x1fc   : > { %3980 = vmatmul.mubr.bf16.gmra.mxu1 %v7730_v26  ;;  %v7025_v26 = vld [vmem:[#allocation10 + $0x648] ss:$16 sps:$4 sm:$0xff]  }
 0x1fd   : > { %4044 = vmatpush1.bf16.msra.mxu1 %v7007_v49  ;;  %4071 = vmatprep.mubr.bf16.mxu1 %v7733_v33  ;;  %v7028_v33 = vld [vmem:[#allocation10 + $0x5e8] ss:$16 sps:$4 sm:$0xff]  }
 0x1fe   : > { %3999 = vmatpush1.bf16.msra.mxu0 %v7010_v9  ;;  %4045 = vmatprep.subr.bf16.mxu1 %v7015_v44 }
 0x1ff   : > { %4000 = vmatprep.subr.bf16.mxu0 %v7018_v51 }
 0x201   : > { %4046 = vmatpush1.bf16.msra.mxu1 %v7013_v10 }
 0x202   : > { %4001 = vmatpush1.bf16.msra.mxu0 %v7016_v17  ;;  %4047 = vmatprep.subr.bf16.mxu1 %v7021_v52  ;;  %v7082_v52 = vld [vmem:[#allocation11 + $0x70] ss:$8 sps:$4 sm:$0xff]  }
 0x203   : > { %4002 = vmatprep.subr.bf16.mxu0 %v7024_v62  ;;  %v7084_v62 = vld [vmem:[#allocation11 + $0x74] ss:$8 sps:$4 sm:$0xff]  }
 0x205   : > { %4048 = vmatpush1.bf16.msra.mxu1 %v7019_v53  ;;  %v7085_v53 = vld [vmem:[#allocation11 + $0x170] ss:$8 sps:$4 sm:$0xff]  }
 0x206   : > { %4003 = vmatpush1.bf16.msra.mxu0 %v7022_v54  ;;  %4049 = vmatprep.subr.bf16.mxu1 %v7027_v55  ;;  %v7090_v54 = vld [vmem:[#allocation11 + $0x64] ss:$8 sps:$4 sm:$0xff]  }
 0x207   : > { %4004 = vmatprep.subr.bf16.mxu0 %v7030_v58  ;;  %v7093_v55 = vld [vmem:[#allocation11 + $0x164] ss:$8 sps:$4 sm:$0xff]   ;;  %v7088_v58 = vld [vmem:[#allocation11 + $0x60] ss:$8 sps:$4 sm:$0xff]  }
 0x209   : > { %4050 = vmatpush1.bf16.msra.mxu1 %v7025_v26  ;;  %v7091_v26 = vld [vmem:[#allocation11 + $0x160] ss:$8 sps:$4 sm:$0xff]  }
 0x20a   : > { %4005 = vmatpush2.bf16.msra.mxu0 %v7028_v33  ;;  %4051 = vmatprep.subr.bf16.mxu1 %v7033_v60  ;;  %v7099_v33 = vld [vmem:[#allocation11 + $0x154] ss:$8 sps:$4 sm:$0xff]   ;;  %v7094_v60 = vld [vmem:[#allocation11 + $0x50] ss:$8 sps:$4 sm:$0xff]  }
 0x20b   : > { %4006 = vmatprep.subr.bf16.mxu0 %v7036_v61  ;;  %v7097_v61 = vld [vmem:[#allocation11 + $0x150] ss:$8 sps:$4 sm:$0xff]  }
 0x20d   : > { %4052 = vmatpush1.bf16.msra.mxu1 %v7031_v63  ;;  %v7102_v63 = vld [vmem:[#allocation11 + $0x44] ss:$8 sps:$4 sm:$0xff]  }
 0x20e   : > { %4007 = vmatpush2.bf16.msra.mxu0 %v7034_v0  ;;  %4053 = vmatprep.subr.bf16.mxu1 %v7039_v2  ;;  %v7105_v0 = vld [vmem:[#allocation11 + $0x144] ss:$8 sps:$4 sm:$0xff]   ;;  %v7100_v2 = vld [vmem:[#allocation11 + $0x40] ss:$8 sps:$4 sm:$0xff]  }
 0x20f   : > { %4008 = vmatprep.subr.bf16.mxu0 %v7042_v4  ;;  %v7103_v4 = vld [vmem:[#allocation11 + $0x140] ss:$8 sps:$4 sm:$0xff]  }
 0x211   : > { %4054 = vmatpush1.bf16.msra.mxu1 %v7037_v5  ;;  %v7108_v5 = vld [vmem:[#allocation11 + $0x34] ss:$8 sps:$4 sm:$0xff]  }
 0x212   : > { %4009 = vmatpush2.bf16.msra.mxu0 %v7040_v1  ;;  %4055 = vmatprep.subr.bf16.mxu1 %v7045_v28  ;;  %v7111_v1 = vld [vmem:[#allocation11 + $0x134] ss:$8 sps:$4 sm:$0xff]   ;;  %v7106_v28 = vld [vmem:[#allocation11 + $0x30] ss:$8 sps:$4 sm:$0xff]  }
 0x213   : > { %4010 = vmatprep.subr.bf16.mxu0 %v7048_v7  ;;  %v7109_v7 = vld [vmem:[#allocation11 + $0x130] ss:$8 sps:$4 sm:$0xff]  }
 0x215   : > { %4056 = vmatpush2.bf16.msra.mxu1 %v7043_v8  ;;  %v7114_v8 = vld [vmem:[#allocation11 + $0x24] ss:$8 sps:$4 sm:$0xff]  }
 0x216   : > { %4011 = vmatpush2.bf16.msra.mxu0 %v7046_v39  ;;  %4057 = vmatprep.subr.bf16.mxu1 %v7051_v13  ;;  %v7117_v39 = vld [vmem:[#allocation11 + $0x124] ss:$8 sps:$4 sm:$0xff]   ;;  %v7112_v13 = vld [vmem:[#allocation11 + $0x20] ss:$8 sps:$4 sm:$0xff]  }
 0x217   : > { %4012 = vmatprep.subr.bf16.mxu0 %v7054_v18  ;;  %v7115_v18 = vld [vmem:[#allocation11 + $0x120] ss:$8 sps:$4 sm:$0xff]  }
 0x219   : > { %4058 = vmatpush2.bf16.msra.mxu1 %v7049_v29  ;;  %v7120_v29 = vld [vmem:[#allocation11 + $0x14] ss:$8 sps:$4 sm:$0xff]  }
 0x21a   : > { %4013 = vmatpush2.bf16.msra.mxu0 %v7052_v59  ;;  %4059 = vmatprep.subr.bf16.mxu1 %v7057_v19  ;;  %v7123_v59 = vld [vmem:[#allocation11 + $0x114] ss:$8 sps:$4 sm:$0xff]   ;;  %v7118_v19 = vld [vmem:[#allocation11 + $0x10] ss:$8 sps:$4 sm:$0xff]  }
 0x21b   : > { %4014 = vmatprep.subr.bf16.mxu0 %v7060_v30  ;;  %v7121_v30 = vld [vmem:[#allocation11 + $0x110] ss:$8 sps:$4 sm:$0xff]  }
 0x21d   : > { %4060 = vmatpush2.bf16.msra.mxu1 %v7055_v21  ;;  %v7126_v21 = vld [vmem:[#allocation11 + $0x4] ss:$8 sps:$4 sm:$0xff]  }
 0x21e   : > { %4015 = vmatpush2.bf16.msra.mxu0 %v7058_v40  ;;  %4061 = vmatprep.subr.bf16.mxu1 %v7063_v34  ;;  %v7129_v40 = vld [vmem:[#allocation11 + $0x104] ss:$8 sps:$4 sm:$0xff]   ;;  %v7124_v34 = vld [vmem:[#allocation11] ss:$8 sps:$4 sm:$0xff]  }
 0x21f   : > { %4016 = vmatprep.subr.bf16.mxu0 %v7066_v22  ;;  %v7127_v22 = vld [vmem:[#allocation11 + $0x100] ss:$8 sps:$4 sm:$0xff]  }
 0x221   : > { %4062 = vmatpush2.bf16.msra.mxu1 %v7061_v35  ;;  %v7132_v35 = vld [vmem:[#allocation11 + $0xf4] ss:$8 sps:$4 sm:$0xff]  }
 0x222   : > { %4017 = vmatpush2.bf16.msra.mxu0 %v7064_v25  ;;  %4063 = vmatprep.subr.bf16.mxu1 %v7069_v27  ;;  %v7135_v25 = vld [vmem:[#allocation11 + $0x1f4] ss:$8 sps:$4 sm:$0xff]   ;;  %v7130_v27 = vld [vmem:[#allocation11 + $0xf0] ss:$8 sps:$4 sm:$0xff]  }
 0x223   : > { %4018 = vmatprep.subr.bf16.mxu0 %v7072_v31  ;;  %v7133_v31 = vld [vmem:[#allocation11 + $0x1f0] ss:$8 sps:$4 sm:$0xff]  }
 0x225   : > { %4064 = vmatpush2.bf16.msra.mxu1 %v7067_v32  ;;  %v7816_v32 = vld [vmem:[%s8555_s4] sm:$0xf] }
 0x226   : > { %4019 = vmatpush2.bf16.msra.mxu0 %v7070_v36  ;;  %4065 = vmatprep.subr.bf16.mxu1 %v7075_v37  ;;  %v2385_v37 = vrot.slane %v7816_v32, %v7563_v11 }
 0x227   : > { %4654 = vmatprep.subr.bf16.mxu0 %v7084_v62  ;;  %v7144_v62 = vld [vmem:[#allocation11 + $0xd4] ss:$8 sps:$4 sm:$0xff]  }
 0x228   : > { %v7783_v43 = vpop.f32.mrf.mxu0 }
 0x229   : > { %4021 = vmatmul.mubr.bf16.vlgmr.msra.gmra.mxu0 %v7746_v47  ;;  %4066 = vmatpush2.bf16.msra.mxu1 %v7073_v38 }
 0x22a   : > { %4030 = vmatprep.mubr.bf16.mxu0 %v7748_v50  ;;  %v7787_v56 = vpop.f32.mrf.mxu0  ;;  %4067 = vmatprep.subr.bf16.mxu1 %v7078_v41  ;;  %v7136_v41 = vld [vmem:[#allocation11 + $0xe0] ss:$8 sps:$4 sm:$0xff]  }
 0x22b   : > { %4655 = vmatpush1.bf16.msra.mxu0 %v7082_v52  ;;  %v7142_v52 = vld [vmem:[#allocation11 + $0xd0] ss:$8 sps:$4 sm:$0xff]  }
 0x22c   : > { %v7789_v45 = vpop.f32.mrf.mxu0  ;;  %4656 = vmatprep.subr.bf16.mxu0 %v7090_v54 }
 0x22d   : > { %4068 = vmatpush2.bf16.msra.mxu1 %v7076_v42  ;;  %v7138_v42 = vld [vmem:[#allocation11 + $0xe4] ss:$8 sps:$4 sm:$0xff]  }
 0x22e   : > { %v7791_v6 = vpop.f32.mrf.mxu0  ;;  %4069 = vmatprep.subr.bf16.mxu1 %v7081_v24  ;;  %v7139_v24 = vld [vmem:[#allocation11 + $0x1e0] ss:$8 sps:$4 sm:$0xff]  }
 0x22f   : > { %4657 = vmatpush1.bf16.msra.mxu0 %v7088_v58  ;;  %v7147_v58 = vld [vmem:[#allocation11 + $0x1d4] ss:$8 sps:$4 sm:$0xff]  }
 0x230   : > { %v7794_v57 = vpop.f32.mrf.mxu0 }
 0x231   : > { %4031 = vmatmul.mubr.bf16.gmra.mxu0 %v7755_v3  ;;  %4070 = vmatpush2.bf16.msra.mxu1 %v7079_v46  ;;  %v2389_v46 = vrot.slane %v7816_v32, %v7565_v12 }
 0x232   : > { %v7796_v47 = vpop.f32.mrf.mxu0 }
 0x234   : > { %4072 = vmatmul.mubr.bf16.vlgmr.msra.gmra.mxu1 %v7764_v16  ;;  %v7799_v50 = vpop.f32.mrf.mxu1  ;;  %v3730_v48 = vpop.f32.mrf.mxu0 }
 0x235   : > { %4081 = vmatprep.mubr.bf16.mxu1 %v7766_v20  ;;  %v7087_v20 = vld [vmem:[#allocation11 + $0x174] ss:$8 sps:$4 sm:$0xff]  }
 0x236   : > { %v7802_v49 = vpop.f32.mrf.mxu1  ;;  %v3731_v9 = vpop.f32.mrf.mxu0  ;;  %4735 = vmatprep.subr.bf16.mxu1 %v7087_v20  ;;  %v3719_v20 = vadd.f32 %v7787_v56, %v2389_v46  ;;  %v7151_v56 = vld [vmem:[#allocation11 + $0x1c0] ss:$8 sps:$4 sm:$0xff]  }
 0x237   : > { %4736 = vmatpush1.bf16.msra.mxu1 %v7085_v53  ;;  %v7141_v9 = vld [vmem:[#allocation11 + $0x1e4] ss:$8 sps:$4 sm:$0xff]   ;;  %v7145_v53 = vld [vmem:[#allocation11 + $0x1d0] ss:$8 sps:$4 sm:$0xff]  }
 0x238   : > { %v7804_v44 = vpop.f32.mrf.mxu1  ;;  %4737 = vmatprep.subr.bf16.mxu1 %v7093_v55 }
 0x23a   : > { %v7806_v51 = vpop.f32.mrf.mxu1 }
 0x23b   : > { %4738 = vmatpush1.bf16.msra.mxu1 %v7091_v26  ;;  %v3721_v26 = vadd.f32 %v7789_v45, %v2385_v37  ;;  %v3727_v45 = vadd.f32 %v7794_v57, %v2385_v37 }
 0x23c   : > { %4082 = vmatmul.mubr.bf16.gmra.mxu1 %v7771_v23  ;;  %v7809_v3 = vpop.f32.mrf.mxu1  ;;  %v7096_v23 = vld [vmem:[#allocation11 + $0x54] ss:$8 sps:$4 sm:$0xff]   ;;  %4739 = vmatprep.subr.bf16.mxu1 %v7099_v33 }
 0x23d   : > { %4658 = vmatprep.subr.bf16.mxu0 %v7096_v23  ;;  %v3770_v23 = vadd.f32 %v7802_v49, %v3719_v20 }
 0x23e   : > { %v7811_v10 = vpop.f32.mrf.mxu1  ;;  %4659 = vmatpush1.bf16.msra.mxu0 %v7094_v60  ;;  %v3723_v60 = vadd.f32 %v7791_v6, %v2389_v46 }
 0x23f   : > { %4740 = vmatpush1.bf16.msra.mxu1 %v7097_v61  ;;  %4660 = vmatprep.subr.bf16.mxu0 %v7102_v63  ;;  %v7148_v63 = vld [vmem:[#allocation11 + $0xc0] ss:$8 sps:$4 sm:$0xff]  }
 0x240   : > { %v3781_v17 = vpop.f32.mrf.mxu1  ;;  %4741 = vmatprep.subr.bf16.mxu1 %v7105_v0  ;;  %v7150_v0 = vld [vmem:[#allocation11 + $0xc4] ss:$8 sps:$4 sm:$0xff]   ;;  %v3774_v49 = vadd.f32 %v7806_v51, %v3723_v60 }
 0x241   : > { %v3717_v17 = vadd.f32 %v7783_v43, %v2385_v37 }
 0x242   : > { %v3782_v16 = vpop.f32.mrf.mxu1  ;;  %4661 = vmatpush1.bf16.msra.mxu0 %v7100_v2 }
 0x243   : > { %4742 = vmatpush1.bf16.msra.mxu1 %v7103_v4  ;;  %4662 = vmatprep.subr.bf16.mxu0 %v7108_v5  ;;  %v3768_v54 = vadd.f32 %v7799_v50, %v3717_v17  ;;  %v3772_v50 = vadd.f32 %v7804_v44, %v3721_v26  ;;  %v3778_v44 = vadd.f32 %v7809_v3, %v3727_v45 }
 0x244   : > { %4743 = vmatprep.subr.bf16.mxu1 %v7111_v1  ;;  %v7153_v1 = vld [vmem:[#allocation11 + $0x1c4] ss:$8 sps:$4 sm:$0xff]  }
 0x246   : > { %4663 = vmatpush1.bf16.msra.mxu0 %v7106_v28 }
 0x247   : > { %4744 = vmatpush1.bf16.msra.mxu1 %v7109_v7  ;;  %4664 = vmatprep.subr.bf16.mxu0 %v7114_v8 }
 0x248   : > { %4745 = vmatprep.subr.bf16.mxu1 %v7117_v39 }
 0x24a   : > { %4665 = vmatpush1.bf16.msra.mxu0 %v7112_v13  ;;  %v3729_v13 = vadd.f32 %v7796_v47, %v2389_v46  ;;  %v7162_v46 = vld [vmem:[#allocation11 + $0xa4] ss:$8 sps:$4 sm:$0xff]  }
 0x24b   : > { %4746 = vmatpush1.bf16.msra.mxu1 %v7115_v18  ;;  %4666 = vmatprep.subr.bf16.mxu0 %v7120_v29 }
 0x24c   : > { %4747 = vmatprep.subr.bf16.mxu1 %v7123_v59 }
 0x24e   : > { %4667 = vmatpush1.bf16.msra.mxu0 %v7118_v19  ;;  %v3780_v19 = vadd.f32 %v7811_v10, %v3729_v13 }
 0x24f   : > { %4748 = vmatpush1.bf16.msra.mxu1 %v7121_v30  ;;  %4668 = vmatprep.subr.bf16.mxu0 %v7126_v21 }
 0x250   : > { %4749 = vmatprep.subr.bf16.mxu1 %v7129_v40  ;;  %v7156_v40 = vld [vmem:[#allocation11 + $0xb4] ss:$8 sps:$4 sm:$0xff]  }
 0x252   : > { %4669 = vmatpush1.bf16.msra.mxu0 %v7124_v34  ;;  %v7159_v34 = vld [vmem:[#allocation11 + $0x1b4] ss:$8 sps:$4 sm:$0xff]  }
 0x253   : > { %4750 = vmatpush1.bf16.msra.mxu1 %v7127_v22  ;;  %4670 = vmatprep.subr.bf16.mxu0 %v7132_v35 }
 0x254   : > { %4751 = vmatprep.subr.bf16.mxu1 %v7135_v25  ;;  %v7154_v25 = vld [vmem:[#allocation11 + $0xb0] ss:$8 sps:$4 sm:$0xff]  }
 0x256   : > { %4671 = vmatpush2.bf16.msra.mxu0 %v7130_v27 }
 0x257   : > { %4752 = vmatpush2.bf16.msra.mxu1 %v7133_v31  ;;  %4672 = vmatprep.subr.bf16.mxu0 %v7138_v42  ;;  %v7157_v31 = vld [vmem:[#allocation11 + $0x1b0] ss:$8 sps:$4 sm:$0xff]  }
 0x258   : > { %4753 = vmatprep.subr.bf16.mxu1 %v7141_v9 }
 0x25a   : > { %4673 = vmatpush2.bf16.msra.mxu0 %v7136_v41 }
 0x25b   : > { %4754 = vmatpush2.bf16.msra.mxu1 %v7139_v24  ;;  %4674 = vmatprep.subr.bf16.mxu0 %v7144_v62 }
 0x25c   : > { %4755 = vmatprep.subr.bf16.mxu1 %v7147_v58 }
 0x25e   : > { %4675 = vmatpush2.bf16.msra.mxu0 %v7142_v52 }
 0x25f   : > { %4756 = vmatpush2.bf16.msra.mxu1 %v7145_v53  ;;  %4676 = vmatprep.subr.bf16.mxu0 %v7150_v0  ;;  %v7171_v0 = vld [vmem:[#allocation11 + $0x194] ss:$8 sps:$4 sm:$0xff]  }
 0x260   : > { %4757 = vmatprep.subr.bf16.mxu1 %v7153_v1  ;;  %v7169_v1 = vld [vmem:[#allocation11 + $0x190] ss:$8 sps:$4 sm:$0xff]  }
 0x262   : > { %4677 = vmatpush2.bf16.msra.mxu0 %v7148_v63  ;;  %v7168_v63 = vld [vmem:[#allocation11 + $0x94] ss:$8 sps:$4 sm:$0xff]  }
 0x263   : > { %4758 = vmatpush2.bf16.msra.mxu1 %v7151_v56  ;;  %4678 = vmatprep.subr.bf16.mxu0 %v7156_v40 }
 0x264   : > { %4759 = vmatprep.subr.bf16.mxu1 %v7159_v34 }
 0x266   : > { %4679 = vmatpush2.bf16.msra.mxu0 %v7154_v25  ;;  %v2393_v25 = vrot.slane %v7816_v32, %v7567_v14 }
 0x267   : > { %4760 = vmatpush2.bf16.msra.mxu1 %v7157_v31  ;;  %4680 = vmatprep.subr.bf16.mxu0 %v7162_v46 }
 0x269   : > { %v3818_v36 = vpop.f32.mrf.mxu0 }
 0x26a   : > { %v3819_v33 = vadd.f32 %v3818_v36, %v3768_v54 }
 0x26b   : > { %v3820_v38 = vpop.f32.mrf.mxu0 }
 0x26c   : > { %v3821_v2 = vadd.f32 %v3820_v38, %v3770_v23  ;;  %v7165_v23 = vld [vmem:[#allocation11 + $0x1a4] ss:$8 sps:$4 sm:$0xff]  }
 0x26d   : > { %v3822_v48 = vpop.f32.mrf.mxu0  ;;  %4761 = vmatprep.subr.bf16.mxu1 %v7165_v23 }
 0x26e   : > { %v3823_v7 = vadd.f32 %v3822_v48, %v3772_v50  ;;  %v7166_v50 = vld [vmem:[#allocation11 + $0x90] ss:$8 sps:$4 sm:$0xff]  }
 0x26f   : > { %v3824_v16 = vpop.f32.mrf.mxu0 }
 0x270   : > { %v3825_v18 = vadd.f32 %v3824_v16, %v3774_v49  ;;  %v7160_v16 = vld [vmem:[#allocation11 + $0xa0] ss:$8 sps:$4 sm:$0xff]   ;;  %v7174_v49 = vld [vmem:[#allocation11 + $0x84] ss:$8 sps:$4 sm:$0xff]  }
 0x271   : > { %v3828_v55 = vpop.f32.mrf.mxu0  ;;  %4681 = vmatpush2.bf16.msra.mxu0 %v7160_v16 }
 0x272   : > { %v3829_v30 = vadd.f32 %v3828_v55, %v3778_v44  ;;  %v7163_v55 = vld [vmem:[#allocation11 + $0x1a0] ss:$8 sps:$4 sm:$0xff]   ;;  %4682 = vmatprep.subr.bf16.mxu0 %v7168_v63 }
 0x273   : > { %v3830_v43 = vpop.f32.mrf.mxu0  ;;  %4762 = vmatpush2.bf16.msra.mxu1 %v7163_v55 }
 0x274   : > { %v3869_v61 = vpop.f32.mrf.mxu1  ;;  %v3831_v3 = vadd.f32 %v3830_v43, %v3780_v19  ;;  %4763 = vmatprep.subr.bf16.mxu1 %v7171_v0 }
 0x275   : > { %v3870_v4 = vadd.f32 %v3869_v61, %v3819_v33  ;;  %v3832_v5 = vpop.f32.mrf.mxu0  ;;  %4683 = vmatpush2.bf16.msra.mxu0 %v7166_v50 }
 0x276   : > { %v3871_v28 = vpop.f32.mrf.mxu1  ;;  %4684 = vmatprep.subr.bf16.mxu0 %v7174_v49 }
 0x277   : > { %vm4090_vm5 = vcmp.ge.f32.partialorder %v3870_v4, 0.0  ;;  %v4102_v6 = vmul.f32 0.01, %v3870_v4  ;;  %v3872_v8 = vadd.f32 %v3871_v28, %v3821_v2  ;;  %v3833_v39 = vpop.f32.mrf.mxu0  ;;  %v7177_v28 = vld [vmem:[#allocation11 + $0x184] ss:$8 sps:$4 sm:$0xff]   ;;  %4764 = vmatpush2.bf16.msra.mxu1 %v7169_v1 }
 0x278   : > { %v3873_v29 = vpop.f32.mrf.mxu1  ;;  %4765 = vmatprep.subr.bf16.mxu1 %v7177_v28 }
 0x279   : > { %v4114_v59 = vsel %vm4090_vm5, %v3870_v4, %v4102_v6  ;;  %vm4091_vm6 = vcmp.ge.f32.partialorder %v3872_v8, 0.0  ;;  %v4103_v57 = vmul.f32 0.01, %v3872_v8  ;;  %v3874_v51 = vadd.f32 %v3873_v29, %v3823_v7  ;;  %v7172_v7 = vld [vmem:[#allocation11 + $0x80] ss:$8 sps:$4 sm:$0xff]  }
 0x27a   : > { %4126 = vst [vmem:[#allocation3] ss:$2 sm:$0xf] %v4114_v59  ;;  %v3875_v21 = vpop.f32.mrf.mxu1  ;;  %v4129_v38 = vrot.slane %v4114_v59, 5  ;;  %v7175_v6 = vld [vmem:[#allocation11 + $0x180] ss:$8 sps:$4 sm:$0xff]   ;;  %4685 = vmatpush2.bf16.msra.mxu0 %v7172_v7 }
 0x27b   : > { %v4115_v22 = vsel %vm4091_vm6, %v3872_v8, %v4103_v57  ;;  %vm4094_vm7 = vcmp.ge.f32.partialorder %v3874_v51, 0.0  ;;  %v4106_v35 = vmul.f32 0.01, %v3874_v51  ;;  %v3876_v47 = vadd.f32 %v3875_v21, %v3825_v18  ;;  %4766 = vmatpush2.bf16.msra.mxu1 %v7175_v6 }
 0x27c   : > { %4148 = vst [vmem:[#allocation3 + $0x1] ss:$2 sm:$0xf] %v4115_v22  ;;  %v3879_v27 = vpop.f32.mrf.mxu1  ;;  %v4151_v52 = vrot.slane %v4115_v22, 5  ;;  %vm420_vm5 = vcmask 523264  }
 0x27d   : > { %v4118_v36 = vsel %vm4094_vm7, %v3874_v51, %v4106_v35  ;;  %vm4095_vm8 = vcmp.ge.f32.partialorder %v3876_v47, 0.0  ;;  %v4107_v37 = vmul.f32 0.01, %v3876_v47  ;;  %v3880_v10 = vadd.f32 %v3879_v27, %v3829_v30 }
 0x27e   : > { %v4130_v41 = vrot.slane %v4118_v36, 5  ;;  %v4135_v42 = vrot.slane %v4118_v36, 2  ;;  %v3881_v24 = vpop.f32.mrf.mxu1  ;;  %v4141_v33 = vrot.slane %v4118_v36, 7  ;;  %v2397_v27 = vrot.slane %v7816_v32, %v7569_v15 }
 0x27f   : > { %v4119_v48 = vsel %vm4095_vm8, %v3876_v47, %v4107_v37  ;;  %vm4098_vm9 = vcmp.ge.f32.partialorder %v3880_v10, 0.0  ;;  %v4110_v9 = vmul.f32 0.01, %v3880_v10  ;;  %v3882_v17 = vadd.f32 %v3881_v24, %v3831_v3 }
 0x280   : > { %v4131_v62 = vsel %vm2062_vm3, %v4129_v38, %v4130_v41  ;;  %4138 = vst [vmem:[#allocation3 + $0x24] ss:$2 sm:$0xf] %v4135_v42  ;;  %v4152_v53 = vrot.slane %v4119_v48, 5  ;;  %v4157_v20 = vrot.slane %v4119_v48, 2  ;;  %v3883_v54 = vpop.f32.mrf.mxu1  ;;  %v4162_v2 = vrot.slane %v4119_v48, 7 }
 0x281   : > { %4134 = vst [vmem:[#allocation3 + $0x12] ss:$2 sm:$0xf] %v4131_v62  ;;  %v4122_v58 = vsel %vm4098_vm9, %v3880_v10, %v4110_v9  ;;  %vm4099_vm11 = vcmp.ge.f32.partialorder %v3882_v17, 0.0  ;;  %v4111_v26 = vmul.f32 0.01, %v3882_v17 }
 0x282   : > { %v4153_v43 = vsel %vm2062_vm3, %v4151_v52, %v4152_v53  ;;  %4160 = vst [vmem:[#allocation3 + $0x25] ss:$2 sm:$0xf] %v4157_v20  ;;  %v4142_v60 = vrot.slane %v4122_v58, 7  ;;  %v3884_v61 = vpop.f32.mrf.mxu1 }
 0x283   : > { %4156 = vst [vmem:[#allocation3 + $0x13] ss:$2 sm:$0xf] %v4153_v43  ;;  %v4123_v56 = vsel %vm4099_vm11, %v3882_v17, %v4111_v26 }
 0x284   : > { %v4143_v4 = vsel %vm4140_vm10, %v4141_v33, %v4142_v60  ;;  %v4163_v5 = vrot.slane %v4123_v56, 7 }
 0x285   : > { %4146 = vst [vmem:[#allocation3 + $0x36] ss:$2 sm:$0xf] %v4143_v4 }
 0x286   : > { %v4164_v45 = vsel %vm4140_vm10, %v4162_v2, %v4163_v5 }
 0x287   : > { %4167 = vst [vmem:[#allocation3 + $0x37] ss:$2 sm:$0xf] %v4164_v45 }
 0x2a9   : > { %v3920_v8 = vpop.f32.mrf.mxu0 }
 0x2aa   : > { %v3921_v36 = vadd.f32 %v3920_v8, %v2393_v25 }
 0x2ab   : > { %v3922_v39 = vpop.f32.mrf.mxu0 }
 0x2ac   : > { %v3923_v10 = vadd.f32 %v3922_v39, %v2397_v27 }
 0x2ad   : > { %v3924_v13 = vpop.f32.mrf.mxu0 }
 0x2ae   : > { %v3925_v42 = vadd.f32 %v3924_v13, %v2393_v25 }
 0x2af   : > { %v3926_v44 = vpop.f32.mrf.mxu0 }
 0x2b0   : > { %v3927_v9 = vadd.f32 %v3926_v44, %v2397_v27 }
 0x2b1   : > { %v3930_v18 = vpop.f32.mrf.mxu0 }
 0x2b2   : > { %v3931_v53 = vadd.f32 %v3930_v18, %v2393_v25  ;;  %v4219_v25 = vld [vmem:[#allocation3 + $0x1] sm:$0xff] }
 0x2b3   : > { %v3932_v29 = vpop.f32.mrf.mxu0 }
 0x2b4   : > { %v3971_v59 = vpop.f32.mrf.mxu1  ;;  %v3933_v26 = vadd.f32 %v3932_v29, %v2397_v27 }
 0x2b5   : > { %v3934_v57 = vpop.f32.mrf.mxu0  ;;  %v3972_v38 = vadd.f32 %v3971_v59, %v3921_v36 }
 0x2b6   : > { %v3973_v51 = vpop.f32.mrf.mxu1 }
 0x2b7   : > { %v3935_v19 = vpop.f32.mrf.mxu0  ;;  %v3974_v24 = vadd.f32 %v3973_v51, %v3923_v10 }
 0x2b8   : > { %v3975_v30 = vpop.f32.mrf.mxu1 }
 0x2b9   : > { %v3976_v16 = vadd.f32 %v3975_v30, %v3925_v42 }
 0x2ba   : > { %v3977_v21 = vpop.f32.mrf.mxu1 }
 0x2bb   : > { %v3978_v20 = vadd.f32 %v3977_v21, %v3927_v9 }
 0x2bc   : > { %v3981_v40 = vpop.f32.mrf.mxu1 }
 0x2bd   : > { %v3982_v23 = vadd.f32 %v3981_v40, %v3931_v53 }
 0x2be   : > { %v3983_v34 = vpop.f32.mrf.mxu1 }
 0x2bf   : > { %v3984_v0 = vadd.f32 %v3983_v34, %v3933_v26 }
 0x2c0   : > { %v3985_v22 = vpop.f32.mrf.mxu1 }
 0x2c2   : > { %v3986_v35 = vpop.f32.mrf.mxu1 }
 0x2e9   : > { %v4022_v47 = vpop.f32.mrf.mxu0 }
 0x2ea   : > { %v4023_v46 = vadd.f32 %v4022_v47, %v3972_v38 }
 0x2eb   : > { %v4024_v3 = vpop.f32.mrf.mxu0 }
 0x2ec   : > { %v4025_v52 = vadd.f32 %v4024_v3, %v3974_v24  ;;  %v4221_v3 = vld [vmem:[#allocation3 + $0x11] sm:$0xff] }
 0x2ed   : > { %v4026_v31 = vpop.f32.mrf.mxu0 }
 0x2ee   : > { %v4027_v15 = vadd.f32 %v4026_v31, %v3976_v16 }
 0x2ef   : > { %v4028_v37 = vpop.f32.mrf.mxu0 }
 0x2f0   : > { %v4029_v33 = vadd.f32 %v4028_v37, %v3978_v20 }
 0x2f1   : > { %v4032_v41 = vpop.f32.mrf.mxu0 }
 0x2f2   : > { %v4033_v56 = vadd.f32 %v4032_v41, %v3982_v23 }
 0x2f3   : > { %v4034_v48 = vpop.f32.mrf.mxu0 }
 0x2f4   : > { %v4073_v17 = vpop.f32.mrf.mxu1  ;;  %v4035_v1 = vadd.f32 %v4034_v48, %v3984_v0  ;;  %v4210_v48 = vld [vmem:[#allocation3] sm:$0xff] }
 0x2f5   : > { %v4074_v62 = vadd.f32 %v4073_v17, %v4023_v46  ;;  %v4036_v14 = vpop.f32.mrf.mxu0  ;;  %v4230_v46 = vld [vmem:[#allocation3 + $0x12] sm:$0xff] }
 0x2f6   : > { %v4075_v54 = vpop.f32.mrf.mxu1 }
 0x2f7   : > { %vm4092_vm12 = vcmp.ge.f32.partialorder %v4074_v62, 0.0  ;;  %v4104_v32 = vmul.f32 0.01, %v4074_v62  ;;  %v4076_v55 = vadd.f32 %v4075_v54, %v4025_v52  ;;  %v4037_v58 = vpop.f32.mrf.mxu0 }
 0x2f8   : > { %v4077_v43 = vpop.f32.mrf.mxu1 }
 0x2f9   : > { %v4116_v60 = vsel %vm4092_vm12, %v4074_v62, %v4104_v32  ;;  %vm4093_vm13 = vcmp.ge.f32.partialorder %v4076_v55, 0.0  ;;  %v4105_v61 = vmul.f32 0.01, %v4076_v55  ;;  %v4078_v63 = vadd.f32 %v4077_v43, %v4027_v15 }
 0x2fa   : > { %4169 = vst [vmem:[#allocation3 + $0x9] ss:$2 sm:$0xf] %v4116_v60  ;;  %v4079_v50 = vpop.f32.mrf.mxu1  ;;  %v4172_v6 = vrot.slane %v4116_v60, 5 }
 0x2fb   : > { %v4117_v2 = vsel %vm4093_vm13, %v4076_v55, %v4105_v61  ;;  %vm4096_vm14 = vcmp.ge.f32.partialorder %v4078_v63, 0.0  ;;  %v4108_v4 = vmul.f32 0.01, %v4078_v63  ;;  %v4080_v5 = vadd.f32 %v4079_v50, %v4029_v33 }
 0x2fc   : > { %4190 = vst [vmem:[#allocation3 + $0xa] ss:$2 sm:$0xf] %v4117_v2  ;;  %v4083_v45 = vpop.f32.mrf.mxu1  ;;  %v4193_v59 = vrot.slane %v4117_v2, 5 }
 0x2fd   : > { %v4120_v49 = vsel %vm4096_vm14, %v4078_v63, %v4108_v4  ;;  %vm4097_vm15 = vcmp.ge.f32.partialorder %v4080_v5, 0.0  ;;  %v4109_v28 = vmul.f32 0.01, %v4080_v5  ;;  %v4084_v7 = vadd.f32 %v4083_v45, %v4033_v56 }
 0x2fe   : > { %v4173_v8 = vrot.slane %v4120_v49, 5  ;;  %v4178_v39 = vrot.slane %v4120_v49, 2  ;;  %v4085_v13 = vpop.f32.mrf.mxu1  ;;  %v4183_v34 = vrot.slane %v4120_v49, 7 }
 0x2ff   : > { %v4121_v44 = vsel %vm4097_vm15, %v4080_v5, %v4109_v28  ;;  %vm4100_vm0 = vcmp.ge.f32.partialorder %v4084_v7, 0.0  ;;  %v4112_v18 = vmul.f32 0.01, %v4084_v7  ;;  %v4086_v29 = vadd.f32 %v4085_v13, %v4035_v1  ;;  %v4237_v28 = vld [vmem:[#allocation3 + $0x4a] sm:$0xff] }
 0x300   : > { %v4174_v57 = vsel %vm2062_vm3, %v4172_v6, %v4173_v8  ;;  %4181 = vst [vmem:[#allocation3 + $0x2d] ss:$2 sm:$0xf] %v4178_v39  ;;  %v4194_v51 = vrot.slane %v4121_v44, 5  ;;  %v4199_v19 = vrot.slane %v4121_v44, 2  ;;  %v4087_v30 = vpop.f32.mrf.mxu1  ;;  %v4204_v27 = vrot.slane %v4121_v44, 7 }
 0x301   : > { %4177 = vst [vmem:[#allocation3 + $0x1b] ss:$2 sm:$0xf] %v4174_v57  ;;  %v4124_v21 = vsel %vm4100_vm0, %v4084_v7, %v4112_v18  ;;  %vm4101_vm1 = vcmp.ge.f32.partialorder %v4086_v29, 0.0  ;;  %v4113_v40 = vmul.f32 0.01, %v4086_v29  ;;  %v4257_v39 = vpack.c.bf16 %v4237_v28, %v4237_v28 }
 0x302   : > { %v4195_v22 = vsel %vm2062_vm3, %v4193_v59, %v4194_v51  ;;  %4202 = vst [vmem:[#allocation3 + $0x2e] ss:$2 sm:$0xf] %v4199_v19  ;;  %v4184_v35 = vrot.slane %v4124_v21, 7  ;;  %v4088_v47 = vpop.f32.mrf.mxu1  ;;  %v4228_v18 = vld [vmem:[#allocation3 + $0x49] sm:$0xff]  ;;  %vm4881_vm15 = vcmask 1045504  }
 0x303   : > { %4198 = vst [vmem:[#allocation3 + $0x1c] ss:$2 sm:$0xf] %v4195_v22  ;;  %v4125_v31 = vsel %vm4101_vm1, %v4086_v29, %v4113_v40  ;;  %v4220_v36 = vld [vmem:[#allocation3 + $0x9] sm:$0xff]  ;;  %v4256_v59 = vpack.c.bf16 %v4228_v18, %v4228_v18  ;;  %v4322_v19 = vld [vmem:[%s8557_s6] sm:$0x3] }
 0x304   : > { %v4229_v37 = vld [vmem:[#allocation3 + $0xa] sm:$0xff]  ;;  %v4185_v38 = vsel %vm4140_vm10, %v4183_v34, %v4184_v35  ;;  %v4205_v41 = vrot.slane %v4125_v31, 7  ;;  %v4239_v42 = vpack.c.bf16 %v4220_v36, %v4219_v25  ;;  %v4240_v24 = vpack.c.bf16 %v4221_v3, %v4220_v36 }
 0x305   : > { %v4211_v10 = vld [vmem:[#allocation3 + $0x8] sm:$0xff]  ;;  %4188 = vst [vmem:[#allocation3 + $0x3f] ss:$2 sm:$0xf] %v4185_v38  ;;  %v4241_v9 = vpack.c.bf16 %v4230_v46, %v4229_v37  ;;  %v4212_v55 = vld [vmem:[#allocation3 + $0x10] sm:$0xff]  ;;  %v7888_v30 = vrot.slane %v4322_v19, %v7563_v11  ;;  %v7891_v21 = vrot.slane %v4322_v19, %v7565_v12  ;;  %vm4889_vm1 = vcmask 1044480  }
 0x306   : > { %v4238_v17 = vpack.c.bf16 %v4211_v10, %v4210_v48  ;;  %v4206_v16 = vsel %vm4140_vm10, %v4204_v27, %v4205_v41  ;;  %4686 = vmatprep.mubr.bf16.mxu0 %v4239_v42  ;;  %v7178_v51 = vld [vmem:[#allocation3 + $0x48] sm:$0xff] }
 0x307   : > { %4209 = vst [vmem:[#allocation3 + $0x40] ss:$2 sm:$0xf] %v4206_v16  ;;  %4767 = vmatprep.mubr.bf16.mxu1 %v4241_v9  ;;  %423 = vst.msk [vmem:[#allocation4 + $0x10] sm:$0xff] %vm420_vm5, %v7178_v51 }
 0x308   : > { %4687 = vmatmul.mubr.bf16.vlgmr.msra.gmra.mxu0 %v4238_v17  ;;  %4768 = vmatmul.mubr.bf16.vlgmr.msra.gmra.mxu1 %v4240_v24  ;;  %424 = vst.msk [vmem:[#allocation4 + $0x18] sm:$0xff] %vm420_vm5, %v7178_v51  ;;  %425 = vst.msk [vmem:[#allocation4 + $0x20] sm:$0xff] %vm420_vm5, %v7178_v51 }
 0x309   : > { %v4224_v32 = vld [vmem:[#allocation3 + $0x29] sm:$0xff]  ;;  %v4234_v26 = vld [vmem:[#allocation3 + $0x32] sm:$0xff]  ;;  %421 = vst.msk [vmem:[#allocation4] sm:$0xff] %vm420_vm5, %v7178_v51  ;;  %422 = vst.msk [vmem:[#allocation4 + $0x8] sm:$0xff] %vm420_vm5, %v7178_v51 }
 0x30a   : > { %v4222_v52 = vld [vmem:[#allocation3 + $0x19] sm:$0xff]  ;;  %v4232_v14 = vld [vmem:[#allocation3 + $0x22] sm:$0xff]  ;;  %v4233_v58 = vld [vmem:[#allocation3 + $0x2a] sm:$0xff]  ;;  %426 = vst.msk [vmem:[#allocation4 + $0x28] sm:$0xff] %vm420_vm5, %v7178_v51 }
 0x30b   : > { %v4231_v62 = vld [vmem:[#allocation3 + $0x1a] sm:$0xff]  ;;  %v4243_v53 = vpack.c.bf16 %v4222_v52, %v4221_v3  ;;  %v4249_v60 = vpack.c.bf16 %v4234_v26, %v4233_v58  ;;  %v4215_v63 = vld [vmem:[#allocation3 + $0x28] sm:$0xff]  ;;  %v4225_v0 = vld [vmem:[#allocation3 + $0x31] sm:$0xff]  ;;  %427 = vst.msk [vmem:[#allocation4 + $0x30] sm:$0xff] %vm420_vm5, %v7178_v51 }
 0x30c   : > { %v4245_v20 = vpack.c.bf16 %v4232_v14, %v4231_v62  ;;  %v4213_v54 = vld [vmem:[#allocation3 + $0x18] sm:$0xff]  ;;  %v4223_v15 = vld [vmem:[#allocation3 + $0x21] sm:$0xff]  ;;  %v4248_v5 = vpack.c.bf16 %v4225_v0, %v4224_v32  ;;  %v4216_v6 = vld [vmem:[#allocation3 + $0x30] sm:$0xff]  ;;  %428 = vst.msk [vmem:[#allocation4 + $0x38] sm:$0xff] %vm420_vm5, %v7178_v51 }
 0x30d   : > { %4696 = vmatprep.mubr.bf16.mxu0 %v4243_v53  ;;  %v4242_v23 = vpack.c.bf16 %v4213_v54, %v4212_v55  ;;  %v4244_v33 = vpack.c.bf16 %v4223_v15, %v4222_v52  ;;  %v4247_v43 = vpack.c.bf16 %v4224_v32, %v4223_v15  ;;  %v4214_v61 = vld [vmem:[#allocation3 + $0x20] sm:$0xff]  ;;  %v4217_v49 = vld [vmem:[#allocation3 + $0x38] sm:$0xff]  ;;  %429 = vst.msk [vmem:[#allocation4 + $0x40] sm:$0xff] %vm420_vm5, %v7178_v51  ;;  %430 = vst.msk [vmem:[#allocation4 + $0x48] sm:$0xff] %vm420_vm5, %v7178_v51 }
 0x30e   : > { %4777 = vmatprep.mubr.bf16.mxu1 %v4245_v20  ;;  %v4226_v56 = vld [vmem:[#allocation3 + $0x39] sm:$0xff]  ;;  %v4236_v2 = vld [vmem:[#allocation3 + $0x42] sm:$0xff]  ;;  %v4246_v4 = vpack.c.bf16 %v4215_v63, %v4214_v61  ;;  %v4250_v8 = vpack.c.bf16 %v4217_v49, %v4216_v6  ;;  %431 = vst.msk [vmem:[#allocation4 + $0x50] sm:$0xff] %vm420_vm5, %v7178_v51  ;;  %432 = vst.msk [vmem:[#allocation4 + $0x58] sm:$0xff] %vm420_vm5, %v7178_v51 }
 0x30f   : > { %v4235_v50 = vld [vmem:[#allocation3 + $0x3a] sm:$0xff]  ;;  %v4251_v1 = vpack.c.bf16 %v4226_v56, %v4225_v0  ;;  %433 = vst.msk [vmem:[#allocation4 + $0x60] sm:$0xff] %vm420_vm5, %v7178_v51  ;;  %434 = vst.msk [vmem:[#allocation4 + $0x68] sm:$0xff] %vm420_vm5, %v7178_v51 }
 0x310   : > { %4697 = vmatmul.mubr.bf16.gmra.mxu0 %v4242_v23  ;;  %4778 = vmatmul.mubr.bf16.gmra.mxu1 %v4244_v33  ;;  %v4253_v45 = vpack.c.bf16 %v4236_v2, %v4235_v50  ;;  %v4227_v7 = vld [vmem:[#allocation3 + $0x41] sm:$0xff]  ;;  %435 = vst.msk [vmem:[#allocation4 + $0x70] sm:$0xff] %vm420_vm5, %v7178_v51  ;;  %436 = vst.msk [vmem:[#allocation4 + $0x78] sm:$0xff] %vm420_vm5, %v7178_v51 }
 0x311   : > { %4706 = vmatprep.mubr.bf16.mxu0 %v4247_v43  ;;  %4787 = vmatprep.mubr.bf16.mxu1 %v4249_v60  ;;  %v4252_v13 = vpack.c.bf16 %v4227_v7, %v4226_v56  ;;  %v4255_v44 = vpack.c.bf16 %v4227_v7, %v4227_v7  ;;  %v4218_v29 = vld [vmem:[#allocation3 + $0x40] sm:$0xff]  ;;  %437 = vst.msk [vmem:[#allocation4 + $0x80] sm:$0xff] %vm420_vm5, %v7178_v51  ;;  %438 = vst.msk [vmem:[#allocation4 + $0x88] sm:$0xff] %vm420_vm5, %v7178_v51 }
 0x312   : > { %v4254_v57 = vpack.c.bf16 %v4218_v29, %v4218_v29  ;;  %439 = vst.msk [vmem:[#allocation4 + $0x90] sm:$0xff] %vm420_vm5, %v7178_v51  ;;  %440 = vst.msk [vmem:[#allocation4 + $0x98] sm:$0xff] %vm420_vm5, %v7178_v51 }
 0x313   : > { %441 = vst.msk [vmem:[#allocation4 + $0xa0] sm:$0xff] %vm420_vm5, %v7178_v51  ;;  %442 = vst.msk [vmem:[#allocation4 + $0xa8] sm:$0xff] %vm420_vm5, %v7178_v51 }
 0x314   : > { %443 = vst.msk [vmem:[#allocation4 + $0xb0] sm:$0xff] %vm420_vm5, %v7178_v51  ;;  %444 = vst.msk [vmem:[#allocation4 + $0xb8] sm:$0xff] %vm420_vm5, %v7178_v51 }
 0x315   : > { %445 = vst.msk [vmem:[#allocation4 + $0xc0] sm:$0xff] %vm420_vm5, %v7178_v51  ;;  %446 = vst.msk [vmem:[#allocation4 + $0xc8] sm:$0xff] %vm420_vm5, %v7178_v51 }
 0x316   : > { %447 = vst.msk [vmem:[#allocation4 + $0xd0] sm:$0xff] %vm420_vm5, %v7178_v51  ;;  %448 = vst.msk [vmem:[#allocation4 + $0xd8] sm:$0xff] %vm420_vm5, %v7178_v51 }
 0x317   : > { %449 = vst.msk [vmem:[#allocation4 + $0xe0] sm:$0xff] %vm420_vm5, %v7178_v51  ;;  %450 = vst.msk [vmem:[#allocation4 + $0xe8] sm:$0xff] %vm420_vm5, %v7178_v51 }
 0x318   : > { %4707 = vmatmul.mubr.bf16.gmra.mxu0 %v4246_v4  ;;  %4788 = vmatmul.mubr.bf16.gmra.mxu1 %v4248_v5  ;;  %451 = vst.msk [vmem:[#allocation4 + $0xf0] sm:$0xff] %vm420_vm5, %v7178_v51  ;;  %452 = vst.msk [vmem:[#allocation4 + $0xf8] sm:$0xff] %vm420_vm5, %v7178_v51 }
 0x319   : > { %4716 = vmatprep.mubr.bf16.mxu0 %v4251_v1  ;;  %4797 = vmatprep.mubr.bf16.mxu1 %v4253_v45  ;;  %453 = vst.msk [vmem:[#allocation4 + $0x100] sm:$0xff] %vm420_vm5, %v7178_v51  ;;  %454 = vst.msk [vmem:[#allocation4 + $0x108] sm:$0xff] %vm420_vm5, %v7178_v51 }
 0x31a   : > { %455 = vst.msk [vmem:[#allocation4 + $0x110] sm:$0xff] %vm420_vm5, %v7178_v51  ;;  %456 = vst.msk [vmem:[#allocation4 + $0x118] sm:$0xff] %vm420_vm5, %v7178_v51 }
 0x31b   : > { %457 = vst.msk [vmem:[#allocation4 + $0x120] sm:$0xff] %vm420_vm5, %v7178_v51  ;;  %458 = vst.msk [vmem:[#allocation4 + $0x128] sm:$0xff] %vm420_vm5, %v7178_v51 }
 0x320   : > { %4717 = vmatmul.mubr.bf16.gmra.mxu0 %v4250_v8  ;;  %4798 = vmatmul.mubr.bf16.gmra.mxu1 %v4252_v13 }
 0x321   : > { %4726 = vmatprep.mubr.bf16.mxu0 %v4255_v44  ;;  %4807 = vmatprep.mubr.bf16.mxu1 %v4257_v39 }
 0x328   : > { %4727 = vmatmul.mubr.bf16.gmra.mxu0 %v4254_v57  ;;  %4808 = vmatmul.mubr.bf16.gmra.mxu1 %v4256_v59 }
 0x3c8   : > { %v4688_v40 = vpop.f32.mrf.mxu0  ;;  %v4769_v22 = vpop.f32.mrf.mxu1 }
 0x3c9   : > { %v4689_v34 = vadd.f32 %v4688_v40, %v7888_v30 }
 0x3ca   : > { %v4690_v35 = vpop.f32.mrf.mxu0  ;;  %v4771_v3 = vpop.f32.mrf.mxu1 }
 0x3cb   : > { %v4770_v47 = vadd.f32 %v4769_v22, %v4689_v34  ;;  %v4691_v25 = vadd.f32 %v4690_v35, %v7891_v21 }
 0x3cc   : > { %v4692_v27 = vpop.f32.mrf.mxu0  ;;  %v4773_v37 = vpop.f32.mrf.mxu1 }
 0x3cd   : > { %v4772_v31 = vadd.f32 %v4771_v3, %v4691_v25  ;;  %v4693_v36 = vadd.f32 %v4692_v27, %v7888_v30  ;;  %vm4816_vm6 = vcmp.ge.f32.partialorder %v4770_v47, 0.0  ;;  %v4834_v11 = vmul.f32 0.01, %v4770_v47 }
 0x3ce   : > { %v4694_v10 = vpop.f32.mrf.mxu0  ;;  %v4775_v42 = vpop.f32.mrf.mxu1 }
 0x3cf   : > { %v4835_v38 = vmul.f32 0.01, %v4772_v31  ;;  %v4774_v12 = vadd.f32 %v4773_v37, %v4693_v36  ;;  %v4695_v41 = vadd.f32 %v4694_v10, %v7891_v21  ;;  %v4852_v24 = vsel %vm4816_vm6, %v4770_v47, %v4834_v11 }
 0x3d0   : > { %v4698_v46 = vpop.f32.mrf.mxu0  ;;  %4926 = vrot.lane.b32.xlu0 %v4852_v24, %s7352_s12  ;;  %4871 = vst [vmem:[#allocation4 + $0x12] ss:$2 sm:$0xff] %v4852_v24  ;;  %vm4817_vm7 = vcmp.ge.f32.partialorder %v4772_v31, 0.0  ;;  %v4779_v16 = vpop.f32.mrf.mxu1 }
 0x3d1   : > { %vm4818_vm8 = vcmp.ge.f32.partialorder %v4774_v12, 0.0  ;;  %v4836_v48 = vmul.f32 0.01, %v4774_v12  ;;  %v4776_v9 = vadd.f32 %v4775_v42, %v4695_v41  ;;  %v4699_v17 = vadd.f32 %v4698_v46, %v7888_v30 }
 0x3d2   : > { %v4700_v52 = vpop.f32.mrf.mxu0  ;;  %v4853_v62 = vsel %vm4817_vm7, %v4772_v31, %v4835_v38  ;;  %v4781_v53 = vpop.f32.mrf.mxu1 }
 0x3d3   : > { %v4780_v14 = vadd.f32 %v4779_v16, %v4699_v17  ;;  %4967 = vst [vmem:[#allocation4 + $0x23] ss:$2 sm:$0xff] %v4853_v62  ;;  %v4854_v20 = vsel %vm4818_vm8, %v4774_v12, %v4836_v48  ;;  %v4837_v54 = vmul.f32 0.01, %v4776_v9  ;;  %v4701_v15 = vadd.f32 %v4700_v52, %v7891_v21 }
 0x3d4   : > { %v4702_v32 = vpop.f32.mrf.mxu0  ;;  %5019 = vrot.lane.b32.xlu0 %v4853_v62, %s7352_s12  ;;  %vm4819_vm9 = vcmp.ge.f32.partialorder %v4776_v9, 0.0  ;;  %v4783_v26 = vpop.f32.mrf.mxu1  ;;  %v4874_v43 = vrot.slane %v4854_v20, 1  ;;  %vm4897_vm8 = vcmask 1043456  }
 0x3d5   : > { %vm4820_vm11 = vcmp.ge.f32.partialorder %v4780_v14, 0.0  ;;  %v4838_v55 = vmul.f32 0.01, %v4780_v14  ;;  %v4703_v58 = vadd.f32 %v4702_v32, %v7888_v30  ;;  %v4782_v23 = vadd.f32 %v4781_v53, %v4701_v15 }
 0x3d6   : > { %v4704_v33 = vpop.f32.mrf.mxu0  ;;  %v4785_v0 = vpop.f32.mrf.mxu1  ;;  %v4855_v56 = vsel %vm4819_vm9, %v4776_v9, %v4837_v54 }
 0x3d7   : > { %v4856_v60 = vsel %vm4820_vm11, %v4780_v14, %v4838_v55  ;;  %v4784_v61 = vadd.f32 %v4783_v26, %v4703_v58  ;;  %v4705_v63 = vadd.f32 %v4704_v33, %v7891_v21  ;;  %vm4821_vm12 = vcmp.ge.f32.partialorder %v4782_v23, 0.0 }
 0x3d8   : > { %v4875_v50 = vrot.slane %v4856_v60, 1  ;;  %v4839_v2 = vmul.f32 0.01, %v4782_v23  ;;  %v4708_v4 = vpop.f32.mrf.mxu0  ;;  %v4789_v49 = vpop.f32.mrf.mxu1  ;;  %v4970_v57 = vrot.slane %v4855_v56, 1  ;;  %v4882_v51 = vrot.slane %v4856_v60, 2 }
 0x3d9   : > { %vm4822_vm13 = vcmp.ge.f32.partialorder %v4784_v61, 0.0  ;;  %v4840_v5 = vmul.f32 0.01, %v4784_v61  ;;  %v4786_v1 = vadd.f32 %v4785_v0, %v4705_v63  ;;  %v4709_v45 = vadd.f32 %v4708_v4, %v7888_v30 }
 0x3da   : > { %v4857_v28 = vsel %vm4821_vm12, %v4782_v23, %v4839_v2  ;;  %v4710_v7 = vpop.f32.mrf.mxu0  ;;  %v4876_v6 = vsel %vm2039_vm2, %v4874_v43, %v4875_v50  ;;  %v4791_v13 = vpop.f32.mrf.mxu1 }
 0x3db   : > { %v4858_v8 = vsel %vm4822_vm13, %v4784_v61, %v4840_v5  ;;  %vm4823_vm14 = vcmp.ge.f32.partialorder %v4786_v1, 0.0  ;;  %v4841_v39 = vmul.f32 0.01, %v4786_v1  ;;  %4879 = vst [vmem:[#allocation4 + $0x34] ss:$2 sm:$0xff] %v4876_v6  ;;  %4931 = vrot.lane.b32.xlu0 %v4876_v6, %s7352_s12  ;;  %v4790_v18 = vadd.f32 %v4789_v49, %v4709_v45 }
 0x3dc   : > { %v4883_v44 = vrot.slane %v4858_v8, 2  ;;  %v4711_v29 = vadd.f32 %v4710_v7, %v7891_v21  ;;  %v4712_v59 = vpop.f32.mrf.mxu0  ;;  %v4793_v34 = vpop.f32.mrf.mxu1  ;;  %v4971_v22 = vrot.slane %v4857_v28, 1  ;;  %v4977_v35 = vrot.slane %v4857_v28, 2 }
 0x3dd   : > { %v4859_v19 = vsel %vm4823_vm14, %v4786_v1, %v4841_v39  ;;  %v4713_v40 = vadd.f32 %v4712_v59, %v7888_v30  ;;  %vm4824_vm0 = vcmp.ge.f32.partialorder %v4790_v18, 0.0  ;;  %v4842_v25 = vmul.f32 0.01, %v4790_v18 }
 0x3de   : > { %v4978_v47 = vrot.slane %v4859_v19, 2  ;;  %v4714_v3 = vpop.f32.mrf.mxu0  ;;  %v4792_v27 = vadd.f32 %v4791_v13, %v4711_v29  ;;  %v4972_v36 = vsel %vm2039_vm2, %v4970_v57, %v4971_v22  ;;  %v4795_v11 = vpop.f32.mrf.mxu1  ;;  %v4884_v12 = vsel %vm4881_vm15, %v4882_v51, %v4883_v44 }
 0x3df   : > { %v4794_v31 = vadd.f32 %v4793_v34, %v4713_v40  ;;  %v4715_v37 = vadd.f32 %v4714_v3, %v7891_v21  ;;  %v4860_v10 = vsel %vm4824_vm0, %v4790_v18, %v4842_v25  ;;  %5024 = vrot.lane.b32.xlu1 %v4972_v36, %s7352_s12  ;;  %4975 = vst [vmem:[#allocation4 + $0x45] ss:$2 sm:$0xff] %v4972_v36  ;;  %v4890_v42 = vrot.slane %v4858_v8, 3 }
 0x3e0   : > { %v4718_v38 = vpop.f32.mrf.mxu0  ;;  %v4979_v41 = vsel %vm4881_vm15, %v4977_v35, %v4978_v47  ;;  %v4891_v24 = vrot.slane %v4860_v10, 3  ;;  %vm4825_vm6 = vcmp.ge.f32.partialorder %v4792_v27, 0.0  ;;  %v4843_v46 = vmul.f32 0.01, %v4792_v27  ;;  %v4799_v48 = vpop.f32.mrf.mxu1  ;;  %4887 = vst [vmem:[#allocation4 + $0x56] ss:$2 sm:$0xff] %v4884_v12 }
 0x3e1   : > { %5029 = vrot.lane.b32.xlu0 %v4979_v41, %s7352_s12  ;;  %4982 = vst [vmem:[#allocation4 + $0x67] ss:$2 sm:$0xff] %v4979_v41  ;;  %vm4826_vm2 = vcmp.ge.f32.partialorder %v4794_v31, 0.0  ;;  %v4844_v9 = vmul.f32 0.01, %v4794_v31  ;;  %v4796_v17 = vadd.f32 %v4795_v11, %v4715_v37  ;;  %v4719_v16 = vadd.f32 %v4718_v38, %v7888_v30 }
 0x3e2   : > { %v4720_v52 = vpop.f32.mrf.mxu0  ;;  %v4861_v62 = vsel %vm4825_vm6, %v4792_v27, %v4843_v46  ;;  %v4801_v53 = vpop.f32.mrf.mxu1  ;;  %v4892_v20 = vsel %vm4889_vm1, %v4890_v42, %v4891_v24  ;;  %v4984_v54 = vrot.slane %v4859_v19, 3  ;;  %v4898_v43 = vrot.slane %v4860_v10, 4 }
 0x3e3   : > { %v4721_v14 = vadd.f32 %v4720_v52, %v7891_v21  ;;  %v4985_v15 = vrot.slane %v4861_v62, 3  ;;  %v4862_v32 = vsel %vm4826_vm2, %v4794_v31, %v4844_v9  ;;  %vm4827_vm7 = vcmp.ge.f32.partialorder %v4796_v17, 0.0  ;;  %4936 = vrot.lane.b32.xlu1 %v4884_v12, %s7352_s12  ;;  %4895 = vst [vmem:[#allocation4 + $0x78] ss:$2 sm:$0xff] %v4892_v20 }
 0x3e4   : > { %v4722_v55 = vpop.f32.mrf.mxu0  ;;  %v4899_v58 = vrot.slane %v4862_v32, 4  ;;  %v4845_v26 = vmul.f32 0.01, %v4796_v17  ;;  %v4800_v23 = vadd.f32 %v4799_v48, %v4719_v16  ;;  %v4803_v33 = vpop.f32.mrf.mxu1  ;;  %v4991_v5 = vrot.slane %v4861_v62, 4 }
 0x3e5   : > { %v4802_v60 = vadd.f32 %v4801_v53, %v4721_v14  ;;  %v4723_v61 = vadd.f32 %v4722_v55, %v7888_v30  ;;  %v4986_v0 = vsel %vm4889_vm1, %v4984_v54, %v4985_v15  ;;  %v4905_v13 = vrot.slane %v4862_v32, 5  ;;  %v5060_v54 = vld [vmem:[#allocation4 + $0x8] sm:$0xff]  ;;  %v7941_v15 = vld [vmem:[#allocation13] ss:$0 sm:$0xff]  ;;  %v7943_v55 = vld [vmem:[#allocation13 + $0x1] ss:$0 sm:$0xff] }
 0x3e6   : > { %v4724_v63 = vpop.f32.mrf.mxu0  ;;  %v4863_v56 = vsel %vm4827_vm7, %v4796_v17, %v4845_v26  ;;  %vm4828_vm9 = vcmp.ge.f32.partialorder %v4800_v23, 0.0  ;;  %v4846_v50 = vmul.f32 0.01, %v4800_v23  ;;  %v4805_v4 = vpop.f32.mrf.mxu1  ;;  %4989 = vst [vmem:[#allocation4 + $0x89] ss:$2 sm:$0xff] %v4986_v0  ;;  %v4900_v8 = vsel %vm4897_vm8, %v4898_v43, %v4899_v58  ;;  %v5167_v32 = vld [vmem:[#allocation4 + $0x9] sm:$0xff] }
 0x3e7   : > { %v4725_v2 = vadd.f32 %v4724_v63, %v7891_v21  ;;  %v4992_v1 = vrot.slane %v4863_v56, 4  ;;  %vm4829_vm11 = vcmp.ge.f32.partialorder %v4802_v60, 0.0  ;;  %v4847_v45 = vmul.f32 0.01, %v4802_v60  ;;  %4941 = vrot.lane.b32.xlu1 %v4892_v20, %s7352_s12  ;;  %4903 = vst [vmem:[#allocation4 + $0x9a] ss:$2 sm:$0xff] %v4900_v8  ;;  %4946 = vrot.lane.b32.xlu0 %v4900_v8, %s7352_s12 }
 0x3e8   : > { %v4728_v49 = vpop.f32.mrf.mxu0  ;;  %v4864_v28 = vsel %vm4828_vm9, %v4800_v23, %v4846_v50  ;;  %v4804_v7 = vadd.f32 %v4803_v33, %v4723_v61  ;;  %v4809_v39 = vpop.f32.mrf.mxu1  ;;  %v4998_v57 = vrot.slane %v4863_v56, 5  ;;  %v5059_v58 = vld [vmem:[#allocation4] sm:$0xff]  ;;  %v5099_v23 = vmul.f32 %v7941_v15, %v5060_v54  ;;  %v7947_v61 = vld [vmem:[#allocation13 + $0x2] ss:$0 sm:$0xff] }
 0x3e9   : > { %v4806_v6 = vadd.f32 %v4805_v4, %v4725_v2  ;;  %v4906_v44 = vrot.slane %v4864_v28, 5  ;;  %v4865_v18 = vsel %vm4829_vm11, %v4802_v60, %v4847_v45  ;;  %v4729_v29 = vadd.f32 %v4728_v49, %v7888_v30  ;;  %v5166_v26 = vld [vmem:[#allocation4 + $0x1] sm:$0xff]  ;;  %v5274_v60 = vld [vmem:[#allocation4 + $0xa] sm:$0xff]  ;;  %v7953_v45 = vld [vmem:[#allocation13 + $0x3] ss:$0 sm:$0xff] }
 0x3ea   : > { %v4730_v59 = vpop.f32.mrf.mxu0  ;;  %v4999_v51 = vrot.slane %v4865_v18, 5  ;;  %vm4830_vm12 = vcmp.ge.f32.partialorder %v4804_v7, 0.0  ;;  %v4848_v19 = vmul.f32 0.01, %v4804_v7  ;;  %v4811_v40 = vpop.f32.mrf.mxu1  ;;  %v4993_v3 = vsel %vm4897_vm8, %v4991_v5, %v4992_v1  ;;  %v5273_v56 = vld [vmem:[#allocation4 + $0x2] sm:$0xff] }
 0x3eb   : > { %vm4831_vm13 = vcmp.ge.f32.partialorder %v4806_v6, 0.0  ;;  %v4849_v34 = vmul.f32 0.01, %v4806_v6  ;;  %5034 = vrot.lane.b32.xlu1 %v4986_v0, %s7352_s12  ;;  %v4731_v22 = vadd.f32 %v4730_v59, %v7891_v21  ;;  %v4810_v35 = vadd.f32 %v4809_v39, %v4729_v29  ;;  %4996 = vst [vmem:[#allocation4 + $0xab] ss:$2 sm:$0xff] %v4993_v3  ;;  %5039 = vrot.lane.b32.xlu0 %v4993_v3, %s7352_s12 }
 0x3ec   : > { %v4732_v47 = vpop.f32.mrf.mxu0  ;;  %v4866_v25 = vsel %vm4830_vm12, %v4804_v7, %v4848_v19  ;;  %v4907_v27 = vsel %vm2062_vm3, %v4905_v13, %v4906_v44  ;;  %v5000_v30 = vsel %vm2062_vm3, %v4998_v57, %v4999_v51  ;;  %v4813_v31 = vpop.f32.mrf.mxu1  ;;  %v4912_v36 = vrot.slane %v4864_v28, 6  ;;  %v7958_v29 = vld [vmem:[#allocation13 + $0x5] ss:$0 sm:$0xff] }
 0x3ed   : > { %v4913_v37 = vrot.slane %v4866_v25, 6  ;;  %v4867_v11 = vsel %vm4831_vm13, %v4806_v6, %v4849_v34  ;;  %vm4832_vm14 = vcmp.ge.f32.partialorder %v4810_v35, 0.0  ;;  %4910 = vst [vmem:[#allocation4 + $0xbc] ss:$2 sm:$0xff] %v4907_v27  ;;  %5003 = vst [vmem:[#allocation4 + $0xcd] ss:$2 sm:$0xff] %v5000_v30  ;;  %v4812_v41 = vadd.f32 %v4811_v40, %v4731_v22 }
 0x3ee   : > { %v4733_v10 = vpop.f32.mrf.mxu0  ;;  %v5005_v21 = vrot.slane %v4865_v18, 6  ;;  %v5006_v38 = vrot.slane %v4867_v11, 6  ;;  %v4850_v12 = vmul.f32 0.01, %v4810_v35  ;;  %v4814_v42 = vpop.f32.mrf.mxu1  ;;  %v4919_v17 = vrot.slane %v4866_v25, 7 }
 0x3ef   : > { %4951 = vrot.lane.b32.xlu1 %v4907_v27, %s7352_s12  ;;  %v4914_v24 = vsel %vm2087_vm4, %v4912_v36, %v4913_v37  ;;  %vm4833_vm3 = vcmp.ge.f32.partialorder %v4812_v41, 0.0  ;;  %v4851_v48 = vmul.f32 0.01, %v4812_v41  ;;  %v5012_v62 = vrot.slane %v4867_v11, 7  ;;  %v7955_v6 = vld [vmem:[#allocation13 + $0x4] ss:$0 sm:$0xff] }
 0x3f0   : > { %v4868_v46 = vsel %vm4832_vm14, %v4810_v35, %v4850_v12  ;;  %4917 = vst [vmem:[#allocation4 + $0xde] ss:$2 sm:$0xff] %v4914_v24  ;;  %v5007_v9 = vsel %vm2087_vm4, %v5005_v21, %v5006_v38  ;;  %4956 = vrot.lane.b32.xlu0 %v4914_v24, %s7352_s12  ;;  %v5206_v33 = vmul.f32 %v7943_v55, %v5167_v32  ;;  %v7964_v47 = vld [vmem:[#allocation13 + $0x6] ss:$0 sm:$0xff]  ;;  %v7974_v10 = vld [vmem:[#allocation13 + $0x7] ss:$0 sm:$0xff] }
 0x3f1   : > { %v4920_v16 = vrot.slane %v4868_v46, 7  ;;  %5010 = vst [vmem:[#allocation4 + $0xef] ss:$2 sm:$0xff] %v5007_v9  ;;  %v4869_v52 = vsel %vm4833_vm3, %v4812_v41, %v4851_v48  ;;  %v5098_v63 = vmul.f32 %v7941_v15, %v5059_v58  ;;  %v5205_v0 = vmul.f32 %v7943_v55, %v5166_v26 }
 0x3f2   : > { %v5013_v14 = vrot.slane %v4869_v52, 7  ;;  %v5240_v50 = vadd.f32 %v5206_v33, %v5099_v23  ;;  %v5313_v2 = vmul.f32 %v7947_v61, %v5274_v60  ;;  %v5312_v1 = vmul.f32 %v7947_v61, %v5273_v56 }
 0x3f3   : > { %5044 = vrot.lane.b32.xlu1 %v5000_v30, %s7352_s12  ;;  %v4921_v53 = vsel %vm4140_vm10, %v4919_v17, %v4920_v16  ;;  %v5239_v5 = vadd.f32 %v5205_v0, %v5098_v63  ;;  %v7981_v16 = vld [vmem:[#allocation13 + $0x8] ss:$0 sm:$0xff]  ;;  %vm459_vm4 = vcmask 519168   ;;  %vm6040_vm15 = vcmask 7169  }
 0x3f4   : > { %4924 = vst [vmem:[#allocation4 + $0x100] ss:$2 sm:$0xff] %v4921_v53  ;;  %5049 = vrot.lane.b32.xlu0 %v5007_v9, %s7352_s12  ;;  %v5014_v20 = vsel %vm4140_vm10, %v5012_v62, %v5013_v14  ;;  %v5347_v49 = vadd.f32 %v5313_v2, %v5240_v50  ;;  %vm6037_vm10 = vcmask 7168   ;;  %vm6043_vm0 = vcmask 0  }
 0x3f5   : > { %5017 = vst [vmem:[#allocation4 + $0x111] ss:$2 sm:$0xff] %v5014_v20  ;;  %v5346_v8 = vadd.f32 %v5312_v1, %v5239_v5  ;;  %vm6045_vm1 = vcmask 7170   ;;  %vm6050_vm6 = vcmask 7171   ;;  %vm6053_vm2 = vcmask 2048  }
 0x3f6   : > { %vm6055_vm7 = vcmask 7172   ;;  %vm6058_vm8 = vcmask 3072   ;;  %vm6060_vm9 = vcmask 7173   ;;  %vm6063_vm11 = vcmask 4096  }
 0x3f7   : > { %4961 = vrot.lane.b32.xlu1 %v4921_v53, %s7352_s12  ;;  %vm6065_vm12 = vcmask 7174   ;;  %vm6068_vm13 = vcmask 5120   ;;  %vm6070_vm14 = vcmask 7175   ;;  %vm6073_vm3 = vcmask 6144  }
 0x3fb   : > { %5054 = vrot.lane.b32.xlu1 %v5014_v20, %s7352_s12 }
 0x442   : > { %v4927_v43 = vpop.permute.xlu0 %4926 }
 0x443   : > { %4930 = vst [vmem:[#allocation4 + $0x13] ss:$2 sm:$0xff] %v4927_v43 }
 0x446   : > { %v5020_v4 = vpop.permute.xlu0 %5019 }
 0x447   : > { %5023 = vst [vmem:[#allocation4 + $0x24] ss:$2 sm:$0xff] %v5020_v4 }
 0x44a   : > { %v5169_v28 = vld [vmem:[#allocation4 + $0x19] sm:$0xff]  ;;  %v5168_v13 = vld [vmem:[#allocation4 + $0x11] sm:$0xff] }
 0x44b   : > { %v5276_v7 = vld [vmem:[#allocation4 + $0x1a] sm:$0xff]  ;;  %v5388_v39 = vmul.f32 %v7953_v45, %v5169_v28  ;;  %v5275_v44 = vld [vmem:[#allocation4 + $0x12] sm:$0xff]  ;;  %v5387_v59 = vmul.f32 %v7953_v45, %v5168_v13  ;;  %v5207_v27 = vmul.f32 %v7943_v55, %v5168_v13  ;;  %v5208_v21 = vmul.f32 %v7943_v55, %v5169_v28 }
 0x44c   : > { %v5531_v18 = vld [vmem:[#allocation4 + $0x1b] sm:$0xff]  ;;  %v5061_v57 = vld [vmem:[#allocation4 + $0x10] sm:$0xff]  ;;  %v5463_v40 = vmul.f32 %v7955_v6, %v5276_v7  ;;  %v5462_v3 = vmul.f32 %v7955_v6, %v5275_v44  ;;  %v5314_v52 = vmul.f32 %v7947_v61, %v5275_v44  ;;  %v5315_v56 = vmul.f32 %v7947_v61, %v5276_v7 }
 0x44d   : > { %v4932_v51 = vpop.permute.xlu0 %4931  ;;  %v5422_v19 = vadd.f32 %v5388_v39, %v5347_v49  ;;  %v5530_v34 = vld [vmem:[#allocation4 + $0x13] sm:$0xff]  ;;  %v5421_v25 = vadd.f32 %v5387_v59, %v5346_v8  ;;  %v5100_v30 = vmul.f32 %v7941_v15, %v5061_v57  ;;  %v5570_v36 = vmul.f32 %v7958_v29, %v5531_v18 }
 0x44e   : > { %v5062_v22 = vld [vmem:[#allocation4 + $0x18] sm:$0xff]  ;;  %4935 = vst [vmem:[#allocation4 + $0x35] ss:$2 sm:$0xff] %v4932_v51  ;;  %v7962_v35 = vld [vmem:[#allocation4 + $0x2a] sm:$0xff]  ;;  %v7970_v37 = vld [vmem:[#allocation4 + $0x22] sm:$0xff]  ;;  %v5569_v12 = vmul.f32 %v7958_v29, %v5530_v34 }
 0x44f   : > { %v5497_v31 = vadd.f32 %v5463_v40, %v5422_v19  ;;  %v7972_v11 = vld [vmem:[#allocation4 + $0x2b] sm:$0xff]  ;;  %v5496_v38 = vadd.f32 %v5462_v3, %v5421_v25  ;;  %v5170_v41 = vld [vmem:[#allocation4 + $0x21] sm:$0xff]  ;;  %v5101_v42 = vmul.f32 %v7941_v15, %v5062_v22  ;;  %v5645_v46 = vmul.f32 %v7964_v47, %v7962_v35 }
 0x450   : > { %v5532_v48 = vld [vmem:[#allocation4 + $0x23] sm:$0xff]  ;;  %v5788_v17 = vld [vmem:[#allocation4 + $0x2c] sm:$0xff]  ;;  %v5644_v14 = vmul.f32 %v7964_v47, %v7970_v37  ;;  %v5241_v20 = vadd.f32 %v5207_v27, %v5100_v30  ;;  %v5720_v58 = vmul.f32 %v7974_v10, %v7972_v11  ;;  %v5389_v26 = vmul.f32 %v7953_v45, %v5170_v41 }
 0x451   : > { %v5604_v24 = vadd.f32 %v5570_v36, %v5497_v31  ;;  %v5025_v9 = vpop.permute.xlu1 %5024  ;;  %v5603_v62 = vadd.f32 %v5569_v12, %v5496_v38  ;;  %v5787_v53 = vld [vmem:[#allocation4 + $0x24] sm:$0xff]  ;;  %v5719_v43 = vmul.f32 %v7974_v10, %v5532_v48  ;;  %v5242_v63 = vadd.f32 %v5208_v21, %v5101_v42 }
 0x452   : > { %5028 = vst [vmem:[#allocation4 + $0x46] ss:$2 sm:$0xff] %v5025_v9  ;;  %v5171_v23 = vld [vmem:[#allocation4 + $0x29] sm:$0xff]  ;;  %v5348_v60 = vadd.f32 %v5314_v52, %v5241_v20  ;;  %v5063_v0 = vld [vmem:[#allocation4 + $0x20] sm:$0xff]  ;;  %v5827_v2 = vmul.f32 %v7981_v16, %v5788_v17  ;;  %v5826_v4 = vmul.f32 %v7981_v16, %v5787_v53  ;;  %v5464_v8 = vmul.f32 %v7955_v6, %v7970_v37 }
 0x453   : > { %v5030_v54 = vpop.permute.xlu0 %5029  ;;  %v5679_v32 = vadd.f32 %v5645_v46, %v5604_v24  ;;  %v5678_v33 = vadd.f32 %v5644_v14, %v5603_v62  ;;  %v5390_v39 = vmul.f32 %v7953_v45, %v5171_v23  ;;  %v5571_v44 = vmul.f32 %v7958_v29, %v5532_v48  ;;  %v5064_v59 = vld [vmem:[#allocation4 + $0x28] sm:$0xff] }
 0x454   : > { %5033 = vst [vmem:[#allocation4 + $0x68] ss:$2 sm:$0xff] %v5030_v54  ;;  %v5423_v28 = vadd.f32 %v5389_v26, %v5348_v60  ;;  %v5209_v7 = vmul.f32 %v7943_v55, %v5170_v41  ;;  %v5102_v18 = vmul.f32 %v7941_v15, %v5063_v0  ;;  %v5349_v40 = vadd.f32 %v5315_v56, %v5242_v63 }
 0x455   : > { %v5754_v50 = vadd.f32 %v5720_v58, %v5679_v32  ;;  %v5279_v5 = vld [vmem:[#allocation4 + $0x32] sm:$0xff]  ;;  %v4937_v1 = vpop.permute.xlu1 %4936  ;;  %v5753_v49 = vadd.f32 %v5719_v43, %v5678_v33  ;;  %v5210_v3 = vmul.f32 %v7943_v55, %v5171_v23  ;;  %v5280_v27 = vld [vmem:[#allocation4 + $0x3a] sm:$0xff]  ;;  %v5465_v30 = vmul.f32 %v7955_v6, %v7962_v35 }
 0x456   : > { %4940 = vst [vmem:[#allocation4 + $0x57] ss:$2 sm:$0xff] %v4937_v1  ;;  %v5498_v51 = vadd.f32 %v5464_v8, %v5423_v28  ;;  %v5646_v19 = vmul.f32 %v7964_v47, %v5279_v5  ;;  %v5172_v34 = vld [vmem:[#allocation4 + $0x31] sm:$0xff]  ;;  %v5424_v38 = vadd.f32 %v5390_v39, %v5349_v40  ;;  %v5103_v12 = vmul.f32 %v7941_v15, %v5064_v59  ;;  %v5535_v14 = vld [vmem:[#allocation4 + $0x3b] sm:$0xff] }
 0x457   : > { %v5861_v13 = vadd.f32 %v5827_v2, %v5754_v50  ;;  %v5860_v57 = vadd.f32 %v5826_v4, %v5753_v49  ;;  %v5534_v25 = vld [vmem:[#allocation4 + $0x33] sm:$0xff]  ;;  %v5572_v41 = vmul.f32 %v7958_v29, %v7972_v11  ;;  %v5316_v42 = vmul.f32 %v7947_v61, %v7970_v37  ;;  %v5790_v43 = vld [vmem:[#allocation4 + $0x3c] sm:$0xff] }
 0x458   : > { %v5605_v21 = vadd.f32 %v5571_v44, %v5498_v51  ;;  %v5789_v24 = vld [vmem:[#allocation4 + $0x34] sm:$0xff]  ;;  %v5243_v46 = vadd.f32 %v5209_v7, %v5102_v18  ;;  %v5391_v48 = vmul.f32 %v7953_v45, %v5172_v34  ;;  %v5721_v52 = vmul.f32 %v7974_v10, %v5534_v25 }
 0x459   : > { %v5897_v22 = vsel %vm420_vm5, %v5861_v13, 0.0  ;;  %v4942_v31 = vpop.permute.xlu1 %4941  ;;  %v5894_v36 = vsel %vm420_vm5, %v5860_v57, 0.0  ;;  %v4947_v9 = vpop.permute.xlu0 %4946  ;;  %v5499_v62 = vadd.f32 %v5465_v30, %v5424_v38  ;;  %v5647_v53 = vmul.f32 %v7964_v47, %v5280_v27  ;;  %v5173_v20 = vld [vmem:[#allocation4 + $0x39] sm:$0xff]  ;;  %v5065_v50 = vld [vmem:[#allocation4 + $0x30] sm:$0xff]  ;;  %v5281_v28 = vld [vmem:[#allocation4 + $0x42] sm:$0xff] }
 0x45a   : > { %5898 = vadd.xlane.f32.xlu1 %v5897_v22  ;;  %4945 = vst [vmem:[#allocation4 + $0x79] ss:$2 sm:$0xff] %v4942_v31  ;;  %5895 = vadd.xlane.f32.xlu0 %v5894_v36  ;;  %v5680_v17 = vadd.f32 %v5646_v19, %v5605_v21  ;;  %4950 = vst [vmem:[#allocation4 + $0x9b] ss:$2 sm:$0xff] %v4947_v9  ;;  %v5317_v11 = vmul.f32 %v7947_v61, %v7962_v35  ;;  %v5536_v7 = vld [vmem:[#allocation4 + $0x43] sm:$0xff] }
 0x45b   : > { %v5318_v37 = vmul.f32 %v7947_v61, %v5279_v5  ;;  %v5573_v54 = vmul.f32 %v7958_v29, %v5534_v25  ;;  %v5350_v32 = vadd.f32 %v5316_v42, %v5243_v46  ;;  %v5828_v23 = vmul.f32 %v7981_v16, %v5789_v24  ;;  %v8028_v51 = vld [vmem:[#allocation4 + $0x4a] sm:$0xff] }
 0x45c   : > { %v5755_v26 = vadd.f32 %v5721_v52, %v5680_v17  ;;  %v5606_v33 = vadd.f32 %v5572_v41, %v5499_v62  ;;  %v5244_v60 = vadd.f32 %v5210_v3, %v5103_v12  ;;  %v5722_v63 = vmul.f32 %v7974_v10, %v5535_v14  ;;  %v5791_v21 = vld [vmem:[#allocation4 + $0x44] sm:$0xff]  ;;  %v5066_v41 = vld [vmem:[#allocation4 + $0x38] sm:$0xff] }
 0x45d   : > { %v5035_v58 = vpop.permute.xlu1 %5034  ;;  %v5425_v0 = vadd.f32 %v5391_v48, %v5350_v32  ;;  %v5466_v56 = vmul.f32 %v7955_v6, %v5279_v5  ;;  %v5392_v35 = vmul.f32 %v7953_v45, %v5173_v20  ;;  %v5040_v2 = vpop.permute.xlu0 %5039  ;;  %v5211_v49 = vmul.f32 %v7943_v55, %v5172_v34  ;;  %v5537_v48 = vld [vmem:[#allocation4 + $0x4b] sm:$0xff] }
 0x45e   : > { %5038 = vst [vmem:[#allocation4 + $0x8a] ss:$2 sm:$0xff] %v5035_v58  ;;  %v5862_v4 = vadd.f32 %v5828_v23, %v5755_v26  ;;  %v5681_v1 = vadd.f32 %v5647_v53, %v5606_v33  ;;  %v5351_v8 = vadd.f32 %v5317_v11, %v5244_v60  ;;  %5043 = vst [vmem:[#allocation4 + $0xac] ss:$2 sm:$0xff] %v5040_v2  ;;  %v5283_v58 = vld [vmem:[#allocation4 + $0x52] sm:$0xff] }
 0x45f   : > { %v8023_v39 = vmul.f32 %v7947_v61, %v5280_v27  ;;  %v5829_v13 = vmul.f32 %v7981_v16, %v5790_v43  ;;  %v5500_v44 = vadd.f32 %v5466_v56, %v5425_v0  ;;  %v5467_v5 = vmul.f32 %v7955_v6, %v5280_v27  ;;  %v5174_v27 = vld [vmem:[#allocation4 + $0x41] sm:$0xff] }
 0x460   : > { %v5900_v59 = vsel %vm420_vm5, %v5862_v4, 0.0  ;;  %v5756_v57 = vadd.f32 %v5722_v63, %v5681_v1  ;;  %v5426_v19 = vadd.f32 %v5392_v35, %v5351_v8  ;;  %v5104_v40 = vmul.f32 %v7941_v15, %v5065_v50  ;;  %v5175_v63 = vld [vmem:[#allocation4 + $0x49] sm:$0xff]  ;;  %v5067_v0 = vld [vmem:[#allocation4 + $0x40] sm:$0xff] }
 0x461   : > { %v4952_v18 = vpop.permute.xlu1 %4951  ;;  %5901 = vadd.xlane.f32.xlu0 %v5900_v59  ;;  %v5574_v34 = vmul.f32 %v7958_v29, %v5535_v14  ;;  %v8033_v22 = vmul.f32 %v7947_v61, %v5281_v28  ;;  %v5607_v25 = vadd.f32 %v5573_v54, %v5500_v44  ;;  %v5648_v3 = vmul.f32 %v7964_v47, %v5281_v28  ;;  %v5176_v44 = vld [vmem:[#allocation4 + $0x51] sm:$0xff] }
 0x462   : > { %4955 = vst [vmem:[#allocation4 + $0xbd] ss:$2 sm:$0xff] %v4952_v18  ;;  %v4957_v30 = vpop.permute.xlu0 %4956  ;;  %v5863_v31 = vadd.f32 %v5829_v13, %v5756_v57  ;;  %v5575_v36 = vmul.f32 %v7958_v29, %v5536_v7  ;;  %v5501_v38 = vadd.f32 %v5467_v5, %v5426_v19  ;;  %v5245_v12 = vadd.f32 %v5211_v49, %v5104_v40 }
 0x463   : > { %4960 = vst [vmem:[#allocation4 + $0xdf] ss:$2 sm:$0xff] %v4957_v30  ;;  %v5682_v42 = vadd.f32 %v5648_v3, %v5607_v25  ;;  %v5723_v24 = vmul.f32 %v7974_v10, %v5536_v7  ;;  %v5212_v46 = vmul.f32 %v7943_v55, %v5173_v20  ;;  %v5649_v9 = vmul.f32 %v7964_v47, %v8028_v51  ;;  %v5792_v20 = vld [vmem:[#allocation4 + $0x4c] sm:$0xff] }
 0x464   : > { %v5903_v52 = vsel %vm420_vm5, %v5863_v31, 0.0  ;;  %v5608_v62 = vadd.f32 %v5574_v34, %v5501_v38  ;;  %v5352_v14 = vadd.f32 %v5318_v37, %v5245_v12  ;;  %v5393_v53 = vmul.f32 %v7953_v45, %v5174_v27  ;;  %v5538_v7 = vld [vmem:[#allocation4 + $0x53] sm:$0xff]  ;;  %v5068_v3 = vld [vmem:[#allocation4 + $0x48] sm:$0xff] }
 0x465   : > { %v5045_v17 = vpop.permute.xlu1 %5044  ;;  %5904 = vadd.xlane.f32.xlu0 %v5903_v52  ;;  %v5757_v11 = vadd.f32 %v5723_v24, %v5682_v42  ;;  %v5830_v54 = vmul.f32 %v7981_v16, %v5791_v21  ;;  %v8046_v32 = vmul.f32 %v7947_v61, %v8028_v51  ;;  %v5105_v26 = vmul.f32 %v7941_v15, %v5066_v41  ;;  %v5793_v34 = vld [vmem:[#allocation4 + $0x54] sm:$0xff] }
 0x466   : > { %5048 = vst [vmem:[#allocation4 + $0xce] ss:$2 sm:$0xff] %v5045_v17  ;;  %v5050_v23 = vpop.permute.xlu0 %5049  ;;  %v5683_v33 = vadd.f32 %v5649_v9, %v5608_v62  ;;  %v5724_v43 = vmul.f32 %v7974_v10, %v5537_v48  ;;  %v5427_v37 = vadd.f32 %v5393_v53, %v5352_v14  ;;  %v5468_v60 = vmul.f32 %v7955_v6, %v5281_v28  ;;  %v5177_v24 = vld [vmem:[#allocation4 + $0x59] sm:$0xff] }
 0x467   : > { %5053 = vst [vmem:[#allocation4 + $0xf0] ss:$2 sm:$0xff] %v5050_v23  ;;  %v5864_v56 = vadd.f32 %v5830_v54, %v5757_v11  ;;  %v5576_v35 = vmul.f32 %v7958_v29, %v5537_v48  ;;  %v5213_v50 = vmul.f32 %v7943_v55, %v5174_v27  ;;  %v5246_v2 = vadd.f32 %v5212_v46, %v5105_v26  ;;  %v5284_v27 = vld [vmem:[#allocation4 + $0x5a] sm:$0xff] }
 0x468   : > { %v5758_v1 = vadd.f32 %v5724_v43, %v5683_v33  ;;  %v5831_v49 = vmul.f32 %v7981_v16, %v5792_v20  ;;  %v8055_v8 = vmul.f32 %v7947_v61, %v5283_v58  ;;  %v5502_v13 = vadd.f32 %v5468_v60, %v5427_v37  ;;  %v5539_v9 = vld [vmem:[#allocation4 + $0x5b] sm:$0xff]  ;;  %v5069_v43 = vld [vmem:[#allocation4 + $0x50] sm:$0xff] }
 0x469   : > { %v4962_v4 = vpop.permute.xlu1 %4961  ;;  %v5906_v28 = vsel %vm420_vm5, %v5864_v56, 0.0  ;;  %v5353_v5 = vadd.f32 %v8023_v39, %v5246_v2  ;;  %v5394_v18 = vmul.f32 %v7953_v45, %v5175_v63  ;;  %v5106_v59 = vmul.f32 %v7941_v15, %v5067_v0  ;;  %v5794_v53 = vld [vmem:[#allocation4 + $0x5c] sm:$0xff] }
 0x46a   : > { %4965 = vst [vmem:[#allocation4 + $0x101] ss:$2 sm:$0xff] %v4962_v4  ;;  %5907 = vadd.xlane.f32.xlu1 %v5906_v28  ;;  %v5865_v57 = vadd.f32 %v5831_v49, %v5758_v1  ;;  %v5609_v19 = vadd.f32 %v5575_v36, %v5502_v13  ;;  %v5650_v40 = vmul.f32 %v7964_v47, %v5283_v58  ;;  %v5285_v20 = vld [vmem:[#allocation4 + $0x62] sm:$0xff] }
 0x46b   : > { %v5214_v25 = vmul.f32 %v7943_v55, %v5175_v63  ;;  %v5428_v30 = vadd.f32 %v5394_v18, %v5353_v5  ;;  %v5469_v31 = vmul.f32 %v7955_v6, %v8028_v51  ;;  %v5247_v21 = vadd.f32 %v5213_v50, %v5106_v59  ;;  %v5540_v2 = vld [vmem:[#allocation4 + $0x63] sm:$0xff] }
 0x46c   : > { %v5395_v39 = vmul.f32 %v7953_v45, %v5176_v44  ;;  %v5909_v38 = vsel %vm420_vm5, %v5865_v57, 0.0  ;;  %v5577_v12 = vmul.f32 %v7958_v29, %v5538_v7  ;;  %v5684_v41 = vadd.f32 %v5650_v40, %v5609_v19  ;;  %v5795_v49 = vld [vmem:[#allocation4 + $0x64] sm:$0xff]  ;;  %v5070_v57 = vld [vmem:[#allocation4 + $0x58] sm:$0xff] }
 0x46d   : > { %v5725_v36 = vmul.f32 %v7974_v10, %v5538_v7  ;;  %v5055_v42 = vpop.permute.xlu1 %5054  ;;  %5910 = vadd.xlane.f32.xlu0 %v5909_v38  ;;  %v5832_v46 = vmul.f32 %v7981_v16, %v5793_v34  ;;  %v5503_v48 = vadd.f32 %v5469_v31, %v5428_v30  ;;  %v5354_v51 = vadd.f32 %v8033_v22, %v5247_v21  ;;  %v5286_v7 = vld [vmem:[#allocation4 + $0x6a] sm:$0xff]  ;;  %v5178_v59 = vld [vmem:[#allocation4 + $0x61] sm:$0xff] }
 0x46e   : > { %5058 = vst [vmem:[#allocation4 + $0x112] ss:$2 sm:$0xff] %v5055_v42  ;;  %v5107_v17 = vmul.f32 %v7941_v15, %v5068_v3  ;;  %v8073_v62 = vmul.f32 %v7947_v61, %v5284_v27  ;;  %v5651_v14 = vmul.f32 %v7964_v47, %v5284_v27  ;;  %v5470_v11 = vmul.f32 %v7955_v6, %v5283_v58  ;;  %v5541_v21 = vld [vmem:[#allocation4 + $0x6b] sm:$0xff] }
 0x46f   : > { %v5759_v52 = vadd.f32 %v5725_v36, %v5684_v41  ;;  %v5610_v54 = vadd.f32 %v5576_v35, %v5503_v48  ;;  %v5429_v26 = vadd.f32 %v5395_v39, %v5354_v51  ;;  %v5396_v33 = vmul.f32 %v7953_v45, %v5177_v24  ;;  %v5179_v48 = vld [vmem:[#allocation4 + $0x69] sm:$0xff]  ;;  %v5287_v51 = vld [vmem:[#allocation4 + $0x72] sm:$0xff] }
 0x470   : > { %v5248_v23 = vadd.f32 %v5214_v25, %v5107_v17  ;;  %v5578_v22 = vmul.f32 %v7958_v29, %v5539_v9  ;;  %v5726_v60 = vmul.f32 %v7974_v10, %v5539_v9  ;;  %v5215_v63 = vmul.f32 %v7943_v55, %v5176_v44 }
 0x471   : > { %v5866_v37 = vadd.f32 %v5832_v46, %v5759_v52  ;;  %v5685_v0 = vadd.f32 %v5651_v14, %v5610_v54  ;;  %v5833_v56 = vmul.f32 %v7981_v16, %v5794_v53  ;;  %v5504_v50 = vadd.f32 %v5470_v11, %v5429_v26  ;;  %v5796_v46 = vld [vmem:[#allocation4 + $0x6c] sm:$0xff]  ;;  %v5071_v14 = vld [vmem:[#allocation4 + $0x60] sm:$0xff] }
 0x472   : > { %v5355_v58 = vadd.f32 %v8046_v32, %v5248_v23  ;;  %v8085_v4 = vmul.f32 %v7947_v61, %v5285_v20  ;;  %v5652_v1 = vmul.f32 %v7964_v47, %v5285_v20  ;;  %v5108_v13 = vmul.f32 %v7941_v15, %v5069_v43  ;;  %v5542_v43 = vld [vmem:[#allocation4 + $0x73] sm:$0xff] }
 0x473   : > { %v5912_v35 = vsel %vm420_vm5, %v5866_v37, 0.0  ;;  %v5760_v28 = vadd.f32 %v5726_v60, %v5685_v0  ;;  %v5611_v44 = vadd.f32 %v5577_v12, %v5504_v50  ;;  %v5471_v18 = vmul.f32 %v7955_v6, %v5284_v27  ;;  %v5797_v0 = vld [vmem:[#allocation4 + $0x74] sm:$0xff] }
 0x474   : > { %5913 = vadd.xlane.f32.xlu1 %v5912_v35  ;;  %v5430_v5 = vadd.f32 %v5396_v33, %v5355_v58  ;;  %v5579_v32 = vmul.f32 %v7958_v29, %v5540_v2  ;;  %v5727_v19 = vmul.f32 %v7974_v10, %v5540_v2  ;;  %v5216_v40 = vmul.f32 %v7943_v55, %v5177_v24 }
 0x475   : > { %v5249_v34 = vadd.f32 %v5215_v63, %v5108_v13  ;;  %v5867_v25 = vadd.f32 %v5833_v56, %v5760_v28  ;;  %v5686_v3 = vadd.f32 %v5652_v1, %v5611_v44  ;;  %v5834_v30 = vmul.f32 %v7981_v16, %v5795_v49  ;;  %v5180_v1 = vld [vmem:[#allocation4 + $0x71] sm:$0xff]  ;;  %v5288_v44 = vld [vmem:[#allocation4 + $0x7a] sm:$0xff] }
 0x476   : > { %v5505_v31 = vadd.f32 %v5471_v18, %v5430_v5  ;;  %v8095_v39 = vmul.f32 %v7947_v61, %v5286_v7  ;;  %v5397_v38 = vmul.f32 %v7953_v45, %v5178_v59  ;;  %v5109_v12 = vmul.f32 %v7941_v15, %v5070_v57 }
 0x477   : > { %v5356_v27 = vadd.f32 %v8055_v8, %v5249_v34  ;;  %v5915_v41 = vsel %vm420_vm5, %v5867_v25, 0.0  ;;  %v5761_v36 = vadd.f32 %v5727_v19, %v5686_v3  ;;  %v5653_v24 = vmul.f32 %v7964_v47, %v5286_v7  ;;  %v5181_v19 = vld [vmem:[#allocation4 + $0x79] sm:$0xff] }
 0x478   : > { %v5612_v42 = vadd.f32 %v5578_v22, %v5505_v31  ;;  %5916 = vadd.xlane.f32.xlu0 %v5915_v41  ;;  %v5580_v9 = vmul.f32 %v7958_v29, %v5541_v21  ;;  %v5472_v52 = vmul.f32 %v7955_v6, %v5285_v20  ;;  %v5250_v8 = vadd.f32 %v5216_v40, %v5109_v12  ;;  %v5543_v34 = vld [vmem:[#allocation4 + $0x7b] sm:$0xff] }
 0x479   : > { %v5431_v17 = vadd.f32 %v5397_v38, %v5356_v27  ;;  %v5868_v53 = vadd.f32 %v5834_v30, %v5761_v36  ;;  %v5728_v54 = vmul.f32 %v7974_v10, %v5541_v21  ;;  %v5217_v26 = vmul.f32 %v7943_v55, %v5178_v59  ;;  %v5798_v38 = vld [vmem:[#allocation4 + $0x7c] sm:$0xff] }
 0x47a   : > { %v5687_v11 = vadd.f32 %v5653_v24, %v5612_v42  ;;  %v5835_v23 = vmul.f32 %v7981_v16, %v5796_v46  ;;  %v5357_v37 = vadd.f32 %v8073_v62, %v5250_v8  ;;  %v5398_v22 = vmul.f32 %v7953_v45, %v5179_v48  ;;  %v5072_v62 = vld [vmem:[#allocation4 + $0x68] sm:$0xff]  ;;  %v5073_v24 = vld [vmem:[#allocation4 + $0x70] sm:$0xff] }
 0x47b   : > { %v5506_v33 = vadd.f32 %v5472_v52, %v5431_v17  ;;  %v5918_v60 = vsel %vm420_vm5, %v5868_v53, 0.0  ;;  %v8111_v20 = vmul.f32 %v7947_v61, %v5287_v51  ;;  %v5110_v56 = vmul.f32 %v7941_v15, %v5071_v14  ;;  %v5289_v12 = vld [vmem:[#allocation4 + $0x82] sm:$0xff] }
 0x47c   : > { %v5762_v63 = vadd.f32 %v5728_v54, %v5687_v11  ;;  %5919 = vadd.xlane.f32.xlu1 %v5918_v60  ;;  %v5654_v2 = vmul.f32 %v7964_v47, %v5287_v51  ;;  %v5432_v58 = vadd.f32 %v5398_v22, %v5357_v37  ;;  %v5473_v35 = vmul.f32 %v7955_v6, %v5286_v7  ;;  %v5544_v53 = vld [vmem:[#allocation4 + $0x83] sm:$0xff] }
 0x47d   : > { %v5613_v50 = vadd.f32 %v5579_v32, %v5506_v33  ;;  %v5581_v13 = vmul.f32 %v7958_v29, %v5542_v43  ;;  %v5218_v28 = vmul.f32 %v7943_v55, %v5179_v48  ;;  %v5251_v5 = vadd.f32 %v5217_v26, %v5110_v56 }
 0x47e   : > { %v5869_v49 = vadd.f32 %v5835_v23, %v5762_v63  ;;  %v5729_v59 = vmul.f32 %v7974_v10, %v5542_v43  ;;  %v5836_v57 = vmul.f32 %v7981_v16, %v5797_v0  ;;  %v5507_v32 = vadd.f32 %v5473_v35, %v5432_v58  ;;  %v5799_v23 = vld [vmem:[#allocation4 + $0x84] sm:$0xff]  ;;  %v5074_v0 = vld [vmem:[#allocation4 + $0x78] sm:$0xff] }
 0x47f   : > { %v5688_v18 = vadd.f32 %v5654_v2, %v5613_v50  ;;  %v5358_v7 = vadd.f32 %v8085_v4, %v5251_v5  ;;  %v5399_v25 = vmul.f32 %v7953_v45, %v5180_v1  ;;  %v5111_v3 = vmul.f32 %v7941_v15, %v5072_v62  ;;  %v5182_v63 = vld [vmem:[#allocation4 + $0x81] sm:$0xff]  ;;  %v5290_v2 = vld [vmem:[#allocation4 + $0x8a] sm:$0xff] }
 0x480   : > { %v5921_v40 = vsel %vm420_vm5, %v5869_v49, 0.0  ;;  %v8125_v31 = vmul.f32 %v7947_v61, %v5288_v44  ;;  %v5614_v21 = vadd.f32 %v5580_v9, %v5507_v32  ;;  %v5655_v27 = vmul.f32 %v7964_v47, %v5288_v44  ;;  %v5545_v5 = vld [vmem:[#allocation4 + $0x8b] sm:$0xff] }
 0x481   : > { %5922 = vadd.xlane.f32.xlu0 %v5921_v40  ;;  %v5763_v30 = vadd.f32 %v5729_v59, %v5688_v18  ;;  %v5433_v41 = vadd.f32 %v5399_v25, %v5358_v7  ;;  %v5474_v36 = vmul.f32 %v7955_v6, %v5287_v51  ;;  %v5252_v42 = vadd.f32 %v5218_v28, %v5111_v3  ;;  %v5291_v7 = vld [vmem:[#allocation4 + $0x92] sm:$0xff] }
 0x482   : > { %v5400_v4 = vmul.f32 %v7953_v45, %v5181_v19  ;;  %v5689_v48 = vadd.f32 %v5655_v27, %v5614_v21  ;;  %v5730_v17 = vmul.f32 %v7974_v10, %v5543_v34  ;;  %v5219_v52 = vmul.f32 %v7943_v55, %v5180_v1  ;;  %v5075_v21 = vld [vmem:[#allocation4 + $0x80] sm:$0xff] }
 0x483   : > { %v5870_v46 = vadd.f32 %v5836_v57, %v5763_v30  ;;  %v5582_v8 = vmul.f32 %v7958_v29, %v5543_v34  ;;  %v5837_v9 = vmul.f32 %v7981_v16, %v5798_v38  ;;  %v5508_v14 = vadd.f32 %v5474_v36, %v5433_v41  ;;  %v5800_v34 = vld [vmem:[#allocation4 + $0x8c] sm:$0xff] }
 0x484   : > { %v5359_v11 = vadd.f32 %v8095_v39, %v5252_v42  ;;  %v5764_v54 = vadd.f32 %v5730_v17, %v5689_v48  ;;  %v8137_v26 = vmul.f32 %v7947_v61, %v5289_v12  ;;  %v5112_v33 = vmul.f32 %v7941_v15, %v5073_v24  ;;  %v5184_v48 = vld [vmem:[#allocation4 + $0x91] sm:$0xff] }
 0x485   : > { %v5924_v51 = vsel %vm420_vm5, %v5870_v46, 0.0  ;;  %v5615_v43 = vadd.f32 %v5581_v13, %v5508_v14  ;;  %v5656_v37 = vmul.f32 %v7964_v47, %v5289_v12  ;;  %v5475_v60 = vmul.f32 %v7955_v6, %v5288_v44  ;;  %v5183_v13 = vld [vmem:[#allocation4 + $0x89] sm:$0xff] }
 0x486   : > { %5925 = vadd.xlane.f32.xlu1 %v5924_v51  ;;  %v5434_v22 = vadd.f32 %v5400_v4, %v5359_v11  ;;  %v5871_v56 = vadd.f32 %v5837_v9, %v5764_v54  ;;  %v5583_v39 = vmul.f32 %v7958_v29, %v5544_v53  ;;  %v5220_v50 = vmul.f32 %v7943_v55, %v5181_v19  ;;  %v5801_v11 = vld [vmem:[#allocation4 + $0x94] sm:$0xff] }
 0x487   : > { %v5253_v58 = vadd.f32 %v5219_v52, %v5112_v33  ;;  %v5690_v35 = vadd.f32 %v5656_v37, %v5615_v43  ;;  %v5731_v1 = vmul.f32 %v7974_v10, %v5544_v53  ;;  %v5838_v62 = vmul.f32 %v7981_v16, %v5799_v23  ;;  %v5076_v23 = vld [vmem:[#allocation4 + $0x88] sm:$0xff]  ;;  %v5292_v43 = vld [vmem:[#allocation4 + $0x9a] sm:$0xff] }
 0x488   : > { %v5509_v49 = vadd.f32 %v5475_v60, %v5434_v22  ;;  %v5927_v28 = vsel %vm420_vm5, %v5871_v56, 0.0  ;;  %v5401_v18 = vmul.f32 %v7953_v45, %v5182_v63  ;;  %v5113_v59 = vmul.f32 %v7941_v15, %v5074_v0 }
 0x489   : > { %v5360_v44 = vadd.f32 %v8111_v20, %v5253_v58  ;;  %5928 = vadd.xlane.f32.xlu0 %v5927_v28  ;;  %v5765_v57 = vadd.f32 %v5731_v1, %v5690_v35  ;;  %v8151_v32 = vmul.f32 %v7947_v61, %v5290_v2  ;;  %v5657_v40 = vmul.f32 %v7964_v47, %v5290_v2  ;;  %v5802_v28 = vld [vmem:[#allocation4 + $0x9c] sm:$0xff] }
 0x48a   : > { %v5616_v19 = vadd.f32 %v5582_v8, %v5509_v49  ;;  %v5476_v3 = vmul.f32 %v7955_v6, %v5289_v12  ;;  %v5254_v30 = vadd.f32 %v5220_v50, %v5113_v59  ;;  %v5402_v20 = vmul.f32 %v7953_v45, %v5183_v13  ;;  %v5546_v8 = vld [vmem:[#allocation4 + $0x93] sm:$0xff] }
 0x48b   : > { %v5435_v25 = vadd.f32 %v5401_v18, %v5360_v44  ;;  %v5872_v27 = vadd.f32 %v5838_v62, %v5765_v57  ;;  %v5732_v41 = vmul.f32 %v7974_v10, %v5545_v5  ;;  %v5221_v36 = vmul.f32 %v7943_v55, %v5182_v63  ;;  %v5293_v18 = vld [vmem:[#allocation4 + $0xa2] sm:$0xff] }
 0x48c   : > { %v5691_v38 = vadd.f32 %v5657_v40, %v5616_v19  ;;  %v5584_v42 = vmul.f32 %v7958_v29, %v5545_v5  ;;  %v5839_v4 = vmul.f32 %v7981_v16, %v5800_v34  ;;  %v5361_v46 = vadd.f32 %v8125_v31, %v5254_v30  ;;  %v5185_v5 = vld [vmem:[#allocation4 + $0x99] sm:$0xff] }
 0x48d   : > { %v5510_v24 = vadd.f32 %v5476_v3, %v5435_v25  ;;  %v5930_v12 = vsel %vm420_vm5, %v5872_v27, 0.0  ;;  %v8163_v52 = vmul.f32 %v7947_v61, %v5291_v7  ;;  %v5114_v9 = vmul.f32 %v7941_v15, %v5075_v21  ;;  %v5548_v21 = vld [vmem:[#allocation4 + $0xa3] sm:$0xff] }
 0x48e   : > { %v5766_v17 = vadd.f32 %v5732_v41, %v5691_v38  ;;  %5931 = vadd.xlane.f32.xlu1 %v5930_v12  ;;  %v5658_v53 = vmul.f32 %v7964_v47, %v5291_v7  ;;  %v5436_v51 = vadd.f32 %v5402_v20, %v5361_v46  ;;  %v5477_v54 = vmul.f32 %v7955_v6, %v5290_v2 }
 0x48f   : > { %v5617_v14 = vadd.f32 %v5583_v39, %v5510_v24  ;;  %v5222_v33 = vmul.f32 %v7943_v55, %v5183_v13  ;;  %v5255_v37 = vadd.f32 %v5221_v36, %v5114_v9  ;;  %v5403_v22 = vmul.f32 %v7953_v45, %v5184_v48  ;;  %v5547_v39 = vld [vmem:[#allocation4 + $0x9b] sm:$0xff] }
 0x490   : > { %v5873_v31 = vadd.f32 %v5839_v4, %v5766_v17  ;;  %v5585_v60 = vmul.f32 %v7958_v29, %v5546_v8  ;;  %v5733_v0 = vmul.f32 %v7974_v10, %v5546_v8  ;;  %v5511_v56 = vadd.f32 %v5477_v54, %v5436_v51  ;;  %v5186_v17 = vld [vmem:[#allocation4 + $0xa1] sm:$0xff] }
 0x491   : > { %v5692_v63 = vadd.f32 %v5658_v53, %v5617_v14  ;;  %v5840_v58 = vmul.f32 %v7981_v16, %v5801_v11  ;;  %v5362_v2 = vadd.f32 %v8137_v26, %v5255_v37  ;;  %v5115_v35 = vmul.f32 %v7941_v15, %v5076_v23  ;;  %v5077_v26 = vld [vmem:[#allocation4 + $0x90] sm:$0xff] }
 0x492   : > { %v5933_v50 = vsel %vm420_vm5, %v5873_v31, 0.0  ;;  %v8177_v62 = vmul.f32 %v7947_v61, %v5292_v43  ;;  %v5618_v49 = vadd.f32 %v5584_v42, %v5511_v56  ;;  %v5659_v13 = vmul.f32 %v7964_v47, %v5292_v43  ;;  %v5803_v42 = vld [vmem:[#allocation4 + $0xa4] sm:$0xff] }
 0x493   : > { %5934 = vadd.xlane.f32.xlu0 %v5933_v50  ;;  %v5767_v1 = vadd.f32 %v5733_v0, %v5692_v63  ;;  %v5586_v44 = vmul.f32 %v7958_v29, %v5547_v39  ;;  %v5437_v59 = vadd.f32 %v5403_v22, %v5362_v2  ;;  %v5478_v57 = vmul.f32 %v7955_v6, %v5291_v7  ;;  %v5294_v53 = vld [vmem:[#allocation4 + $0xaa] sm:$0xff] }
 0x494   : > { %v5256_v19 = vadd.f32 %v5222_v33, %v5115_v35  ;;  %v5693_v34 = vadd.f32 %v5659_v13, %v5618_v49  ;;  %v5734_v25 = vmul.f32 %v7974_v10, %v5547_v39  ;;  %v5223_v3 = vmul.f32 %v7943_v55, %v5184_v48  ;;  %v5549_v33 = vld [vmem:[#allocation4 + $0xab] sm:$0xff]  ;;  %v5079_v13 = vld [vmem:[#allocation4 + $0xa0] sm:$0xff] }
 0x495   : > { %v5874_v40 = vadd.f32 %v5840_v58, %v5767_v1  ;;  %v5841_v30 = vmul.f32 %v7981_v16, %v5802_v28  ;;  %v5512_v20 = vadd.f32 %v5478_v57, %v5437_v59  ;;  %v5404_v38 = vmul.f32 %v7953_v45, %v5185_v5  ;;  %v5804_v50 = vld [vmem:[#allocation4 + $0xac] sm:$0xff] }
 0x496   : > { %v5363_v27 = vadd.f32 %v8151_v32, %v5256_v19  ;;  %v5768_v36 = vadd.f32 %v5734_v25, %v5693_v34  ;;  %v8189_v7 = vmul.f32 %v7947_v61, %v5293_v18  ;;  %v5116_v4 = vmul.f32 %v7941_v15, %v5077_v26  ;;  %v5078_v32 = vld [vmem:[#allocation4 + $0x98] sm:$0xff]  ;;  %v5187_v58 = vld [vmem:[#allocation4 + $0xa9] sm:$0xff] }
 0x497   : > { %v5936_v41 = vsel %vm420_vm5, %v5874_v40, 0.0  ;;  %v5619_v24 = vadd.f32 %v5585_v60, %v5512_v20  ;;  %v5660_v46 = vmul.f32 %v7964_v47, %v5293_v18  ;;  %v5479_v12 = vmul.f32 %v7955_v6, %v5292_v43  ;;  %v5295_v35 = vld [vmem:[#allocation4 + $0xb2] sm:$0xff] }
 0x498   : > { %5937 = vadd.xlane.f32.xlu1 %v5936_v41  ;;  %v5438_v48 = vadd.f32 %v5404_v38, %v5363_v27  ;;  %v5875_v8 = vadd.f32 %v5841_v30, %v5768_v36  ;;  %v5587_v9 = vmul.f32 %v7958_v29, %v5548_v21  ;;  %v5735_v14 = vmul.f32 %v7974_v10, %v5548_v21  ;;  %v5188_v34 = vld [vmem:[#allocation4 + $0xb1] sm:$0xff]  ;;  %v5080_v41 = vld [vmem:[#allocation4 + $0xa8] sm:$0xff] }
 0x499   : > { %v5257_v11 = vadd.f32 %v5223_v3, %v5116_v4  ;;  %v5694_v51 = vadd.f32 %v5660_v46, %v5619_v24  ;;  %v5842_v54 = vmul.f32 %v7981_v16, %v5803_v42  ;;  %v5224_v23 = vmul.f32 %v7943_v55, %v5185_v5  ;;  %v5550_v30 = vld [vmem:[#allocation4 + $0xb3] sm:$0xff] }
 0x49a   : > { %v5513_v31 = vadd.f32 %v5479_v12, %v5438_v48  ;;  %v5939_v37 = vsel %vm420_vm5, %v5875_v8, 0.0  ;;  %v5405_v22 = vmul.f32 %v7953_v45, %v5186_v17  ;;  %v5117_v60 = vmul.f32 %v7941_v15, %v5078_v32  ;;  %v5805_v27 = vld [vmem:[#allocation4 + $0xb4] sm:$0xff] }
 0x49b   : > { %v5364_v43 = vadd.f32 %v8163_v52, %v5257_v11  ;;  %5940 = vadd.xlane.f32.xlu0 %v5939_v37  ;;  %v5769_v63 = vadd.f32 %v5735_v14, %v5694_v51  ;;  %v8203_v0 = vmul.f32 %v7947_v61, %v5294_v53  ;;  %v5661_v39 = vmul.f32 %v7964_v47, %v5294_v53  ;;  %v8220_v42 = vld [vmem:[#allocation13 + $0x1] ss:$0 sm:$0xff]  ;;  %v5551_v32 = vld [vmem:[#allocation4 + $0xbb] sm:$0xff]  ;;  %v8229_v14 = vld [vmem:[#allocation13] ss:$0 sm:$0xff] }
 0x49c   : > { %v5620_v56 = vadd.f32 %v5586_v44, %v5513_v31  ;;  %v5588_v2 = vmul.f32 %v7958_v29, %v5549_v33  ;;  %v5480_v52 = vmul.f32 %v7955_v6, %v5293_v18  ;;  %v5258_v49 = vadd.f32 %v5224_v23, %v5117_v60  ;;  %v5296_v24 = vld [vmem:[#allocation4 + $0xba] sm:$0xff] }
 0x49d   : > { %v5439_v1 = vadd.f32 %v5405_v22, %v5364_v43  ;;  %v5876_v28 = vadd.f32 %v5842_v54, %v5769_v63  ;;  %v5736_v59 = vmul.f32 %v7974_v10, %v5549_v33  ;;  %v5225_v57 = vmul.f32 %v7943_v55, %v5186_v17  ;;  %v5806_v31 = vld [vmem:[#allocation4 + $0xbc] sm:$0xff] }
 0x49e   : > { %v5695_v5 = vadd.f32 %v5661_v39, %v5620_v56  ;;  %v5843_v44 = vmul.f32 %v7981_v16, %v5804_v50  ;;  %v5365_v26 = vadd.f32 %v8177_v62, %v5258_v49  ;;  %v5406_v40 = vmul.f32 %v7953_v45, %v5187_v58  ;;  %v5189_v33 = vld [vmem:[#allocation4 + $0xb9] sm:$0xff]  ;;  %v5297_v43 = vld [vmem:[#allocation4 + $0xc2] sm:$0xff]  ;;  %v5081_v56 = vld [vmem:[#allocation4 + $0xb0] sm:$0xff] }
 0x49f   : > { %v5514_v19 = vadd.f32 %v5480_v52, %v5439_v1  ;;  %v5942_v25 = vsel %vm420_vm5, %v5876_v28, 0.0  ;;  %v8215_v18 = vmul.f32 %v7947_v61, %v5295_v35  ;;  %v5118_v20 = vmul.f32 %v7941_v15, %v5079_v13  ;;  %v8239_v22 = vld [vmem:[#allocation13 + $0x4] ss:$0 sm:$0xff]  ;;  %v5552_v52 = vld [vmem:[#allocation4 + $0xc3] sm:$0xff]  ;;  %v8246_v49 = vld [vmem:[#allocation13 + $0x3] ss:$0 sm:$0xff] }
 0x4a0   : > { %v5770_v3 = vadd.f32 %v5736_v59, %v5695_v5  ;;  %5943 = vadd.xlane.f32.xlu1 %v5942_v25  ;;  %v5662_v55 = vmul.f32 %v7964_v47, %v5295_v35  ;;  %v5440_v38 = vadd.f32 %v5406_v40, %v5365_v26  ;;  %v5481_v62 = vmul.f32 %v7955_v6, %v5294_v53  ;;  %v5807_v59 = vld [vmem:[#allocation4 + $0xc4] sm:$0xff] }
 0x4a1   : > { %v5621_v21 = vadd.f32 %v5587_v9, %v5514_v19  ;;  %v5226_v4 = vmul.f32 %v8220_v42, %v5187_v58  ;;  %v5259_v61 = vadd.f32 %v5225_v57, %v5118_v20  ;;  %v5407_v46 = vmul.f32 %v7953_v45, %v5188_v34  ;;  %v8232_v45 = vld [vmem:[#allocation13 + $0x2] ss:$0 sm:$0xff]  ;;  %v5190_v40 = vld [vmem:[#allocation4 + $0xc1] sm:$0xff] }
 0x4a2   : > { %v5877_v36 = vadd.f32 %v5843_v44, %v5770_v3  ;;  %v5589_v15 = vmul.f32 %v7958_v29, %v5550_v30  ;;  %v5737_v12 = vmul.f32 %v7974_v10, %v5550_v30  ;;  %v5515_v17 = vadd.f32 %v5481_v62, %v5440_v38  ;;  %v8254_v44 = vld [vmem:[#allocation13 + $0x6] ss:$0 sm:$0xff]  ;;  %v8258_v3 = vld [vmem:[#allocation13 + $0x5] ss:$0 sm:$0xff]  ;;  %v8262_v38 = vld [vmem:[#allocation13 + $0x7] ss:$0 sm:$0xff] }
 0x4a3   : > { %v5696_v48 = vadd.f32 %v5662_v55, %v5621_v21  ;;  %v5844_v6 = vmul.f32 %v7981_v16, %v5805_v27  ;;  %v5366_v9 = vadd.f32 %v8189_v7, %v5259_v61  ;;  %v5119_v53 = vmul.f32 %v8229_v14, %v5080_v41  ;;  %v5298_v21 = vld [vmem:[#allocation4 + $0xca] sm:$0xff] }
 0x4a4   : > { %v5945_v8 = vsel %vm420_vm5, %v5877_v36, 0.0  ;;  %v8235_v51 = vmul.f32 %v8232_v45, %v5296_v24  ;;  %v5622_v54 = vadd.f32 %v5588_v2, %v5515_v17  ;;  %v5663_v23 = vmul.f32 %v7964_v47, %v5296_v24  ;;  %v5553_v61 = vld [vmem:[#allocation4 + $0xcb] sm:$0xff] }
 0x4a5   : > { %5946 = vadd.xlane.f32.xlu0 %v5945_v8  ;;  %v5771_v11 = vadd.f32 %v5737_v12, %v5696_v48  ;;  %v5590_v37 = vmul.f32 %v7958_v29, %v5551_v32  ;;  %v5441_v7 = vadd.f32 %v5407_v46, %v5366_v9  ;;  %v5482_v60 = vmul.f32 %v8239_v22, %v5295_v35 }
 0x4a6   : > { %v5260_v63 = vadd.f32 %v5226_v4, %v5119_v53  ;;  %v5697_v50 = vadd.f32 %v5663_v23, %v5622_v54  ;;  %v5738_v58 = vmul.f32 %v7974_v10, %v5551_v32  ;;  %v5227_v2 = vmul.f32 %v8220_v42, %v5188_v34  ;;  %v5082_v34 = vld [vmem:[#allocation4 + $0xb8] sm:$0xff]  ;;  %v5191_v4 = vld [vmem:[#allocation4 + $0xc9] sm:$0xff]  ;;  %v5083_v54 = vld [vmem:[#allocation4 + $0xc0] sm:$0xff] }
 0x4a7   : > { %v5878_v39 = vadd.f32 %v5844_v6, %v5771_v11  ;;  %v5845_v47 = vmul.f32 %v7981_v16, %v5806_v31  ;;  %v5516_v1 = vadd.f32 %v5482_v60, %v5441_v7  ;;  %v5408_v13 = vmul.f32 %v8246_v49, %v5189_v33  ;;  %v5299_v6 = vld [vmem:[#allocation4 + $0xd2] sm:$0xff] }
 0x4a8   : > { %v5367_v29 = vadd.f32 %v8203_v0, %v5260_v63  ;;  %v5772_v28 = vadd.f32 %v5738_v58, %v5697_v50  ;;  %v8251_v5 = vmul.f32 %v8232_v45, %v5297_v43  ;;  %v5120_v10 = vmul.f32 %v8229_v14, %v5081_v56 }
 0x4a9   : > { %v5948_v35 = vsel %vm420_vm5, %v5878_v39, 0.0  ;;  %v5623_v57 = vadd.f32 %v5589_v15, %v5516_v1  ;;  %v5664_v19 = vmul.f32 %v8254_v44, %v5297_v43  ;;  %v5483_v26 = vmul.f32 %v8239_v22, %v5296_v24 }
 0x4aa   : > { %5949 = vadd.xlane.f32.xlu1 %v5948_v35  ;;  %v5442_v0 = vadd.f32 %v5408_v13, %v5367_v29  ;;  %v5879_v25 = vadd.f32 %v5845_v47, %v5772_v28  ;;  %v5591_v30 = vmul.f32 %v8258_v3, %v5552_v52  ;;  %v5228_v20 = vmul.f32 %v8220_v42, %v5189_v33  ;;  %v5554_v47 = vld [vmem:[#allocation4 + $0xd3] sm:$0xff] }
 0x4ab   : > { %v5261_v55 = vadd.f32 %v5227_v2, %v5120_v10  ;;  %v5698_v27 = vadd.f32 %v5664_v19, %v5623_v57  ;;  %v5739_v62 = vmul.f32 %v8262_v38, %v5552_v52  ;;  %v5846_v41 = vmul.f32 %v7981_v16, %v5807_v59  ;;  %v5808_v16 = vld [vmem:[#allocation4 + $0xcc] sm:$0xff]  ;;  %v5809_v13 = vld [vmem:[#allocation4 + $0xd4] sm:$0xff] }
 0x4ac   : > { %v5517_v36 = vadd.f32 %v5483_v26, %v5442_v0  ;;  %v5951_v24 = vsel %vm420_vm5, %v5879_v25, 0.0  ;;  %v5409_v15 = vmul.f32 %v8246_v49, %v5190_v40  ;;  %v5121_v48 = vmul.f32 %v8229_v14, %v5082_v34  ;;  %v5084_v59 = vld [vmem:[#allocation4 + $0xc8] sm:$0xff]  ;;  %v5300_v57 = vld [vmem:[#allocation4 + $0xda] sm:$0xff] }
 0x4ad   : > { %v5368_v46 = vadd.f32 %v8215_v18, %v5261_v55  ;;  %5952 = vadd.xlane.f32.xlu0 %v5951_v24  ;;  %v5773_v12 = vadd.f32 %v5739_v62, %v5698_v27  ;;  %v8271_v17 = vmul.f32 %v8232_v45, %v5298_v21  ;;  %v5665_v8 = vmul.f32 %v8254_v44, %v5298_v21  ;;  %v5810_v24 = vld [vmem:[#allocation4 + $0xdc] sm:$0xff] }
 0x4ae   : > { %v5624_v32 = vadd.f32 %v5590_v37, %v5517_v36  ;;  %v5484_v53 = vmul.f32 %v8239_v22, %v5297_v43  ;;  %v5262_v11 = vadd.f32 %v5228_v20, %v5121_v48  ;;  %v5410_v18 = vmul.f32 %v8246_v49, %v5191_v4  ;;  %v8279_v37 = vld [vmem:[#allocation13 + $0x8] ss:$0 sm:$0xff]  ;;  %v5192_v43 = vld [vmem:[#allocation4 + $0xd1] sm:$0xff] }
 0x4af   : > { %v5443_v9 = vadd.f32 %v5409_v15, %v5368_v46  ;;  %v5880_v23 = vadd.f32 %v5846_v41, %v5773_v12  ;;  %v5740_v33 = vmul.f32 %v8262_v38, %v5553_v61  ;;  %v5229_v7 = vmul.f32 %v8220_v42, %v5190_v40  ;;  %v5301_v15 = vld [vmem:[#allocation4 + $0xe2] sm:$0xff] }
 0x4b0   : > { %v5699_v31 = vadd.f32 %v5665_v8, %v5624_v32  ;;  %v5592_v60 = vmul.f32 %v8258_v3, %v5553_v61  ;;  %v5847_v63 = vmul.f32 %v8279_v37, %v5808_v16  ;;  %v5369_v39 = vadd.f32 %v8235_v51, %v5262_v11  ;;  %v5193_v61 = vld [vmem:[#allocation4 + $0xd9] sm:$0xff] }
 0x4b1   : > { %v5518_v56 = vadd.f32 %v5484_v53, %v5443_v9  ;;  %v5954_v50 = vsel %vm420_vm5, %v5880_v23, 0.0  ;;  %v8285_v2 = vmul.f32 %v8232_v45, %v5299_v6  ;;  %v5122_v1 = vmul.f32 %v8229_v14, %v5083_v54  ;;  %v5556_v54 = vld [vmem:[#allocation4 + $0xe3] sm:$0xff] }
 0x4b2   : > { %v5774_v58 = vadd.f32 %v5740_v33, %v5699_v31  ;;  %5955 = vadd.xlane.f32.xlu1 %v5954_v50  ;;  %v5666_v29 = vmul.f32 %v8254_v44, %v5299_v6  ;;  %v5444_v35 = vadd.f32 %v5410_v18, %v5369_v39  ;;  %v5485_v28 = vmul.f32 %v8239_v22, %v5298_v21 }
 0x4b3   : > { %v5625_v52 = vadd.f32 %v5591_v30, %v5518_v56  ;;  %v5230_v10 = vmul.f32 %v8220_v42, %v5191_v4  ;;  %v5263_v19 = vadd.f32 %v5229_v7, %v5122_v1  ;;  %v5411_v0 = vmul.f32 %v8246_v49, %v5192_v43  ;;  %v5555_v30 = vld [vmem:[#allocation4 + $0xdb] sm:$0xff] }
 0x4b4   : > { %v5881_v51 = vadd.f32 %v5847_v63, %v5774_v58  ;;  %v5593_v26 = vmul.f32 %v8258_v3, %v5554_v47  ;;  %v5741_v34 = vmul.f32 %v8262_v38, %v5554_v47  ;;  %v5519_v25 = vadd.f32 %v5485_v28, %v5444_v35  ;;  %v5194_v58 = vld [vmem:[#allocation4 + $0xe1] sm:$0xff] }
 0x4b5   : > { %v5700_v40 = vadd.f32 %v5666_v29, %v5625_v52  ;;  %v5848_v55 = vmul.f32 %v8279_v37, %v5809_v13  ;;  %v5370_v21 = vadd.f32 %v8251_v5, %v5263_v19  ;;  %v5123_v27 = vmul.f32 %v8229_v14, %v5084_v59  ;;  %v5085_v5 = vld [vmem:[#allocation4 + $0xd0] sm:$0xff] }
 0x4b6   : > { %v5957_v20 = vsel %vm420_vm5, %v5881_v51, 0.0  ;;  %v8299_v41 = vmul.f32 %v8232_v45, %v5300_v57  ;;  %v5626_v36 = vadd.f32 %v5592_v60, %v5519_v25  ;;  %v5667_v4 = vmul.f32 %v8254_v44, %v5300_v57  ;;  %v5811_v60 = vld [vmem:[#allocation4 + $0xe4] sm:$0xff] }
 0x4b7   : > { %5958 = vadd.xlane.f32.xlu0 %v5957_v20  ;;  %v5775_v62 = vadd.f32 %v5741_v34, %v5700_v40  ;;  %v5594_v46 = vmul.f32 %v8258_v3, %v5555_v30  ;;  %v5445_v48 = vadd.f32 %v5411_v0, %v5370_v21  ;;  %v5486_v12 = vmul.f32 %v8239_v22, %v5299_v6  ;;  %v5302_v29 = vld [vmem:[#allocation4 + $0xea] sm:$0xff] }
 0x4b8   : > { %v5264_v32 = vadd.f32 %v5230_v10, %v5123_v27  ;;  %v5701_v16 = vadd.f32 %v5667_v4, %v5626_v36  ;;  %v5742_v9 = vmul.f32 %v8262_v38, %v5555_v30  ;;  %v5231_v53 = vmul.f32 %v8220_v42, %v5192_v43  ;;  %v5557_v10 = vld [vmem:[#allocation4 + $0xeb] sm:$0xff]  ;;  %v5087_v4 = vld [vmem:[#allocation4 + $0xe0] sm:$0xff] }
 0x4b9   : > { %v5882_v8 = vadd.f32 %v5848_v55, %v5775_v62  ;;  %v5849_v11 = vmul.f32 %v8279_v37, %v5810_v24  ;;  %v5520_v18 = vadd.f32 %v5486_v12, %v5445_v48  ;;  %v5412_v31 = vmul.f32 %v8246_v49, %v5193_v61  ;;  %v5812_v20 = vld [vmem:[#allocation4 + $0xec] sm:$0xff] }
 0x4ba   : > { %v5371_v23 = vadd.f32 %v8271_v17, %v5264_v32  ;;  %v5776_v7 = vadd.f32 %v5742_v9, %v5701_v16  ;;  %v8311_v6 = vmul.f32 %v8232_v45, %v5301_v15  ;;  %v5124_v63 = vmul.f32 %v8229_v14, %v5085_v5  ;;  %v5086_v17 = vld [vmem:[#allocation4 + $0xd8] sm:$0xff]  ;;  %v5195_v55 = vld [vmem:[#allocation4 + $0xe9] sm:$0xff] }
 0x4bb   : > { %v5960_v33 = vsel %vm420_vm5, %v5882_v8, 0.0  ;;  %v5627_v56 = vadd.f32 %v5593_v26, %v5520_v18  ;;  %v5668_v39 = vmul.f32 %v8254_v44, %v5301_v15  ;;  %v5487_v50 = vmul.f32 %v8239_v22, %v5300_v57  ;;  %v5303_v27 = vld [vmem:[#allocation4 + $0xf2] sm:$0xff] }
 0x4bc   : > { %5961 = vadd.xlane.f32.xlu1 %v5960_v33  ;;  %v5446_v43 = vadd.f32 %v5412_v31, %v5371_v23  ;;  %v5883_v47 = vadd.f32 %v5849_v11, %v5776_v7  ;;  %v5595_v1 = vmul.f32 %v8258_v3, %v5556_v54  ;;  %v5232_v52 = vmul.f32 %v8220_v42, %v5193_v61  ;;  %v5196_v16 = vld [vmem:[#allocation4 + $0xf1] sm:$0xff]  ;;  %v5088_v7 = vld [vmem:[#allocation4 + $0xe8] sm:$0xff] }
 0x4bd   : > { %v5265_v13 = vadd.f32 %v5231_v53, %v5124_v63  ;;  %v5702_v35 = vadd.f32 %v5668_v39, %v5627_v56  ;;  %v5743_v28 = vmul.f32 %v8262_v38, %v5556_v54  ;;  %v5850_v59 = vmul.f32 %v8279_v37, %v5811_v60  ;;  %v5558_v11 = vld [vmem:[#allocation4 + $0xf3] sm:$0xff] }
 0x4be   : > { %v5521_v51 = vadd.f32 %v5487_v50, %v5446_v43  ;;  %v5963_v19 = vsel %vm420_vm5, %v5883_v47, 0.0  ;;  %v5413_v0 = vmul.f32 %v8246_v49, %v5194_v58  ;;  %v5125_v26 = vmul.f32 %v8229_v14, %v5086_v17  ;;  %v5813_v31 = vld [vmem:[#allocation4 + $0xf4] sm:$0xff] }
 0x4bf   : > { %v5372_v57 = vadd.f32 %v8285_v2, %v5265_v13  ;;  %5964 = vadd.xlane.f32.xlu0 %v5963_v19  ;;  %v5777_v40 = vadd.f32 %v5743_v28, %v5702_v35  ;;  %v8325_v34 = vmul.f32 %v8232_v45, %v5302_v29  ;;  %v5669_v30 = vmul.f32 %v8254_v44, %v5302_v29  ;;  %v5304_v56 = vld [vmem:[#allocation4 + $0xfa] sm:$0xff] }
 0x4c0   : > { %v5628_v25 = vadd.f32 %v5594_v46, %v5521_v51  ;;  %v5596_v21 = vmul.f32 %v8258_v3, %v5557_v10  ;;  %v5488_v2 = vmul.f32 %v8239_v22, %v5301_v15  ;;  %v5266_v36 = vadd.f32 %v5232_v52, %v5125_v26  ;;  %v5814_v19 = vld [vmem:[#allocation4 + $0xfc] sm:$0xff] }
 0x4c1   : > { %v5447_v62 = vadd.f32 %v5413_v0, %v5372_v57  ;;  %v5884_v24 = vadd.f32 %v5850_v59, %v5777_v40  ;;  %v5744_v48 = vmul.f32 %v8262_v38, %v5557_v10  ;;  %v5233_v12 = vmul.f32 %v8220_v42, %v5194_v58  ;;  %v5197_v57 = vld [vmem:[#allocation4 + $0xf9] sm:$0xff]  ;;  %v5305_v26 = vld [vmem:[#allocation4 + $0x102] sm:$0xff] }
 0x4c2   : > { %v5703_v61 = vadd.f32 %v5669_v30, %v5628_v25  ;;  %v5851_v46 = vmul.f32 %v8279_v37, %v5812_v20  ;;  %v5373_v5 = vadd.f32 %v8299_v41, %v5266_v36  ;;  %v5414_v8 = vmul.f32 %v8246_v49, %v5195_v55 }
 0x4c3   : > { %v5522_v32 = vadd.f32 %v5488_v2, %v5447_v62  ;;  %v5966_v9 = vsel %vm420_vm5, %v5884_v24, 0.0  ;;  %v8337_v15 = vmul.f32 %v8232_v45, %v5303_v27  ;;  %v5126_v18 = vmul.f32 %v8229_v14, %v5087_v4  ;;  %v5560_v4 = vld [vmem:[#allocation4 + $0x103] sm:$0xff] }
 0x4c4   : > { %v5778_v53 = vadd.f32 %v5744_v48, %v5703_v61  ;;  %5967 = vadd.xlane.f32.xlu1 %v5966_v9  ;;  %v5670_v23 = vmul.f32 %v8254_v44, %v5303_v27  ;;  %v5448_v33 = vadd.f32 %v5414_v8, %v5373_v5  ;;  %v5489_v41 = vmul.f32 %v8239_v22, %v5302_v29 }
 0x4c5   : > { %v5629_v54 = vadd.f32 %v5595_v1, %v5522_v32  ;;  %v5234_v63 = vmul.f32 %v8220_v42, %v5195_v55  ;;  %v5267_v39 = vadd.f32 %v5233_v12, %v5126_v18  ;;  %v5415_v43 = vmul.f32 %v8246_v49, %v5196_v16  ;;  %v5559_v1 = vld [vmem:[#allocation4 + $0xfb] sm:$0xff] }
 0x4c6   : > { %v5885_v60 = vadd.f32 %v5851_v46, %v5778_v53  ;;  %v5597_v50 = vmul.f32 %v8258_v3, %v5558_v11  ;;  %v5745_v17 = vmul.f32 %v8262_v38, %v5558_v11  ;;  %v5523_v47 = vadd.f32 %v5489_v41, %v5448_v33  ;;  %v5815_v46 = vld [vmem:[#allocation4 + $0x104] sm:$0xff] }
 0x4c7   : > { %v5704_v58 = vadd.f32 %v5670_v23, %v5629_v54  ;;  %v5852_v13 = vmul.f32 %v8279_v37, %v5813_v31  ;;  %v5374_v29 = vadd.f32 %v8311_v6, %v5267_v39  ;;  %v5127_v35 = vmul.f32 %v8229_v14, %v5088_v7  ;;  %v5089_v6 = vld [vmem:[#allocation4 + $0xf0] sm:$0xff]  ;;  %v5198_v53 = vld [vmem:[#allocation4 + $0x101] sm:$0xff] }
 0x4c8   : > { %v5969_v52 = vsel %vm420_vm5, %v5885_v60, 0.0  ;;  %v8351_v59 = vmul.f32 %v8232_v45, %v5304_v56  ;;  %v5630_v51 = vadd.f32 %v5596_v21, %v5523_v47  ;;  %v5671_v10 = vmul.f32 %v8254_v44, %v5304_v56  ;;  %v5306_v23 = vld [vmem:[#allocation4 + $0x10a] sm:$0xff] }
 0x4c9   : > { %5970 = vadd.xlane.f32.xlu0 %v5969_v52  ;;  %v5779_v28 = vadd.f32 %v5745_v17, %v5704_v58  ;;  %v5598_v0 = vmul.f32 %v8258_v3, %v5559_v1  ;;  %v5449_v40 = vadd.f32 %v5415_v43, %v5374_v29  ;;  %v5490_v25 = vmul.f32 %v8239_v22, %v5303_v27  ;;  %v5816_v52 = vld [vmem:[#allocation4 + $0x10c] sm:$0xff] }
 0x4ca   : > { %v5268_v30 = vadd.f32 %v5234_v63, %v5127_v35  ;;  %v5705_v55 = vadd.f32 %v5671_v10, %v5630_v51  ;;  %v5746_v62 = vmul.f32 %v8262_v38, %v5559_v1  ;;  %v5235_v2 = vmul.f32 %v8220_v42, %v5196_v16  ;;  %v5561_v63 = vld [vmem:[#allocation4 + $0x10b] sm:$0xff]  ;;  %v5091_v10 = vld [vmem:[#allocation4 + $0x100] sm:$0xff] }
 0x4cb   : > { %v5886_v20 = vadd.f32 %v5852_v13, %v5779_v28  ;;  %v5853_v21 = vmul.f32 %v8279_v37, %v5814_v19  ;;  %v5524_v36 = vadd.f32 %v5490_v25, %v5449_v40  ;;  %v5416_v61 = vmul.f32 %v8246_v49, %v5197_v57  ;;  %v5199_v13 = vld [vmem:[#allocation4 + $0x109] sm:$0xff]  ;;  %v5455_v28 = vld [vmem:[#allocation4 + $0x112] sm:$0xff] }
 0x4cc   : > { %v5375_v24 = vadd.f32 %v8325_v34, %v5268_v30  ;;  %v5780_v12 = vadd.f32 %v5746_v62, %v5705_v55  ;;  %v8363_v27 = vmul.f32 %v8232_v45, %v5305_v26  ;;  %v5128_v32 = vmul.f32 %v8229_v14, %v5089_v6  ;;  %v5090_v34 = vld [vmem:[#allocation4 + $0xf8] sm:$0xff] }
 0x4cd   : > { %v5972_v48 = vsel %vm420_vm5, %v5886_v20, 0.0  ;;  %v5631_v5 = vadd.f32 %v5597_v50, %v5524_v36  ;;  %v5672_v8 = vmul.f32 %v8254_v44, %v5305_v26  ;;  %v5491_v9 = vmul.f32 %v8239_v22, %v5304_v56  ;;  %v5380_v20 = vld [vmem:[#allocation4 + $0x111] sm:$0xff]  ;;  %v5092_v36 = vld [vmem:[#allocation4 + $0x108] sm:$0xff] }
 0x4ce   : > { %5973 = vadd.xlane.f32.xlu1 %v5972_v48  ;;  %v5450_v16 = vadd.f32 %v5416_v61, %v5375_v24  ;;  %v5887_v11 = vadd.f32 %v5853_v21, %v5780_v12  ;;  %v5599_v18 = vmul.f32 %v8258_v3, %v5560_v4  ;;  %v5236_v54 = vmul.f32 %v8220_v42, %v5197_v57  ;;  %v5817_v24 = vld [vmem:[#allocation4 + $0x114] sm:$0xff] }
 0x4cf   : > { %v5269_v31 = vadd.f32 %v5235_v2, %v5128_v32  ;;  %v5706_v33 = vadd.f32 %v5672_v8, %v5631_v5  ;;  %v5747_v41 = vmul.f32 %v8262_v38, %v5560_v4  ;;  %v5854_v7 = vmul.f32 %v8279_v37, %v5815_v46  ;;  %v5456_v12 = vld [vmem:[#allocation4 + $0x11a] sm:$0xff] }
 0x4d0   : > { %v5525_v60 = vadd.f32 %v5491_v9, %v5450_v16  ;;  %v5975_v39 = vsel %vm420_vm5, %v5887_v11, 0.0  ;;  %v5417_v43 = vmul.f32 %v8246_v49, %v5198_v53  ;;  %v5129_v50 = vmul.f32 %v8229_v14, %v5090_v34  ;;  %v5381_v8 = vld [vmem:[#allocation4 + $0x119] sm:$0xff]  ;;  %v7188_v34 = vld [vmem:[#allocation3 + $0x48] sm:$0xff] }
 0x4d1   : > { %v5376_v56 = vadd.f32 %v8337_v15, %v5269_v31  ;;  %5976 = vadd.xlane.f32.xlu0 %v5975_v39  ;;  %v5781_v58 = vadd.f32 %v5747_v41, %v5706_v33  ;;  %v5345_v17 = vmul.f32 %v8232_v45, %v5306_v23  ;;  %v5673_v1 = vmul.f32 %v8254_v44, %v5306_v23 }
 0x4d2   : > { %v5632_v47 = vadd.f32 %v5598_v0, %v5525_v60  ;;  %v5600_v29 = vmul.f32 %v8258_v3, %v5561_v63  ;;  %v5492_v51 = vmul.f32 %v8239_v22, %v5305_v26  ;;  %v5270_v15 = vadd.f32 %v5236_v54, %v5129_v50  ;;  %v5562_v26 = vld [vmem:[#allocation4 + $0x113] sm:$0xff]  ;;  %460 = vst.msk [vmem:[#allocation4 + $0x130] sm:$0xf] %vm459_vm4, %v7188_v34  ;;  %v5563_v54 = vld [vmem:[#allocation4 + $0x11b] sm:$0xff] }
 0x4d3   : > { %v5451_v35 = vadd.f32 %v5417_v43, %v5376_v56  ;;  %v5888_v19 = vadd.f32 %v5854_v7, %v5781_v58  ;;  %v5748_v40 = vmul.f32 %v8262_v38, %v5561_v63  ;;  %v5237_v25 = vmul.f32 %v8220_v42, %v5198_v53  ;;  %v5637_v7 = vld [vmem:[#allocation4 + $0x122] sm:$0xff] }
 0x4d4   : > { %v5707_v57 = vadd.f32 %v5673_v1, %v5632_v47  ;;  %v5855_v45 = vmul.f32 %v8279_v37, %v5816_v52  ;;  %v5377_v30 = vadd.f32 %v8351_v59, %v5270_v15  ;;  %v5418_v6 = vmul.f32 %v8246_v49, %v5199_v13  ;;  %v5712_v47 = vld [vmem:[#allocation4 + $0x123] sm:$0xff] }
 0x4d5   : > { %v5526_v0 = vadd.f32 %v5492_v51, %v5451_v35  ;;  %v5978_v55 = vsel %vm420_vm5, %v5888_v19, 0.0  ;;  %v5674_v2 = vmul.f32 %v8254_v44, %v5455_v28  ;;  %v5130_v21 = vmul.f32 %v8229_v14, %v5091_v10  ;;  %v5819_v51 = vld [vmem:[#allocation4 + $0x124] sm:$0xff] }
 0x4d6   : > { %v5782_v62 = vadd.f32 %v5748_v40, %v5707_v57  ;;  %5979 = vadd.xlane.f32.xlu1 %v5978_v55  ;;  %v5238_v61 = vmul.f32 %v8220_v42, %v5199_v13  ;;  %v5452_v48 = vadd.f32 %v5418_v6, %v5377_v30  ;;  %v5493_v59 = vmul.f32 %v8239_v22, %v5306_v23  ;;  %v8407_v40 = vld [vmem:[#allocation5] ss:$0 sm:$0xff] }
 0x4d7   : > { %v5633_v4 = vadd.f32 %v5599_v18, %v5526_v0  ;;  %v5271_v32 = vadd.f32 %v5237_v25, %v5130_v21  ;;  %v5419_v5 = vmul.f32 %v8246_v49, %v5380_v20  ;;  %v5749_v9 = vmul.f32 %v8262_v38, %v5562_v26 }
 0x4d8   : > { %v5889_v46 = vadd.f32 %v5855_v45, %v5782_v62  ;;  %v5527_v53 = vadd.f32 %v5493_v59, %v5452_v48  ;;  %v5131_v11 = vmul.f32 %v8229_v14, %v5092_v36  ;;  %v5856_v18 = vmul.f32 %v8279_v37, %v5817_v24  ;;  %v5818_v14 = vld [vmem:[#allocation4 + $0x11c] sm:$0xff] }
 0x4d9   : > { %v5708_v16 = vadd.f32 %v5674_v2, %v5633_v4  ;;  %v5675_v23 = vmul.f32 %v8254_v44, %v5456_v12  ;;  %v5378_v31 = vadd.f32 %v8363_v27, %v5271_v32  ;;  %v5420_v63 = vmul.f32 %v8246_v49, %v5381_v8  ;;  %v5713_v57 = vld [vmem:[#allocation4 + $0x12b] sm:$0xff] }
 0x4da   : > { %v5981_v42 = vsel %vm420_vm5, %v5889_v46, 0.0  ;;  %v5634_v41 = vadd.f32 %v5600_v29, %v5527_v53  ;;  %v5272_v60 = vadd.f32 %v5238_v61, %v5131_v11  ;;  %v5494_v39 = vmul.f32 %v8239_v22, %v5455_v28  ;;  %v5820_v20 = vld [vmem:[#allocation4 + $0x12c] sm:$0xff] }
 0x4db   : > { %5982 = vadd.xlane.f32.xlu0 %v5981_v42  ;;  %v5783_v33 = vadd.f32 %v5749_v9, %v5708_v16  ;;  %v5453_v56 = vadd.f32 %v5419_v5, %v5378_v31  ;;  %v5750_v58 = vmul.f32 %v8262_v38, %v5563_v54  ;;  %v5601_v27 = vmul.f32 %v8258_v3, %v5562_v26 }
 0x4dc   : > { %v5709_v50 = vadd.f32 %v5675_v23, %v5634_v41  ;;  %v5379_v1 = vadd.f32 %v5345_v17, %v5272_v60  ;;  %v5495_v52 = vmul.f32 %v8239_v22, %v5456_v12  ;;  %v5676_v29 = vmul.f32 %v8254_v44, %v5637_v7  ;;  %v5638_v17 = vld [vmem:[#allocation4 + $0x12a] sm:$0xff] }
 0x4dd   : > { %v5890_v43 = vadd.f32 %v5856_v18, %v5783_v33  ;;  %v5528_v13 = vadd.f32 %v5494_v39, %v5453_v56  ;;  %v5857_v28 = vmul.f32 %v8279_v37, %v5818_v14  ;;  %v5751_v19 = vmul.f32 %v8262_v38, %v5712_v47 }
 0x4de   : > { %v5784_v35 = vadd.f32 %v5750_v58, %v5709_v50  ;;  %v5454_v15 = vadd.f32 %v5420_v63, %v5379_v1  ;;  %v5602_v22 = vmul.f32 %v8258_v3, %v5563_v54  ;;  %v5677_v0 = vmul.f32 %v8254_v44, %v5638_v17 }
 0x4df   : > { %v5984_v49 = vsel %vm420_vm5, %v5890_v43, 0.0  ;;  %v5635_v10 = vadd.f32 %v5601_v27, %v5528_v13  ;;  %v5858_v6 = vmul.f32 %v8279_v37, %v5819_v51  ;;  %v5752_v26 = vmul.f32 %v8262_v38, %v5713_v57 }
 0x4e0   : > { %5985 = vadd.xlane.f32.xlu1 %v5984_v49  ;;  %v5891_v25 = vadd.f32 %v5857_v28, %v5784_v35  ;;  %v5529_v45 = vadd.f32 %v5495_v52, %v5454_v15  ;;  %v5859_v24 = vmul.f32 %v8279_v37, %v5820_v20 }
 0x4e1   : > { %v5710_v30 = vadd.f32 %v5676_v29, %v5635_v10 }
 0x4e2   : > { %v5987_v62 = vsel %vm420_vm5, %v5891_v25, 0.0  ;;  %v5636_v3 = vadd.f32 %v5602_v22, %v5529_v45 }
 0x4e3   : > { %v5899_v55 = vpop.xlane.xlu1 %5898  ;;  %v5896_v2 = vpop.xlane.xlu0 %5895  ;;  %5988 = vadd.xlane.f32.xlu0 %v5987_v62  ;;  %v5785_v21 = vadd.f32 %v5751_v19, %v5710_v30 }
 0x4e4   : > { %v6004_v44 = vadd.f32 %v8407_v40, %v5899_v55  ;;  %v6003_v36 = vadd.f32 %v8407_v40, %v5896_v2  ;;  %v5711_v4 = vadd.f32 %v5677_v0, %v5636_v3 }
 0x4e5   : > { %v5892_v61 = vadd.f32 %v5858_v6, %v5785_v21 }
 0x4e6   : > { %6039 = vst.msk [vmem:[%s8414_s16 + $0x8] sm:$0xff] %vm6037_vm10, %v6004_v44  ;;  %6038 = vst.msk [vmem:[%s8414_s16] sm:$0xff] %vm6037_vm10, %v6003_v36  ;;  %v5786_v48 = vadd.f32 %v5752_v26, %v5711_v4 }
 0x4e7   : > { %v5990_v38 = vsel %vm420_vm5, %v5892_v61, 0.0 }
 0x4e8   : > { %5991 = vadd.xlane.f32.xlu1 %v5990_v38  ;;  %v5893_v12 = vadd.f32 %v5859_v24, %v5786_v48 }
 0x4ea   : > { %v5993_v59 = vsel %vm420_vm5, %v5893_v12, 0.0  ;;  %v5902_v46 = vpop.xlane.xlu0 %5901  ;;  %vm6048_vm5 = vcmask 1024  }
 0x4eb   : > { %5994 = vadd.xlane.f32.xlu0 %v5993_v59  ;;  %v6005_v37 = vadd.f32 %v8407_v40, %v5902_v46 }
 0x4ed   : > { %6041 = vst.msk [vmem:[%s8414_s16 + $0xf] sm:$0xfe] %vm6040_vm15, %v6005_v37 }
 0x4ee   : > { %v5905_v32 = vpop.xlane.xlu0 %5904 }
 0x4ef   : > { %v6006_v5 = vadd.f32 %v8407_v40, %v5905_v32 }
 0x4f1   : > { %6042 = vst.msk [vmem:[%s8414_s16 + $0x17] sm:$0xff] %vm6037_vm10, %v6006_v5 }
 0x4f3   : > { %v5908_v8 = vpop.xlane.xlu1 %5907 }
 0x4f4   : > { %v6007_v16 = vadd.f32 %v8407_v40, %v5908_v8 }
 0x4f6   : > { %6044 = vst.msk [vmem:[%s8414_s16 + $0x1f] sm:$0x1] %vm6043_vm0, %v6007_v16  ;;  %v5911_v9 = vpop.xlane.xlu0 %5910 }
 0x4f7   : > { %6046 = vst.msk [vmem:[%s8414_s16 + $0x1e] sm:$0xfc] %vm6045_vm1, %v6007_v16  ;;  %v6008_v53 = vadd.f32 %v8407_v40, %v5911_v9 }
 0x4f9   : > { %6047 = vst.msk [vmem:[%s8414_s16 + $0x26] sm:$0xff] %vm6037_vm10, %v6008_v53 }
 0x4fd   : > { %v5914_v34 = vpop.xlane.xlu1 %5913 }
 0x4fe   : > { %v6009_v11 = vadd.f32 %v8407_v40, %v5914_v34 }
 0x500   : > { %6049 = vst.msk [vmem:[%s8414_s16 + $0x2e] sm:$0x3] %vm6048_vm5, %v6009_v11 }
 0x501   : > { %6051 = vst.msk [vmem:[%s8414_s16 + $0x2d] sm:$0xf8] %vm6050_vm6, %v6009_v11  ;;  %v5917_v42 = vpop.xlane.xlu0 %5916 }
 0x502   : > { %v6010_v18 = vadd.f32 %v8407_v40, %v5917_v42 }
 0x504   : > { %6052 = vst.msk [vmem:[%s8414_s16 + $0x35] sm:$0xff] %vm6037_vm10, %v6010_v18 }
 0x505   : > { %v5920_v54 = vpop.xlane.xlu1 %5919 }
 0x506   : > { %v6011_v23 = vadd.f32 %v8407_v40, %v5920_v54 }
 0x508   : > { %6054 = vst.msk [vmem:[%s8414_s16 + $0x3d] sm:$0x7] %vm6053_vm2, %v6011_v23 }
 0x509   : > { %6056 = vst.msk [vmem:[%s8414_s16 + $0x3c] sm:$0xf0] %vm6055_vm7, %v6011_v23 }
 0x50a   : > { %v5923_v31 = vpop.xlane.xlu0 %5922 }
 0x50b   : > { %v6012_v33 = vadd.f32 %v8407_v40, %v5923_v31 }
 0x50d   : > { %6057 = vst.msk [vmem:[%s8414_s16 + $0x44] sm:$0xff] %vm6037_vm10, %v6012_v33 }
 0x50f   : > { %v5926_v41 = vpop.xlane.xlu1 %5925 }
 0x510   : > { %v6013_v7 = vadd.f32 %v8407_v40, %v5926_v41 }
 0x512   : > { %6059 = vst.msk [vmem:[%s8414_s16 + $0x4c] sm:$0xf] %vm6058_vm8, %v6013_v7  ;;  %v5929_v60 = vpop.xlane.xlu0 %5928 }
 0x513   : > { %6061 = vst.msk [vmem:[%s8414_s16 + $0x4b] sm:$0xe0] %vm6060_vm9, %v6013_v7  ;;  %v6014_v63 = vadd.f32 %v8407_v40, %v5929_v60 }
 0x515   : > { %6062 = vst.msk [vmem:[%s8414_s16 + $0x53] sm:$0xff] %vm6037_vm10, %v6014_v63 }
 0x517   : > { %v5932_v39 = vpop.xlane.xlu1 %5931 }
 0x518   : > { %v6015_v14 = vadd.f32 %v8407_v40, %v5932_v39 }
 0x51a   : > { %6064 = vst.msk [vmem:[%s8414_s16 + $0x5b] sm:$0x1f] %vm6063_vm11, %v6015_v14 }
 0x51b   : > { %6066 = vst.msk [vmem:[%s8414_s16 + $0x5a] sm:$0xc0] %vm6065_vm12, %v6015_v14 }
 0x51c   : > { %v5935_v56 = vpop.xlane.xlu0 %5934 }
 0x51d   : > { %v6016_v43 = vadd.f32 %v8407_v40, %v5935_v56 }
 0x51f   : > { %6067 = vst.msk [vmem:[%s8414_s16 + $0x62] sm:$0xff] %vm6037_vm10, %v6016_v43 }
 0x521   : > { %v5938_v50 = vpop.xlane.xlu1 %5937 }
 0x522   : > { %v6017_v58 = vadd.f32 %v8407_v40, %v5938_v50 }
 0x524   : > { %6069 = vst.msk [vmem:[%s8414_s16 + $0x6a] sm:$0x3f] %vm6068_vm13, %v6017_v58  ;;  %v5941_v47 = vpop.xlane.xlu0 %5940 }
 0x525   : > { %6071 = vst.msk [vmem:[%s8414_s16 + $0x69] sm:$0x80] %vm6070_vm14, %v6017_v58  ;;  %v6018_v1 = vadd.f32 %v8407_v40, %v5941_v47 }
 0x527   : > { %6072 = vst.msk [vmem:[%s8414_s16 + $0x71] sm:$0xff] %vm6037_vm10, %v6018_v1 }
 0x529   : > { %v5944_v27 = vpop.xlane.xlu1 %5943 }
 0x52a   : > { %v6019_v52 = vadd.f32 %v8407_v40, %v5944_v27 }
 0x52c   : > { %6074 = vst.msk [vmem:[%s8414_s16 + $0x79] sm:$0x7f] %vm6073_vm3, %v6019_v52 }
 0x52e   : > { %v5947_v13 = vpop.xlane.xlu0 %5946 }
 0x52f   : > { %v6020_v29 = vadd.f32 %v8407_v40, %v5947_v13 }
 0x531   : > { %6075 = vst.msk [vmem:[%s8414_s16 + $0x80] sm:$0xff] %vm6037_vm10, %v6020_v29 }
 0x533   : > { %v5950_v49 = vpop.xlane.xlu1 %5949 }
 0x534   : > { %v6021_v35 = vadd.f32 %v8407_v40, %v5950_v49 }
 0x536   : > { %6076 = vst.msk [vmem:[%s8414_s16 + $0x88] sm:$0xff] %vm6037_vm10, %v6021_v35  ;;  %v5953_v28 = vpop.xlane.xlu0 %5952 }
 0x537   : > { %v6022_v51 = vadd.f32 %v8407_v40, %v5953_v28 }
 0x539   : > { %6077 = vst.msk [vmem:[%s8414_s16 + $0x8f] sm:$0xfe] %vm6040_vm15, %v6022_v51 }
 0x53b   : > { %v5956_v15 = vpop.xlane.xlu1 %5955 }
 0x53c   : > { %v6023_v10 = vadd.f32 %v8407_v40, %v5956_v15 }
 0x53e   : > { %6078 = vst.msk [vmem:[%s8414_s16 + $0x97] sm:$0xff] %vm6037_vm10, %v6023_v10 }
 0x540   : > { %v5959_v19 = vpop.xlane.xlu0 %5958 }
 0x541   : > { %v6024_v17 = vadd.f32 %v8407_v40, %v5959_v19 }
 0x543   : > { %6079 = vst.msk [vmem:[%s8414_s16 + $0x9f] sm:$0x1] %vm6043_vm0, %v6024_v17 }
 0x544   : > { %6080 = vst.msk [vmem:[%s8414_s16 + $0x9e] sm:$0xfc] %vm6045_vm1, %v6024_v17 }
 0x545   : > { %v5962_v57 = vpop.xlane.xlu1 %5961 }
 0x546   : > { %v6025_v22 = vadd.f32 %v8407_v40, %v5962_v57 }
 0x548   : > { %6081 = vst.msk [vmem:[%s8414_s16 + $0xa6] sm:$0xff] %vm6037_vm10, %v6025_v22  ;;  %v5965_v25 = vpop.xlane.xlu0 %5964 }
 0x549   : > { %v6026_v45 = vadd.f32 %v8407_v40, %v5965_v25 }
 0x54b   : > { %6082 = vst.msk [vmem:[%s8414_s16 + $0xae] sm:$0x3] %vm6048_vm5, %v6026_v45 }
 0x54c   : > { %6083 = vst.msk [vmem:[%s8414_s16 + $0xad] sm:$0xf8] %vm6050_vm6, %v6026_v45 }
 0x54d   : > { %v5968_v0 = vpop.xlane.xlu1 %5967 }
 0x54e   : > { %v6027_v30 = vadd.f32 %v8407_v40, %v5968_v0 }
 0x550   : > { %6084 = vst.msk [vmem:[%s8414_s16 + $0xb5] sm:$0xff] %vm6037_vm10, %v6027_v30 }
 0x552   : > { %v5971_v6 = vpop.xlane.xlu0 %5970 }
 0x553   : > { %v6028_v20 = vadd.f32 %v8407_v40, %v5971_v6 }
 0x555   : > { %6085 = vst.msk [vmem:[%s8414_s16 + $0xbd] sm:$0x7] %vm6053_vm2, %v6028_v20 }
 0x556   : > { %6086 = vst.msk [vmem:[%s8414_s16 + $0xbc] sm:$0xf0] %vm6055_vm7, %v6028_v20 }
 0x557   : > { %v5974_v55 = vpop.xlane.xlu1 %5973 }
 0x558   : > { %v6029_v62 = vadd.f32 %v8407_v40, %v5974_v55 }
 0x55a   : > { %6087 = vst.msk [vmem:[%s8414_s16 + $0xc4] sm:$0xff] %vm6037_vm10, %v6029_v62  ;;  %v5977_v3 = vpop.xlane.xlu0 %5976 }
 0x55b   : > { %v6030_v26 = vadd.f32 %v8407_v40, %v5977_v3 }
 0x55d   : > { %6088 = vst.msk [vmem:[%s8414_s16 + $0xcc] sm:$0xf] %vm6058_vm8, %v6030_v26 }
 0x55e   : > { %6089 = vst.msk [vmem:[%s8414_s16 + $0xcb] sm:$0xe0] %vm6060_vm9, %v6030_v26 }
 0x55f   : > { %v5980_v44 = vpop.xlane.xlu1 %5979 }
 0x560   : > { %v6031_v2 = vadd.f32 %v8407_v40, %v5980_v44 }
 0x562   : > { %6090 = vst.msk [vmem:[%s8414_s16 + $0xd3] sm:$0xff] %vm6037_vm10, %v6031_v2 }
 0x564   : > { %v5983_v21 = vpop.xlane.xlu0 %5982 }
 0x565   : > { %v6032_v36 = vadd.f32 %v8407_v40, %v5983_v21 }
 0x567   : > { %6091 = vst.msk [vmem:[%s8414_s16 + $0xdb] sm:$0x1f] %vm6063_vm11, %v6032_v36 }
 0x568   : > { %6092 = vst.msk [vmem:[%s8414_s16 + $0xda] sm:$0xc0] %vm6065_vm12, %v6032_v36 }
 0x569   : > { %v5986_v4 = vpop.xlane.xlu1 %5985 }
 0x56a   : > { %v6033_v24 = vadd.f32 %v8407_v40, %v5986_v4 }
 0x56c   : > { %6093 = vst.msk [vmem:[%s8414_s16 + $0xe2] sm:$0xff] %vm6037_vm10, %v6033_v24  ;;  %v5989_v61 = vpop.xlane.xlu0 %5988 }
 0x56d   : > { %v6034_v48 = vadd.f32 %v8407_v40, %v5989_v61 }
 0x56f   : > { %6094 = vst.msk [vmem:[%s8414_s16 + $0xea] sm:$0x3f] %vm6068_vm13, %v6034_v48 }
 0x570   : > { %6095 = vst.msk [vmem:[%s8414_s16 + $0xe9] sm:$0x80] %vm6070_vm14, %v6034_v48 }
 0x571   : > { %v5992_v38 = vpop.xlane.xlu1 %5991 }
 0x572   : > { %v6035_v12 = vadd.f32 %v8407_v40, %v5992_v38 }
 0x574   : > { %6096 = vst.msk [vmem:[%s8414_s16 + $0xf1] sm:$0xff] %vm6037_vm10, %v6035_v12  ;;  %v5995_v59 = vpop.xlane.xlu0 %5994 }
 0x575   : > { %v6036_v46 = vadd.f32 %v8407_v40, %v5995_v59 }
 0x577   : > { %6097 = vst.msk [vmem:[%s8414_s16 + $0xf9] sm:$0x7f] %vm6073_vm3, %v6036_v46 }
 0x578 PF: > { %s24_s11 = sadd.s32 1, %s7337_s11  }
 0x579   : > { %p21_p2 = scmp.ge.s32.totalorder %s24_s11, 4  }
 0x57b   :  { %23 = sbr.rel (!%p21_p2) target bundleno = 6 (0x6), region = 169 }
 0x580   :  { %6119 = vsyncpa [#allocation7], 1 }
 0x581   :  { %6121 = vsyncpa [#allocation7 + $0x1], 1 }
 0x582   :  { %6122 = vsyncpa [#allocation9], 1 }
 0x583   :  { %6123 = vsyncpa [#allocation12], 1 }

</bundles_post_ra>
